<compile_context>
chip_gen: v7x
topology: tpu7x:2x2x1
jax: 0.10.0
libtpu: 0.0.40
codegen_flags: <defaults>
</compile_context>

<pallas_src>
from functools import partial

import numpy as np
import jax
import jax.numpy as jnp
from jax.experimental import pallas as pl
from jax.experimental.pallas import tpu as pltpu

TAPS = tuple((ky, kx) for ky in range(3) for kx in range(3))

# Column layout of the packed affine/scalar parameter array (R, 18).
_A_S1A, _A_B1A, _A_S2A, _A_B2A, _A_S3A, _A_B3A = 0, 1, 2, 3, 4, 5
_A_S1B, _A_B1B, _A_S2B, _A_B2B, _A_S3B, _A_B3B = 6, 7, 8, 9, 10, 11
_A_WP, _A_WX, _A_SC, _A_BC, _A_WO, _A_BO = 12, 13, 14, 15, 16, 17
_A_COLS = 18


# ----------------------------------------------------------------------------
# Fused kernel (grid = (B,), one image per grid step)
# ----------------------------------------------------------------------------
def _drd2_kernel(x_ref, pcs_ref, xcs_ref, gp_ref, gx_ref, mask_ref,
                 w11_ref, w33_ref, wout_ref, aff_ref, o_ref,
                 *, H, W, C, Cm, mm_dtype):
    f32 = jnp.float32
    HW = H * W

    def mm(a, b):                       # MXU matmul with f32 accumulation
        return jnp.dot(a.astype(mm_dtype), b.astype(mm_dtype),
                       preferred_element_type=f32)

    # ---- prior stage: upsample + |FFT2| + sigmoid reverse map --------------
    # One matmul per prior: small_row @ [M | M@Re(KD) | M@Im(KD)].
    def prior_branch(small_ref, g_ref):
        s = small_ref[0]                                            # (1, S)
        t = jnp.dot(s, g_ref[...], preferred_element_type=f32)     # (1, 3*HW)
        up = t[:, 0:HW]
        fre = t[:, HW:2 * HW]
        fim = t[:, 2 * HW:3 * HW]
        mag = jnp.sqrt(fre * fre + fim * fim)
        rev = (1.0 - jax.nn.sigmoid(mag)) + (1.0 - jax.nn.sigmoid(up))
        return up, rev

    pc, rev_p = prior_branch(pcs_ref, gp_ref)        # interpolated prior_cam
    xc, rev_x = prior_branch(xcs_ref, gx_ref)        # interpolated x1
    r = rev_p + rev_x                                 # reverse-attention map

    # ---- conv trunk, channel-major (C, HW) ----------------------------------
    x = x_ref[0]                                      # (C, HW)
    masks = mask_ref[...]                             # (9, HW) boundary masks
    aff = aff_ref[...]                                # (R, 18) packed params

    def col(i, n):                                    # per-channel column
        return aff[:n, i:i + 1]                       # (n, 1)

    def affine(h, si, bi, n):                         # folded Conv-bias + BN
        return h * col(si, n) + col(bi, n)

    def taps(h):
        """Stack the 9 shifted / zero-padded copies of h along K -> (9*Cin, HW)."""
        pieces = []
        for t, (ky, kx) in enumerate(TAPS):
            dy, dx = ky - 1, kx - 1
            shift = (-(dy * W + dx)) % HW
            v = h if shift == 0 else pltpu.roll(h, shift=shift, axis=1)
            if dy != 0 or dx != 0:
                v = v * masks[t:t + 1, :]
            pieces.append(v)
        return jnp.concatenate(pieces, axis=0)

    # ---- self.conv : Conv1x1(3C->C)+BN, Conv3x3+BN, Conv3x3+BN, ReLU --------
    # The 1x1 conv of cat([X, prior.expand(C), x1.expand(C)]) = matmul on X
    # plus two broadcast rank-1 terms (broadcast-channel weights pre-summed).
    h = mm(w11_ref[0], x) + col(_A_WP, C) * pc + col(_A_WX, C) * xc
    h = affine(h, _A_S1A, _A_B1A, C)
    h = affine(mm(w33_ref[0], taps(h)), _A_S2A, _A_B2A, C)
    h = jnp.maximum(affine(mm(w33_ref[1], taps(h)), _A_S3A, _A_B3A, C), 0.0)  # yt

    # ---- self.conv3 ----------------------------------------------------------
    g = affine(mm(w11_ref[1], h), _A_S1B, _A_B1B, C)
    g = affine(mm(w33_ref[2], taps(g)), _A_S2B, _A_B2B, C)
    g = jnp.maximum(affine(mm(w33_ref[3], taps(g)), _A_S3B, _A_B3B, C), 0.0)  # yt_s

    # ---- self.out on cat([y_ra, yt_s]) + residual ---------------------------
    y_ra = x * r
    patch = jnp.concatenate([taps(y_ra), taps(g)], axis=0)        # (18C, HW)
    hm = jnp.maximum(affine(mm(wout_ref[...], patch), _A_SC, _A_BC, Cm), 0.0)

    # Cm -> 1 conv as VPU multiply + sublane reduction; residual add fused.
    bo = aff[0:1, _A_BO:_A_BO + 1]
    y = jnp.sum(hm * col(_A_WO, Cm), axis=0, keepdims=True) + bo
    y = y + pc + xc
    o_ref[...] = y.reshape(1, 1, HW)


# ----------------------------------------------------------------------------
# BlockSpec helpers (grid = (B,))
# ----------------------------------------------------------------------------
def _const_spec(arr):
    nd = arr.ndim
    return pl.BlockSpec(tuple(arr.shape), lambda b, _n=nd: (0,) * _n)


def _batch_spec(arr):
    nd = arr.ndim
    return pl.BlockSpec((1,) + tuple(arr.shape[1:]),
                        lambda b, _n=nd: (b,) + (0,) * (_n - 1))


# ----------------------------------------------------------------------------
# Forward wrapper (only contiguous reshapes in plain JAX)
# ----------------------------------------------------------------------------
def drd2_forward(X, x1, prior_cam, kp, *, use_bf16_matmul=False):
    B, C, H, W = X.shape
    HW = H * W
    Cm = kp["wout"].shape[0]
    f32 = jnp.float32

    x_cm = X.reshape(B, C, HW)                                   # contiguous
    pcs = prior_cam.reshape(B, 1, prior_cam.shape[2] * prior_cam.shape[3])
    xcs = x1.reshape(B, 1, x1.shape[2] * x1.shape[3])

    operands = (x_cm, pcs, xcs, kp["Gp"], kp["Gx"], kp["masks"],
                kp["w11"], kp["w33"], kp["wout"], kp["aff"])
    in_specs = ([_batch_spec(x_cm), _batch_spec(pcs), _batch_spec(xcs)]
                + [_const_spec(kp[k]) for k in
                   ("Gp", "Gx", "masks", "w11", "w33", "wout", "aff")])

    y = pl.pallas_call(
        partial(_drd2_kernel, H=H, W=W, C=C, Cm=Cm,
                mm_dtype=jnp.bfloat16 if use_bf16_matmul else f32),
        grid=(B,),
        in_specs=in_specs,
        out_specs=pl.BlockSpec((1, 1, HW), lambda b: (b, 0, 0)),
        out_shape=jax.ShapeDtypeStruct((B, 1, HW), f32),
        compiler_params=pltpu.CompilerParams(dimension_semantics=("parallel",)),
    )(*operands)
    return y.reshape(B, 1, H, W)


# ----------------------------------------------------------------------------
# Constant matrices
# ----------------------------------------------------------------------------
def _interp_matrix(n_out, n_in):
    """1-D bilinear interpolation matrix, align_corners=True (as in the module)."""
    A = np.zeros((n_out, n_in), np.float64)
    if n_in == 1:
        A[:, 0] = 1.0
        return A
    for i in range(n_out):
        src = i * (n_in - 1) / (n_out - 1) if n_out > 1 else 0.0
        lo = int(np.floor(src))
        hi = min(lo + 1, n_in - 1)
        frac = src - lo
        A[i, lo] += 1.0 - frac
        A[i, hi] += frac
    return A


def _dft_matrix(n):
    k = np.arange(n)
    return np.exp(-2j * np.pi * np.outer(k, k) / n)     # complex128 (n, n)


def _tap_masks(H, W):
    """(9, H*W) zero-padding validity masks for the 3x3 taps."""
    m = np.ones((9, H, W), np.float32)
    hh = np.arange(H)[:, None]
    ww = np.arange(W)[None, :]
    for t, (ky, kx) in enumerate(TAPS):
        dy, dx = ky - 1, kx - 1
        valid = (hh + dy >= 0) & (hh + dy < H) & (ww + dx >= 0) & (ww + dx < W)
        m[t] = valid.astype(np.float32)
    return m.reshape(9, H * W)


# ----------------------------------------------------------------------------
# Parameters: logical (reference-friendly) + packed (kernel operands)
# ----------------------------------------------------------------------------
def make_params(C, Cm, H, W, hp, wp, hx, wx, key):
    keys = iter(jax.random.split(key, 64))

    def rnd(shape, scale):
        return scale * jax.random.normal(next(keys), shape, dtype=jnp.float32)

    def bn_fold(conv_bias, n):           # fold Conv bias + inference-mode BN
        gamma = 1.0 + rnd((n,), 0.1)
        beta = rnd((n,), 0.1)
        mean = rnd((n,), 0.1)
        var = 1.0 + jnp.abs(rnd((n,), 0.1))
        s = gamma / jnp.sqrt(var + 1e-5)
        b = beta + (conv_bias - mean) * s
        return jnp.stack([s, b])          # (2, n)

    p = {}
    # self.conv : Conv1x1(3C->C)+BN, Conv3x3+BN, Conv3x3+BN, ReLU
    w1_full = rnd((3 * C, C), 0.1)        # (Cin, Cout) layout
    p["w1a"] = w1_full[:C]
    p["wpx"] = jnp.stack([w1_full[C:2 * C].sum(0), w1_full[2 * C:].sum(0)])
    p["sb1a"] = bn_fold(rnd((C,), 0.05), C)
    p["w2a"] = rnd((9, C, C), 0.06)
    p["sb2a"] = bn_fold(rnd((C,), 0.05), C)
    p["w3a"] = rnd((9, C, C), 0.06)
    p["sb3a"] = bn_fold(rnd((C,), 0.05), C)
    # self.conv3
    p["w1b"] = rnd((C, C), 0.1)
    p["sb1b"] = bn_fold(rnd((C,), 0.05), C)
    p["w2b"] = rnd((9, C, C), 0.06)
    p["sb2b"] = bn_fold(rnd((C,), 0.05), C)
    p["w3b"] = rnd((9, C, C), 0.06)
    p["sb3b"] = bn_fold(rnd((C,), 0.05), C)
    # self.out : Conv3x3(2C->Cm)+BN+ReLU, Conv1x1(Cm->1)
    p["wca"] = rnd((9, C, Cm), 0.06)
    p["wcb"] = rnd((9, C, Cm), 0.06)
    p["sbc"] = bn_fold(rnd((Cm,), 0.05), Cm)
    p["wo"] = rnd((1, Cm), 0.2)
    p["bo"] = rnd((1, 1), 0.05)
    # bilinear interpolation matrices (align_corners=True)
    p["Ahp"] = jnp.asarray(_interp_matrix(H, hp), jnp.float32)
    p["Awp"] = jnp.asarray(_interp_matrix(W, wp), jnp.float32)
    p["Ahx"] = jnp.asarray(_interp_matrix(H, hx), jnp.float32)
    p["Awx"] = jnp.asarray(_interp_matrix(W, wx), jnp.float32)
    return p


def pack_kernel_params(p, C, Cm, H, W):
    """Fold / repack the logical params into the kernel's 7 constant operands."""
    HW = H * W
    DH = _dft_matrix(H)
    DW = _dft_matrix(W)

    def prior_matrix(Ah, Aw):
        # up_row = small_row @ M ;  F_row = small_row @ (M @ kron(DH, DW))
        Ah = np.asarray(Ah, np.float64)
        Aw = np.asarray(Aw, np.float64)
        M = np.kron(Ah, Aw).T                       # (S, HW)
        Gd = M @ np.kron(DH, DW)                    # (S, HW) complex
        return np.concatenate([M, Gd.real, Gd.imag], axis=1).astype(np.float32)

    def kcat(w9):                                   # (9, Cin, Cout) -> (Cout, 9*Cin)
        w9 = np.asarray(w9)
        return np.concatenate([w9[t].T for t in range(9)], axis=1)

    kp = {}
    kp["Gp"] = jnp.asarray(prior_matrix(p["Ahp"], p["Awp"]))
    kp["Gx"] = jnp.asarray(prior_matrix(p["Ahx"], p["Awx"]))
    kp["masks"] = jnp.asarray(_tap_masks(H, W))
    kp["w11"] = jnp.asarray(np.stack([np.asarray(p["w1a"]).T,
                                      np.asarray(p["w1b"]).T]))       # (2, C, C)
    kp["w33"] = jnp.asarray(np.stack([kcat(p["w2a"]), kcat(p["w3a"]),
                                      kcat(p["w2b"]), kcat(p["w3b"])]))  # (4, C, 9C)
    kp["wout"] = jnp.asarray(np.concatenate([kcat(p["wca"]), kcat(p["wcb"])],
                                            axis=1))                  # (Cm, 18C)

    R = max(C, Cm)
    aff = np.zeros((R, _A_COLS), np.float32)

    def put(c_idx, vec):
        v = np.asarray(vec)
        aff[:v.shape[0], c_idx] = v

    put(_A_S1A, p["sb1a"][0]); put(_A_B1A, p["sb1a"][1])
    put(_A_S2A, p["sb2a"][0]); put(_A_B2A, p["sb2a"][1])
    put(_A_S3A, p["sb3a"][0]); put(_A_B3A, p["sb3a"][1])
    put(_A_S1B, p["sb1b"][0]); put(_A_B1B, p["sb1b"][1])
    put(_A_S2B, p["sb2b"][0]); put(_A_B2B, p["sb2b"][1])
    put(_A_S3B, p["sb3b"][0]); put(_A_B3B, p["sb3b"][1])
    put(_A_WP, p["wpx"][0]);   put(_A_WX, p["wpx"][1])
    put(_A_SC, p["sbc"][0]);   put(_A_BC, p["sbc"][1])
    put(_A_WO, p["wo"][0])
    aff[0, _A_BO] = float(np.asarray(p["bo"])[0, 0])
    kp["aff"] = jnp.asarray(aff)
    return kp


# ----------------------------------------------------------------------------
# Pure-JAX reference (independent of the Pallas kernel) for validation
# ----------------------------------------------------------------------------
def reference_forward(X, x1, prior_cam, p):
    B, C, H, W = X.shape
    pc = jnp.einsum("Hh,bhw,Ww->bHW", p["Ahp"], prior_cam[:, 0], p["Awp"])
    xc = jnp.einsum("Hh,bhw,Ww->bHW", p["Ahx"], x1[:, 0], p["Awx"])

    def rev(u):
        mag = jnp.abs(jnp.fft.fft2(u))
        return (1.0 - jax.nn.sigmoid(mag)) + (1.0 - jax.nn.sigmoid(u))

    r = rev(pc) + rev(xc)
    x_nhwc = jnp.transpose(X, (0, 2, 3, 1))

    def conv1x1(t, w):
        return jnp.einsum("bhwc,co->bhwo", t, w)

    def conv3x3(t, w9):
        tp = jnp.pad(t, ((0, 0), (1, 1), (1, 1), (0, 0)))
        acc = 0.0
        for k, (ky, kx) in enumerate(TAPS):
            acc = acc + jnp.einsum("bhwc,co->bhwo",
                                   tp[:, ky:ky + H, kx:kx + W, :], w9[k])
        return acc

    def bn(t, sb):
        return t * sb[0] + sb[1]

    h = (conv1x1(x_nhwc, p["w1a"]) + pc[..., None] * p["wpx"][0]
         + xc[..., None] * p["wpx"][1])
    h = bn(h, p["sb1a"])
    h = bn(conv3x3(h, p["w2a"]), p["sb2a"])
    h = jnp.maximum(bn(conv3x3(h, p["w3a"]), p["sb3a"]), 0.0)
    g = bn(conv1x1(h, p["w1b"]), p["sb1b"])
    g = bn(conv3x3(g, p["w2b"]), p["sb2b"])
    g = jnp.maximum(bn(conv3x3(g, p["w3b"]), p["sb3b"]), 0.0)
    y_ra = x_nhwc * r[..., None]
    hm = jnp.maximum(bn(conv3x3(y_ra, p["wca"]) + conv3x3(g, p["wcb"]),
                        p["sbc"]), 0.0)
    y = jnp.einsum("bhwc,c->bhw", hm, p["wo"][0]) + p["bo"][0, 0]
    y = y + pc + xc
    return y[:, None, :, :]


# ----------------------------------------------------------------------------
if __name__ == "__main__":
    B, C, Cm, H, W = 2, 32, 16, 16, 16       # in_channels=32, mid_channels=16
    hp = wp = hx = wx = 8                    # priors arrive at half resolution

    key = jax.random.PRNGKey(0)
    k_x, k_x1, k_pc, k_p = jax.random.split(key, 4)
    X = jax.random.normal(k_x, (B, C, H, W), dtype=jnp.float32)
    x1 = jax.random.normal(k_x1, (B, 1, hx, wx), dtype=jnp.float32)
    prior_cam = jax.random.normal(k_pc, (B, 1, hp, wp), dtype=jnp.float32)

    params = make_params(C, Cm, H, W, hp, wp, hx, wx, k_p)
    kparams = pack_kernel_params(params, C, Cm, H, W)

    out = jax.jit(drd2_forward)(X, x1, prior_cam, kparams)
    jax.block_until_ready(out)
    assert out.shape == (B, 1, H, W) and out.dtype == jnp.float32

    ref = reference_forward(X, x1, prior_cam, params)
    max_err = float(jnp.max(jnp.abs(out - ref)))
    assert bool(jnp.allclose(out, ref, rtol=2e-3, atol=2e-3)), max_err

    print("KERNEL_OK")
</pallas_src>

<mosaic_0001>
module attributes {stable_mosaic.version = 11 : i64} {
  func.func @_drd2_kernel(%arg0: i32, %arg1: memref<1x32x256xf32, #tpu.memory_space<vmem>>, %arg2: memref<1x1x64xf32, #tpu.memory_space<vmem>>, %arg3: memref<1x1x64xf32, #tpu.memory_space<vmem>>, %arg4: memref<64x768xf32, #tpu.memory_space<vmem>>, %arg5: memref<64x768xf32, #tpu.memory_space<vmem>>, %arg6: memref<9x256xf32, #tpu.memory_space<vmem>>, %arg7: memref<2x32x32xf32, #tpu.memory_space<vmem>>, %arg8: memref<4x32x288xf32, #tpu.memory_space<vmem>>, %arg9: memref<16x576xf32, #tpu.memory_space<vmem>>, %arg10: memref<32x18xf32, #tpu.memory_space<vmem>>, %arg11: memref<1x1x256xf32, #tpu.memory_space<vmem>>) attributes {dimension_semantics = [#tpu.dimension_semantics<parallel>], iteration_bounds = array<i64: 2>, scalar_prefetch = 0 : i64, scratch_operands = 0 : i64, tpu.core_type = #tpu.core_type<tc>, window_params = [{transform_indices = @transform_0, window_bounds = array<i64: 1, 32, 256>}, {transform_indices = @transform_1, window_bounds = array<i64: 1, 1, 64>}, {transform_indices = @transform_2, window_bounds = array<i64: 1, 1, 64>}, {pipeline_mode = #tpu.pipeline_mode<synchronous>, transform_indices = @transform_3, window_bounds = array<i64: 64, 768>}, {pipeline_mode = #tpu.pipeline_mode<synchronous>, transform_indices = @transform_4, window_bounds = array<i64: 64, 768>}, {pipeline_mode = #tpu.pipeline_mode<synchronous>, transform_indices = @transform_5, window_bounds = array<i64: 9, 256>}, {pipeline_mode = #tpu.pipeline_mode<synchronous>, transform_indices = @transform_6, window_bounds = array<i64: 2, 32, 32>}, {pipeline_mode = #tpu.pipeline_mode<synchronous>, transform_indices = @transform_7, window_bounds = array<i64: 4, 32, 288>}, {pipeline_mode = #tpu.pipeline_mode<synchronous>, transform_indices = @transform_8, window_bounds = array<i64: 16, 576>}, {pipeline_mode = #tpu.pipeline_mode<synchronous>, transform_indices = @transform_9, window_bounds = array<i64: 32, 18>}, {transform_indices = @transform_10, window_bounds = array<i64: 1, 1, 256>}]} {
    %c0 = arith.constant 0 : index
    %c0_0 = arith.constant 0 : index
    %c0_1 = arith.constant 0 : index
    %0 = vector.load %arg2[%c0, %c0_0, %c0_1] : memref<1x1x64xf32, #tpu.memory_space<vmem>>, vector<1x1x64xf32>
    %1 = vector.shape_cast %0 : vector<1x1x64xf32> to vector<1x64xf32>
    %c0_2 = arith.constant 0 : index
    %c0_3 = arith.constant 0 : index
    %2 = vector.load %arg4[%c0_2, %c0_3] : memref<64x768xf32, #tpu.memory_space<vmem>>, vector<64x768xf32>
    %cst = arith.constant dense<0.000000e+00> : vector<1x768xf32>
    %3 = tpu.matmul %1, %2, %cst {dimension_numbers = #tpu.dot_dimension_numbers<[1], [0], [0], [1], [0, 0, 1, 1], [], []>} : vector<1x64xf32>, vector<64x768xf32>, vector<1x768xf32> -> vector<1x768xf32>
    %4 = vector.extract_strided_slice %3 {offsets = [0, 0], sizes = [1, 256], strides = [1, 1]} : vector<1x768xf32> to vector<1x256xf32>
    %5 = vector.extract_strided_slice %3 {offsets = [0, 256], sizes = [1, 256], strides = [1, 1]} : vector<1x768xf32> to vector<1x256xf32>
    %6 = vector.extract_strided_slice %3 {offsets = [0, 512], sizes = [1, 256], strides = [1, 1]} : vector<1x768xf32> to vector<1x256xf32>
    %7 = arith.mulf %5, %5 : vector<1x256xf32>
    %8 = arith.mulf %6, %6 : vector<1x256xf32>
    %9 = arith.addf %7, %8 : vector<1x256xf32>
    %10 = math.sqrt %9 : vector<1x256xf32>
    %11 = arith.negf %10 : vector<1x256xf32>
    %12 = math.exp %11 : vector<1x256xf32>
    %cst_4 = arith.constant 1.000000e+00 : f32
    %13 = vector.broadcast %cst_4 : f32 to vector<1x256xf32>
    %14 = arith.addf %13, %12 : vector<1x256xf32>
    %15 = arith.divf %13, %14 : vector<1x256xf32>
    %cst_5 = arith.constant 1.000000e+00 : f32
    %16 = vector.broadcast %cst_5 : f32 to vector<1x256xf32>
    %17 = arith.subf %16, %15 : vector<1x256xf32>
    %18 = arith.negf %4 : vector<1x256xf32>
    %19 = math.exp %18 : vector<1x256xf32>
    %cst_6 = arith.constant 1.000000e+00 : f32
    %20 = vector.broadcast %cst_6 : f32 to vector<1x256xf32>
    %21 = arith.addf %20, %19 : vector<1x256xf32>
    %22 = arith.divf %20, %21 : vector<1x256xf32>
    %cst_7 = arith.constant 1.000000e+00 : f32
    %23 = vector.broadcast %cst_7 : f32 to vector<1x256xf32>
    %24 = arith.subf %23, %22 : vector<1x256xf32>
    %25 = arith.addf %17, %24 : vector<1x256xf32>
    %c0_8 = arith.constant 0 : index
    %c0_9 = arith.constant 0 : index
    %c0_10 = arith.constant 0 : index
    %26 = vector.load %arg3[%c0_8, %c0_9, %c0_10] : memref<1x1x64xf32, #tpu.memory_space<vmem>>, vector<1x1x64xf32>
    %27 = vector.shape_cast %26 : vector<1x1x64xf32> to vector<1x64xf32>
    %c0_11 = arith.constant 0 : index
    %c0_12 = arith.constant 0 : index
    %28 = vector.load %arg5[%c0_11, %c0_12] : memref<64x768xf32, #tpu.memory_space<vmem>>, vector<64x768xf32>
    %cst_13 = arith.constant dense<0.000000e+00> : vector<1x768xf32>
    %29 = tpu.matmul %27, %28, %cst_13 {dimension_numbers = #tpu.dot_dimension_numbers<[1], [0], [0], [1], [0, 0, 1, 1], [], []>} : vector<1x64xf32>, vector<64x768xf32>, vector<1x768xf32> -> vector<1x768xf32>
    %30 = vector.extract_strided_slice %29 {offsets = [0, 0], sizes = [1, 256], strides = [1, 1]} : vector<1x768xf32> to vector<1x256xf32>
    %31 = vector.extract_strided_slice %29 {offsets = [0, 256], sizes = [1, 256], strides = [1, 1]} : vector<1x768xf32> to vector<1x256xf32>
    %32 = vector.extract_strided_slice %29 {offsets = [0, 512], sizes = [1, 256], strides = [1, 1]} : vector<1x768xf32> to vector<1x256xf32>
    %33 = arith.mulf %31, %31 : vector<1x256xf32>
    %34 = arith.mulf %32, %32 : vector<1x256xf32>
    %35 = arith.addf %33, %34 : vector<1x256xf32>
    %36 = math.sqrt %35 : vector<1x256xf32>
    %37 = arith.negf %36 : vector<1x256xf32>
    %38 = math.exp %37 : vector<1x256xf32>
    %cst_14 = arith.constant 1.000000e+00 : f32
    %39 = vector.broadcast %cst_14 : f32 to vector<1x256xf32>
    %40 = arith.addf %39, %38 : vector<1x256xf32>
    %41 = arith.divf %39, %40 : vector<1x256xf32>
    %cst_15 = arith.constant 1.000000e+00 : f32
    %42 = vector.broadcast %cst_15 : f32 to vector<1x256xf32>
    %43 = arith.subf %42, %41 : vector<1x256xf32>
    %44 = arith.negf %30 : vector<1x256xf32>
    %45 = math.exp %44 : vector<1x256xf32>
    %cst_16 = arith.constant 1.000000e+00 : f32
    %46 = vector.broadcast %cst_16 : f32 to vector<1x256xf32>
    %47 = arith.addf %46, %45 : vector<1x256xf32>
    %48 = arith.divf %46, %47 : vector<1x256xf32>
    %cst_17 = arith.constant 1.000000e+00 : f32
    %49 = vector.broadcast %cst_17 : f32 to vector<1x256xf32>
    %50 = arith.subf %49, %48 : vector<1x256xf32>
    %51 = arith.addf %43, %50 : vector<1x256xf32>
    %52 = arith.addf %25, %51 : vector<1x256xf32>
    %c0_18 = arith.constant 0 : index
    %c0_19 = arith.constant 0 : index
    %c0_20 = arith.constant 0 : index
    %53 = vector.load %arg1[%c0_18, %c0_19, %c0_20] : memref<1x32x256xf32, #tpu.memory_space<vmem>>, vector<1x32x256xf32>
    %54 = vector.shape_cast %53 : vector<1x32x256xf32> to vector<32x256xf32>
    %c0_21 = arith.constant 0 : index
    %c0_22 = arith.constant 0 : index
    %55 = vector.load %arg6[%c0_21, %c0_22] : memref<9x256xf32, #tpu.memory_space<vmem>>, vector<9x256xf32>
    %c0_23 = arith.constant 0 : index
    %c0_24 = arith.constant 0 : index
    %56 = vector.load %arg10[%c0_23, %c0_24] : memref<32x18xf32, #tpu.memory_space<vmem>>, vector<32x18xf32>
    %c0_25 = arith.constant 0 : index
    %c0_26 = arith.constant 0 : index
    %c0_27 = arith.constant 0 : index
    %57 = vector.load %arg7[%c0_25, %c0_26, %c0_27] : memref<2x32x32xf32, #tpu.memory_space<vmem>>, vector<1x32x32xf32>
    %58 = vector.shape_cast %57 : vector<1x32x32xf32> to vector<32x32xf32>
    %cst_28 = arith.constant dense<0.000000e+00> : vector<32x256xf32>
    %59 = tpu.matmul %58, %54, %cst_28 {dimension_numbers = #tpu.dot_dimension_numbers<[1], [0], [0], [1], [0, 0, 1, 1], [], []>} : vector<32x32xf32>, vector<32x256xf32>, vector<32x256xf32> -> vector<32x256xf32>
    %60 = vector.extract_strided_slice %56 {offsets = [0, 12], sizes = [32, 1], strides = [1, 1]} : vector<32x18xf32> to vector<32x1xf32>
    %61 = vector.broadcast %60 : vector<32x1xf32> to vector<32x256xf32>
    %62 = vector.broadcast %4 : vector<1x256xf32> to vector<32x256xf32>
    %63 = arith.mulf %61, %62 : vector<32x256xf32>
    %64 = arith.addf %59, %63 : vector<32x256xf32>
    %65 = vector.extract_strided_slice %56 {offsets = [0, 13], sizes = [32, 1], strides = [1, 1]} : vector<32x18xf32> to vector<32x1xf32>
    %66 = vector.broadcast %65 : vector<32x1xf32> to vector<32x256xf32>
    %67 = vector.broadcast %30 : vector<1x256xf32> to vector<32x256xf32>
    %68 = arith.mulf %66, %67 : vector<32x256xf32>
    %69 = arith.addf %64, %68 : vector<32x256xf32>
    %70 = vector.extract_strided_slice %56 {offsets = [0, 0], sizes = [32, 1], strides = [1, 1]} : vector<32x18xf32> to vector<32x1xf32>
    %71 = vector.broadcast %70 : vector<32x1xf32> to vector<32x256xf32>
    %72 = arith.mulf %69, %71 : vector<32x256xf32>
    %73 = vector.extract_strided_slice %56 {offsets = [0, 1], sizes = [32, 1], strides = [1, 1]} : vector<32x18xf32> to vector<32x1xf32>
    %74 = vector.broadcast %73 : vector<32x1xf32> to vector<32x256xf32>
    %75 = arith.addf %72, %74 : vector<32x256xf32>
    %c0_29 = arith.constant 0 : index
    %c0_30 = arith.constant 0 : index
    %c0_31 = arith.constant 0 : index
    %76 = vector.load %arg8[%c0_29, %c0_30, %c0_31] : memref<4x32x288xf32, #tpu.memory_space<vmem>>, vector<1x32x288xf32>
    %77 = vector.shape_cast %76 : vector<1x32x288xf32> to vector<32x288xf32>
    %c17_i32 = arith.constant 17 : i32
    %78 = tpu.dynamic_rotate %75 by %c17_i32 dim 1 : vector<32x256xf32>, i32 -> vector<32x256xf32>
    %79 = vector.extract_strided_slice %55 {offsets = [0, 0], sizes = [1, 256], strides = [1, 1]} : vector<9x256xf32> to vector<1x256xf32>
    %80 = vector.broadcast %79 : vector<1x256xf32> to vector<32x256xf32>
    %81 = arith.mulf %78, %80 : vector<32x256xf32>
    %c16_i32 = arith.constant 16 : i32
    %82 = tpu.dynamic_rotate %75 by %c16_i32 dim 1 : vector<32x256xf32>, i32 -> vector<32x256xf32>
    %83 = vector.extract_strided_slice %55 {offsets = [1, 0], sizes = [1, 256], strides = [1, 1]} : vector<9x256xf32> to vector<1x256xf32>
    %84 = vector.broadcast %83 : vector<1x256xf32> to vector<32x256xf32>
    %85 = arith.mulf %82, %84 : vector<32x256xf32>
    %c15_i32 = arith.constant 15 : i32
    %86 = tpu.dynamic_rotate %75 by %c15_i32 dim 1 : vector<32x256xf32>, i32 -> vector<32x256xf32>
    %87 = vector.extract_strided_slice %55 {offsets = [2, 0], sizes = [1, 256], strides = [1, 1]} : vector<9x256xf32> to vector<1x256xf32>
    %88 = vector.broadcast %87 : vector<1x256xf32> to vector<32x256xf32>
    %89 = arith.mulf %86, %88 : vector<32x256xf32>
    %c1_i32 = arith.constant 1 : i32
    %90 = tpu.dynamic_rotate %75 by %c1_i32 dim 1 : vector<32x256xf32>, i32 -> vector<32x256xf32>
    %91 = vector.extract_strided_slice %55 {offsets = [3, 0], sizes = [1, 256], strides = [1, 1]} : vector<9x256xf32> to vector<1x256xf32>
    %92 = vector.broadcast %91 : vector<1x256xf32> to vector<32x256xf32>
    %93 = arith.mulf %90, %92 : vector<32x256xf32>
    %c255_i32 = arith.constant 255 : i32
    %94 = tpu.dynamic_rotate %75 by %c255_i32 dim 1 : vector<32x256xf32>, i32 -> vector<32x256xf32>
    %95 = vector.extract_strided_slice %55 {offsets = [5, 0], sizes = [1, 256], strides = [1, 1]} : vector<9x256xf32> to vector<1x256xf32>
    %96 = vector.broadcast %95 : vector<1x256xf32> to vector<32x256xf32>
    %97 = arith.mulf %94, %96 : vector<32x256xf32>
    %c241_i32 = arith.constant 241 : i32
    %98 = tpu.dynamic_rotate %75 by %c241_i32 dim 1 : vector<32x256xf32>, i32 -> vector<32x256xf32>
    %99 = vector.extract_strided_slice %55 {offsets = [6, 0], sizes = [1, 256], strides = [1, 1]} : vector<9x256xf32> to vector<1x256xf32>
    %100 = vector.broadcast %99 : vector<1x256xf32> to vector<32x256xf32>
    %101 = arith.mulf %98, %100 : vector<32x256xf32>
    %c240_i32 = arith.constant 240 : i32
    %102 = tpu.dynamic_rotate %75 by %c240_i32 dim 1 : vector<32x256xf32>, i32 -> vector<32x256xf32>
    %103 = vector.extract_strided_slice %55 {offsets = [7, 0], sizes = [1, 256], strides = [1, 1]} : vector<9x256xf32> to vector<1x256xf32>
    %104 = vector.broadcast %103 : vector<1x256xf32> to vector<32x256xf32>
    %105 = arith.mulf %102, %104 : vector<32x256xf32>
    %c239_i32 = arith.constant 239 : i32
    %106 = tpu.dynamic_rotate %75 by %c239_i32 dim 1 : vector<32x256xf32>, i32 -> vector<32x256xf32>
    %107 = vector.extract_strided_slice %55 {offsets = [8, 0], sizes = [1, 256], strides = [1, 1]} : vector<9x256xf32> to vector<1x256xf32>
    %108 = vector.broadcast %107 : vector<1x256xf32> to vector<32x256xf32>
    %109 = arith.mulf %106, %108 : vector<32x256xf32>
    %110 = tpu.concatenate %81, %85, %89, %93, %75, %97, %101, %105, %109 in 0 : vector<32x256xf32>, vector<32x256xf32>, vector<32x256xf32>, vector<32x256xf32>, vector<32x256xf32>, vector<32x256xf32>, vector<32x256xf32>, vector<32x256xf32>, vector<32x256xf32> -> vector<288x256xf32>
    %cst_32 = arith.constant dense<0.000000e+00> : vector<32x256xf32>
    %111 = tpu.matmul %77, %110, %cst_32 {dimension_numbers = #tpu.dot_dimension_numbers<[1], [0], [0], [1], [0, 0, 1, 1], [], []>} : vector<32x288xf32>, vector<288x256xf32>, vector<32x256xf32> -> vector<32x256xf32>
    %112 = vector.extract_strided_slice %56 {offsets = [0, 2], sizes = [32, 1], strides = [1, 1]} : vector<32x18xf32> to vector<32x1xf32>
    %113 = vector.broadcast %112 : vector<32x1xf32> to vector<32x256xf32>
    %114 = arith.mulf %111, %113 : vector<32x256xf32>
    %115 = vector.extract_strided_slice %56 {offsets = [0, 3], sizes = [32, 1], strides = [1, 1]} : vector<32x18xf32> to vector<32x1xf32>
    %116 = vector.broadcast %115 : vector<32x1xf32> to vector<32x256xf32>
    %117 = arith.addf %114, %116 : vector<32x256xf32>
    %c1 = arith.constant 1 : index
    %c0_33 = arith.constant 0 : index
    %c0_34 = arith.constant 0 : index
    %118 = vector.load %arg8[%c1, %c0_33, %c0_34] : memref<4x32x288xf32, #tpu.memory_space<vmem>>, vector<1x32x288xf32>
    %119 = vector.shape_cast %118 : vector<1x32x288xf32> to vector<32x288xf32>
    %c17_i32_35 = arith.constant 17 : i32
    %120 = tpu.dynamic_rotate %117 by %c17_i32_35 dim 1 : vector<32x256xf32>, i32 -> vector<32x256xf32>
    %121 = vector.extract_strided_slice %55 {offsets = [0, 0], sizes = [1, 256], strides = [1, 1]} : vector<9x256xf32> to vector<1x256xf32>
    %122 = vector.broadcast %121 : vector<1x256xf32> to vector<32x256xf32>
    %123 = arith.mulf %120, %122 : vector<32x256xf32>
    %c16_i32_36 = arith.constant 16 : i32
    %124 = tpu.dynamic_rotate %117 by %c16_i32_36 dim 1 : vector<32x256xf32>, i32 -> vector<32x256xf32>
    %125 = vector.extract_strided_slice %55 {offsets = [1, 0], sizes = [1, 256], strides = [1, 1]} : vector<9x256xf32> to vector<1x256xf32>
    %126 = vector.broadcast %125 : vector<1x256xf32> to vector<32x256xf32>
    %127 = arith.mulf %124, %126 : vector<32x256xf32>
    %c15_i32_37 = arith.constant 15 : i32
    %128 = tpu.dynamic_rotate %117 by %c15_i32_37 dim 1 : vector<32x256xf32>, i32 -> vector<32x256xf32>
    %129 = vector.extract_strided_slice %55 {offsets = [2, 0], sizes = [1, 256], strides = [1, 1]} : vector<9x256xf32> to vector<1x256xf32>
    %130 = vector.broadcast %129 : vector<1x256xf32> to vector<32x256xf32>
    %131 = arith.mulf %128, %130 : vector<32x256xf32>
    %c1_i32_38 = arith.constant 1 : i32
    %132 = tpu.dynamic_rotate %117 by %c1_i32_38 dim 1 : vector<32x256xf32>, i32 -> vector<32x256xf32>
    %133 = vector.extract_strided_slice %55 {offsets = [3, 0], sizes = [1, 256], strides = [1, 1]} : vector<9x256xf32> to vector<1x256xf32>
    %134 = vector.broadcast %133 : vector<1x256xf32> to vector<32x256xf32>
    %135 = arith.mulf %132, %134 : vector<32x256xf32>
    %c255_i32_39 = arith.constant 255 : i32
    %136 = tpu.dynamic_rotate %117 by %c255_i32_39 dim 1 : vector<32x256xf32>, i32 -> vector<32x256xf32>
    %137 = vector.extract_strided_slice %55 {offsets = [5, 0], sizes = [1, 256], strides = [1, 1]} : vector<9x256xf32> to vector<1x256xf32>
    %138 = vector.broadcast %137 : vector<1x256xf32> to vector<32x256xf32>
    %139 = arith.mulf %136, %138 : vector<32x256xf32>
    %c241_i32_40 = arith.constant 241 : i32
    %140 = tpu.dynamic_rotate %117 by %c241_i32_40 dim 1 : vector<32x256xf32>, i32 -> vector<32x256xf32>
    %141 = vector.extract_strided_slice %55 {offsets = [6, 0], sizes = [1, 256], strides = [1, 1]} : vector<9x256xf32> to vector<1x256xf32>
    %142 = vector.broadcast %141 : vector<1x256xf32> to vector<32x256xf32>
    %143 = arith.mulf %140, %142 : vector<32x256xf32>
    %c240_i32_41 = arith.constant 240 : i32
    %144 = tpu.dynamic_rotate %117 by %c240_i32_41 dim 1 : vector<32x256xf32>, i32 -> vector<32x256xf32>
    %145 = vector.extract_strided_slice %55 {offsets = [7, 0], sizes = [1, 256], strides = [1, 1]} : vector<9x256xf32> to vector<1x256xf32>
    %146 = vector.broadcast %145 : vector<1x256xf32> to vector<32x256xf32>
    %147 = arith.mulf %144, %146 : vector<32x256xf32>
    %c239_i32_42 = arith.constant 239 : i32
    %148 = tpu.dynamic_rotate %117 by %c239_i32_42 dim 1 : vector<32x256xf32>, i32 -> vector<32x256xf32>
    %149 = vector.extract_strided_slice %55 {offsets = [8, 0], sizes = [1, 256], strides = [1, 1]} : vector<9x256xf32> to vector<1x256xf32>
    %150 = vector.broadcast %149 : vector<1x256xf32> to vector<32x256xf32>
    %151 = arith.mulf %148, %150 : vector<32x256xf32>
    %152 = tpu.concatenate %123, %127, %131, %135, %117, %139, %143, %147, %151 in 0 : vector<32x256xf32>, vector<32x256xf32>, vector<32x256xf32>, vector<32x256xf32>, vector<32x256xf32>, vector<32x256xf32>, vector<32x256xf32>, vector<32x256xf32>, vector<32x256xf32> -> vector<288x256xf32>
    %cst_43 = arith.constant dense<0.000000e+00> : vector<32x256xf32>
    %153 = tpu.matmul %119, %152, %cst_43 {dimension_numbers = #tpu.dot_dimension_numbers<[1], [0], [0], [1], [0, 0, 1, 1], [], []>} : vector<32x288xf32>, vector<288x256xf32>, vector<32x256xf32> -> vector<32x256xf32>
    %154 = vector.extract_strided_slice %56 {offsets = [0, 4], sizes = [32, 1], strides = [1, 1]} : vector<32x18xf32> to vector<32x1xf32>
    %155 = vector.broadcast %154 : vector<32x1xf32> to vector<32x256xf32>
    %156 = arith.mulf %153, %155 : vector<32x256xf32>
    %157 = vector.extract_strided_slice %56 {offsets = [0, 5], sizes = [32, 1], strides = [1, 1]} : vector<32x18xf32> to vector<32x1xf32>
    %158 = vector.broadcast %157 : vector<32x1xf32> to vector<32x256xf32>
    %159 = arith.addf %156, %158 : vector<32x256xf32>
    %cst_44 = arith.constant 0.000000e+00 : f32
    %160 = vector.broadcast %cst_44 : f32 to vector<32x256xf32>
    %161 = arith.maximumf %159, %160 : vector<32x256xf32>
    %c1_45 = arith.constant 1 : index
    %c0_46 = arith.constant 0 : index
    %c0_47 = arith.constant 0 : index
    %162 = vector.load %arg7[%c1_45, %c0_46, %c0_47] : memref<2x32x32xf32, #tpu.memory_space<vmem>>, vector<1x32x32xf32>
    %163 = vector.shape_cast %162 : vector<1x32x32xf32> to vector<32x32xf32>
    %cst_48 = arith.constant dense<0.000000e+00> : vector<32x256xf32>
    %164 = tpu.matmul %163, %161, %cst_48 {dimension_numbers = #tpu.dot_dimension_numbers<[1], [0], [0], [1], [0, 0, 1, 1], [], []>} : vector<32x32xf32>, vector<32x256xf32>, vector<32x256xf32> -> vector<32x256xf32>
    %165 = vector.extract_strided_slice %56 {offsets = [0, 6], sizes = [32, 1], strides = [1, 1]} : vector<32x18xf32> to vector<32x1xf32>
    %166 = vector.broadcast %165 : vector<32x1xf32> to vector<32x256xf32>
    %167 = arith.mulf %164, %166 : vector<32x256xf32>
    %168 = vector.extract_strided_slice %56 {offsets = [0, 7], sizes = [32, 1], strides = [1, 1]} : vector<32x18xf32> to vector<32x1xf32>
    %169 = vector.broadcast %168 : vector<32x1xf32> to vector<32x256xf32>
    %170 = arith.addf %167, %169 : vector<32x256xf32>
    %c2 = arith.constant 2 : index
    %c0_49 = arith.constant 0 : index
    %c0_50 = arith.constant 0 : index
    %171 = vector.load %arg8[%c2, %c0_49, %c0_50] : memref<4x32x288xf32, #tpu.memory_space<vmem>>, vector<1x32x288xf32>
    %172 = vector.shape_cast %171 : vector<1x32x288xf32> to vector<32x288xf32>
    %c17_i32_51 = arith.constant 17 : i32
    %173 = tpu.dynamic_rotate %170 by %c17_i32_51 dim 1 : vector<32x256xf32>, i32 -> vector<32x256xf32>
    %174 = vector.extract_strided_slice %55 {offsets = [0, 0], sizes = [1, 256], strides = [1, 1]} : vector<9x256xf32> to vector<1x256xf32>
    %175 = vector.broadcast %174 : vector<1x256xf32> to vector<32x256xf32>
    %176 = arith.mulf %173, %175 : vector<32x256xf32>
    %c16_i32_52 = arith.constant 16 : i32
    %177 = tpu.dynamic_rotate %170 by %c16_i32_52 dim 1 : vector<32x256xf32>, i32 -> vector<32x256xf32>
    %178 = vector.extract_strided_slice %55 {offsets = [1, 0], sizes = [1, 256], strides = [1, 1]} : vector<9x256xf32> to vector<1x256xf32>
    %179 = vector.broadcast %178 : vector<1x256xf32> to vector<32x256xf32>
    %180 = arith.mulf %177, %179 : vector<32x256xf32>
    %c15_i32_53 = arith.constant 15 : i32
    %181 = tpu.dynamic_rotate %170 by %c15_i32_53 dim 1 : vector<32x256xf32>, i32 -> vector<32x256xf32>
    %182 = vector.extract_strided_slice %55 {offsets = [2, 0], sizes = [1, 256], strides = [1, 1]} : vector<9x256xf32> to vector<1x256xf32>
    %183 = vector.broadcast %182 : vector<1x256xf32> to vector<32x256xf32>
    %184 = arith.mulf %181, %183 : vector<32x256xf32>
    %c1_i32_54 = arith.constant 1 : i32
    %185 = tpu.dynamic_rotate %170 by %c1_i32_54 dim 1 : vector<32x256xf32>, i32 -> vector<32x256xf32>
    %186 = vector.extract_strided_slice %55 {offsets = [3, 0], sizes = [1, 256], strides = [1, 1]} : vector<9x256xf32> to vector<1x256xf32>
    %187 = vector.broadcast %186 : vector<1x256xf32> to vector<32x256xf32>
    %188 = arith.mulf %185, %187 : vector<32x256xf32>
    %c255_i32_55 = arith.constant 255 : i32
    %189 = tpu.dynamic_rotate %170 by %c255_i32_55 dim 1 : vector<32x256xf32>, i32 -> vector<32x256xf32>
    %190 = vector.extract_strided_slice %55 {offsets = [5, 0], sizes = [1, 256], strides = [1, 1]} : vector<9x256xf32> to vector<1x256xf32>
    %191 = vector.broadcast %190 : vector<1x256xf32> to vector<32x256xf32>
    %192 = arith.mulf %189, %191 : vector<32x256xf32>
    %c241_i32_56 = arith.constant 241 : i32
    %193 = tpu.dynamic_rotate %170 by %c241_i32_56 dim 1 : vector<32x256xf32>, i32 -> vector<32x256xf32>
    %194 = vector.extract_strided_slice %55 {offsets = [6, 0], sizes = [1, 256], strides = [1, 1]} : vector<9x256xf32> to vector<1x256xf32>
    %195 = vector.broadcast %194 : vector<1x256xf32> to vector<32x256xf32>
    %196 = arith.mulf %193, %195 : vector<32x256xf32>
    %c240_i32_57 = arith.constant 240 : i32
    %197 = tpu.dynamic_rotate %170 by %c240_i32_57 dim 1 : vector<32x256xf32>, i32 -> vector<32x256xf32>
    %198 = vector.extract_strided_slice %55 {offsets = [7, 0], sizes = [1, 256], strides = [1, 1]} : vector<9x256xf32> to vector<1x256xf32>
    %199 = vector.broadcast %198 : vector<1x256xf32> to vector<32x256xf32>
    %200 = arith.mulf %197, %199 : vector<32x256xf32>
    %c239_i32_58 = arith.constant 239 : i32
    %201 = tpu.dynamic_rotate %170 by %c239_i32_58 dim 1 : vector<32x256xf32>, i32 -> vector<32x256xf32>
    %202 = vector.extract_strided_slice %55 {offsets = [8, 0], sizes = [1, 256], strides = [1, 1]} : vector<9x256xf32> to vector<1x256xf32>
    %203 = vector.broadcast %202 : vector<1x256xf32> to vector<32x256xf32>
    %204 = arith.mulf %201, %203 : vector<32x256xf32>
    %205 = tpu.concatenate %176, %180, %184, %188, %170, %192, %196, %200, %204 in 0 : vector<32x256xf32>, vector<32x256xf32>, vector<32x256xf32>, vector<32x256xf32>, vector<32x256xf32>, vector<32x256xf32>, vector<32x256xf32>, vector<32x256xf32>, vector<32x256xf32> -> vector<288x256xf32>
    %cst_59 = arith.constant dense<0.000000e+00> : vector<32x256xf32>
    %206 = tpu.matmul %172, %205, %cst_59 {dimension_numbers = #tpu.dot_dimension_numbers<[1], [0], [0], [1], [0, 0, 1, 1], [], []>} : vector<32x288xf32>, vector<288x256xf32>, vector<32x256xf32> -> vector<32x256xf32>
    %207 = vector.extract_strided_slice %56 {offsets = [0, 8], sizes = [32, 1], strides = [1, 1]} : vector<32x18xf32> to vector<32x1xf32>
    %208 = vector.broadcast %207 : vector<32x1xf32> to vector<32x256xf32>
    %209 = arith.mulf %206, %208 : vector<32x256xf32>
    %210 = vector.extract_strided_slice %56 {offsets = [0, 9], sizes = [32, 1], strides = [1, 1]} : vector<32x18xf32> to vector<32x1xf32>
    %211 = vector.broadcast %210 : vector<32x1xf32> to vector<32x256xf32>
    %212 = arith.addf %209, %211 : vector<32x256xf32>
    %c3 = arith.constant 3 : index
    %c0_60 = arith.constant 0 : index
    %c0_61 = arith.constant 0 : index
    %213 = vector.load %arg8[%c3, %c0_60, %c0_61] : memref<4x32x288xf32, #tpu.memory_space<vmem>>, vector<1x32x288xf32>
    %214 = vector.shape_cast %213 : vector<1x32x288xf32> to vector<32x288xf32>
    %c17_i32_62 = arith.constant 17 : i32
    %215 = tpu.dynamic_rotate %212 by %c17_i32_62 dim 1 : vector<32x256xf32>, i32 -> vector<32x256xf32>
    %216 = vector.extract_strided_slice %55 {offsets = [0, 0], sizes = [1, 256], strides = [1, 1]} : vector<9x256xf32> to vector<1x256xf32>
    %217 = vector.broadcast %216 : vector<1x256xf32> to vector<32x256xf32>
    %218 = arith.mulf %215, %217 : vector<32x256xf32>
    %c16_i32_63 = arith.constant 16 : i32
    %219 = tpu.dynamic_rotate %212 by %c16_i32_63 dim 1 : vector<32x256xf32>, i32 -> vector<32x256xf32>
    %220 = vector.extract_strided_slice %55 {offsets = [1, 0], sizes = [1, 256], strides = [1, 1]} : vector<9x256xf32> to vector<1x256xf32>
    %221 = vector.broadcast %220 : vector<1x256xf32> to vector<32x256xf32>
    %222 = arith.mulf %219, %221 : vector<32x256xf32>
    %c15_i32_64 = arith.constant 15 : i32
    %223 = tpu.dynamic_rotate %212 by %c15_i32_64 dim 1 : vector<32x256xf32>, i32 -> vector<32x256xf32>
    %224 = vector.extract_strided_slice %55 {offsets = [2, 0], sizes = [1, 256], strides = [1, 1]} : vector<9x256xf32> to vector<1x256xf32>
    %225 = vector.broadcast %224 : vector<1x256xf32> to vector<32x256xf32>
    %226 = arith.mulf %223, %225 : vector<32x256xf32>
    %c1_i32_65 = arith.constant 1 : i32
    %227 = tpu.dynamic_rotate %212 by %c1_i32_65 dim 1 : vector<32x256xf32>, i32 -> vector<32x256xf32>
    %228 = vector.extract_strided_slice %55 {offsets = [3, 0], sizes = [1, 256], strides = [1, 1]} : vector<9x256xf32> to vector<1x256xf32>
    %229 = vector.broadcast %228 : vector<1x256xf32> to vector<32x256xf32>
    %230 = arith.mulf %227, %229 : vector<32x256xf32>
    %c255_i32_66 = arith.constant 255 : i32
    %231 = tpu.dynamic_rotate %212 by %c255_i32_66 dim 1 : vector<32x256xf32>, i32 -> vector<32x256xf32>
    %232 = vector.extract_strided_slice %55 {offsets = [5, 0], sizes = [1, 256], strides = [1, 1]} : vector<9x256xf32> to vector<1x256xf32>
    %233 = vector.broadcast %232 : vector<1x256xf32> to vector<32x256xf32>
    %234 = arith.mulf %231, %233 : vector<32x256xf32>
    %c241_i32_67 = arith.constant 241 : i32
    %235 = tpu.dynamic_rotate %212 by %c241_i32_67 dim 1 : vector<32x256xf32>, i32 -> vector<32x256xf32>
    %236 = vector.extract_strided_slice %55 {offsets = [6, 0], sizes = [1, 256], strides = [1, 1]} : vector<9x256xf32> to vector<1x256xf32>
    %237 = vector.broadcast %236 : vector<1x256xf32> to vector<32x256xf32>
    %238 = arith.mulf %235, %237 : vector<32x256xf32>
    %c240_i32_68 = arith.constant 240 : i32
    %239 = tpu.dynamic_rotate %212 by %c240_i32_68 dim 1 : vector<32x256xf32>, i32 -> vector<32x256xf32>
    %240 = vector.extract_strided_slice %55 {offsets = [7, 0], sizes = [1, 256], strides = [1, 1]} : vector<9x256xf32> to vector<1x256xf32>
    %241 = vector.broadcast %240 : vector<1x256xf32> to vector<32x256xf32>
    %242 = arith.mulf %239, %241 : vector<32x256xf32>
    %c239_i32_69 = arith.constant 239 : i32
    %243 = tpu.dynamic_rotate %212 by %c239_i32_69 dim 1 : vector<32x256xf32>, i32 -> vector<32x256xf32>
    %244 = vector.extract_strided_slice %55 {offsets = [8, 0], sizes = [1, 256], strides = [1, 1]} : vector<9x256xf32> to vector<1x256xf32>
    %245 = vector.broadcast %244 : vector<1x256xf32> to vector<32x256xf32>
    %246 = arith.mulf %243, %245 : vector<32x256xf32>
    %247 = tpu.concatenate %218, %222, %226, %230, %212, %234, %238, %242, %246 in 0 : vector<32x256xf32>, vector<32x256xf32>, vector<32x256xf32>, vector<32x256xf32>, vector<32x256xf32>, vector<32x256xf32>, vector<32x256xf32>, vector<32x256xf32>, vector<32x256xf32> -> vector<288x256xf32>
    %cst_70 = arith.constant dense<0.000000e+00> : vector<32x256xf32>
    %248 = tpu.matmul %214, %247, %cst_70 {dimension_numbers = #tpu.dot_dimension_numbers<[1], [0], [0], [1], [0, 0, 1, 1], [], []>} : vector<32x288xf32>, vector<288x256xf32>, vector<32x256xf32> -> vector<32x256xf32>
    %249 = vector.extract_strided_slice %56 {offsets = [0, 10], sizes = [32, 1], strides = [1, 1]} : vector<32x18xf32> to vector<32x1xf32>
    %250 = vector.broadcast %249 : vector<32x1xf32> to vector<32x256xf32>
    %251 = arith.mulf %248, %250 : vector<32x256xf32>
    %252 = vector.extract_strided_slice %56 {offsets = [0, 11], sizes = [32, 1], strides = [1, 1]} : vector<32x18xf32> to vector<32x1xf32>
    %253 = vector.broadcast %252 : vector<32x1xf32> to vector<32x256xf32>
    %254 = arith.addf %251, %253 : vector<32x256xf32>
    %cst_71 = arith.constant 0.000000e+00 : f32
    %255 = vector.broadcast %cst_71 : f32 to vector<32x256xf32>
    %256 = arith.maximumf %254, %255 : vector<32x256xf32>
    %257 = vector.broadcast %52 : vector<1x256xf32> to vector<32x256xf32>
    %258 = arith.mulf %54, %257 : vector<32x256xf32>
    %c17_i32_72 = arith.constant 17 : i32
    %259 = tpu.dynamic_rotate %258 by %c17_i32_72 dim 1 : vector<32x256xf32>, i32 -> vector<32x256xf32>
    %260 = vector.extract_strided_slice %55 {offsets = [0, 0], sizes = [1, 256], strides = [1, 1]} : vector<9x256xf32> to vector<1x256xf32>
    %261 = vector.broadcast %260 : vector<1x256xf32> to vector<32x256xf32>
    %262 = arith.mulf %259, %261 : vector<32x256xf32>
    %c16_i32_73 = arith.constant 16 : i32
    %263 = tpu.dynamic_rotate %258 by %c16_i32_73 dim 1 : vector<32x256xf32>, i32 -> vector<32x256xf32>
    %264 = vector.extract_strided_slice %55 {offsets = [1, 0], sizes = [1, 256], strides = [1, 1]} : vector<9x256xf32> to vector<1x256xf32>
    %265 = vector.broadcast %264 : vector<1x256xf32> to vector<32x256xf32>
    %266 = arith.mulf %263, %265 : vector<32x256xf32>
    %c15_i32_74 = arith.constant 15 : i32
    %267 = tpu.dynamic_rotate %258 by %c15_i32_74 dim 1 : vector<32x256xf32>, i32 -> vector<32x256xf32>
    %268 = vector.extract_strided_slice %55 {offsets = [2, 0], sizes = [1, 256], strides = [1, 1]} : vector<9x256xf32> to vector<1x256xf32>
    %269 = vector.broadcast %268 : vector<1x256xf32> to vector<32x256xf32>
    %270 = arith.mulf %267, %269 : vector<32x256xf32>
    %c1_i32_75 = arith.constant 1 : i32
    %271 = tpu.dynamic_rotate %258 by %c1_i32_75 dim 1 : vector<32x256xf32>, i32 -> vector<32x256xf32>
    %272 = vector.extract_strided_slice %55 {offsets = [3, 0], sizes = [1, 256], strides = [1, 1]} : vector<9x256xf32> to vector<1x256xf32>
    %273 = vector.broadcast %272 : vector<1x256xf32> to vector<32x256xf32>
    %274 = arith.mulf %271, %273 : vector<32x256xf32>
    %c255_i32_76 = arith.constant 255 : i32
    %275 = tpu.dynamic_rotate %258 by %c255_i32_76 dim 1 : vector<32x256xf32>, i32 -> vector<32x256xf32>
    %276 = vector.extract_strided_slice %55 {offsets = [5, 0], sizes = [1, 256], strides = [1, 1]} : vector<9x256xf32> to vector<1x256xf32>
    %277 = vector.broadcast %276 : vector<1x256xf32> to vector<32x256xf32>
    %278 = arith.mulf %275, %277 : vector<32x256xf32>
    %c241_i32_77 = arith.constant 241 : i32
    %279 = tpu.dynamic_rotate %258 by %c241_i32_77 dim 1 : vector<32x256xf32>, i32 -> vector<32x256xf32>
    %280 = vector.extract_strided_slice %55 {offsets = [6, 0], sizes = [1, 256], strides = [1, 1]} : vector<9x256xf32> to vector<1x256xf32>
    %281 = vector.broadcast %280 : vector<1x256xf32> to vector<32x256xf32>
    %282 = arith.mulf %279, %281 : vector<32x256xf32>
    %c240_i32_78 = arith.constant 240 : i32
    %283 = tpu.dynamic_rotate %258 by %c240_i32_78 dim 1 : vector<32x256xf32>, i32 -> vector<32x256xf32>
    %284 = vector.extract_strided_slice %55 {offsets = [7, 0], sizes = [1, 256], strides = [1, 1]} : vector<9x256xf32> to vector<1x256xf32>
    %285 = vector.broadcast %284 : vector<1x256xf32> to vector<32x256xf32>
    %286 = arith.mulf %283, %285 : vector<32x256xf32>
    %c239_i32_79 = arith.constant 239 : i32
    %287 = tpu.dynamic_rotate %258 by %c239_i32_79 dim 1 : vector<32x256xf32>, i32 -> vector<32x256xf32>
    %288 = vector.extract_strided_slice %55 {offsets = [8, 0], sizes = [1, 256], strides = [1, 1]} : vector<9x256xf32> to vector<1x256xf32>
    %289 = vector.broadcast %288 : vector<1x256xf32> to vector<32x256xf32>
    %290 = arith.mulf %287, %289 : vector<32x256xf32>
    %291 = tpu.concatenate %262, %266, %270, %274, %258, %278, %282, %286, %290 in 0 : vector<32x256xf32>, vector<32x256xf32>, vector<32x256xf32>, vector<32x256xf32>, vector<32x256xf32>, vector<32x256xf32>, vector<32x256xf32>, vector<32x256xf32>, vector<32x256xf32> -> vector<288x256xf32>
    %c17_i32_80 = arith.constant 17 : i32
    %292 = tpu.dynamic_rotate %256 by %c17_i32_80 dim 1 : vector<32x256xf32>, i32 -> vector<32x256xf32>
    %293 = vector.extract_strided_slice %55 {offsets = [0, 0], sizes = [1, 256], strides = [1, 1]} : vector<9x256xf32> to vector<1x256xf32>
    %294 = vector.broadcast %293 : vector<1x256xf32> to vector<32x256xf32>
    %295 = arith.mulf %292, %294 : vector<32x256xf32>
    %c16_i32_81 = arith.constant 16 : i32
    %296 = tpu.dynamic_rotate %256 by %c16_i32_81 dim 1 : vector<32x256xf32>, i32 -> vector<32x256xf32>
    %297 = vector.extract_strided_slice %55 {offsets = [1, 0], sizes = [1, 256], strides = [1, 1]} : vector<9x256xf32> to vector<1x256xf32>
    %298 = vector.broadcast %297 : vector<1x256xf32> to vector<32x256xf32>
    %299 = arith.mulf %296, %298 : vector<32x256xf32>
    %c15_i32_82 = arith.constant 15 : i32
    %300 = tpu.dynamic_rotate %256 by %c15_i32_82 dim 1 : vector<32x256xf32>, i32 -> vector<32x256xf32>
    %301 = vector.extract_strided_slice %55 {offsets = [2, 0], sizes = [1, 256], strides = [1, 1]} : vector<9x256xf32> to vector<1x256xf32>
    %302 = vector.broadcast %301 : vector<1x256xf32> to vector<32x256xf32>
    %303 = arith.mulf %300, %302 : vector<32x256xf32>
    %c1_i32_83 = arith.constant 1 : i32
    %304 = tpu.dynamic_rotate %256 by %c1_i32_83 dim 1 : vector<32x256xf32>, i32 -> vector<32x256xf32>
    %305 = vector.extract_strided_slice %55 {offsets = [3, 0], sizes = [1, 256], strides = [1, 1]} : vector<9x256xf32> to vector<1x256xf32>
    %306 = vector.broadcast %305 : vector<1x256xf32> to vector<32x256xf32>
    %307 = arith.mulf %304, %306 : vector<32x256xf32>
    %c255_i32_84 = arith.constant 255 : i32
    %308 = tpu.dynamic_rotate %256 by %c255_i32_84 dim 1 : vector<32x256xf32>, i32 -> vector<32x256xf32>
    %309 = vector.extract_strided_slice %55 {offsets = [5, 0], sizes = [1, 256], strides = [1, 1]} : vector<9x256xf32> to vector<1x256xf32>
    %310 = vector.broadcast %309 : vector<1x256xf32> to vector<32x256xf32>
    %311 = arith.mulf %308, %310 : vector<32x256xf32>
    %c241_i32_85 = arith.constant 241 : i32
    %312 = tpu.dynamic_rotate %256 by %c241_i32_85 dim 1 : vector<32x256xf32>, i32 -> vector<32x256xf32>
    %313 = vector.extract_strided_slice %55 {offsets = [6, 0], sizes = [1, 256], strides = [1, 1]} : vector<9x256xf32> to vector<1x256xf32>
    %314 = vector.broadcast %313 : vector<1x256xf32> to vector<32x256xf32>
    %315 = arith.mulf %312, %314 : vector<32x256xf32>
    %c240_i32_86 = arith.constant 240 : i32
    %316 = tpu.dynamic_rotate %256 by %c240_i32_86 dim 1 : vector<32x256xf32>, i32 -> vector<32x256xf32>
    %317 = vector.extract_strided_slice %55 {offsets = [7, 0], sizes = [1, 256], strides = [1, 1]} : vector<9x256xf32> to vector<1x256xf32>
    %318 = vector.broadcast %317 : vector<1x256xf32> to vector<32x256xf32>
    %319 = arith.mulf %316, %318 : vector<32x256xf32>
    %c239_i32_87 = arith.constant 239 : i32
    %320 = tpu.dynamic_rotate %256 by %c239_i32_87 dim 1 : vector<32x256xf32>, i32 -> vector<32x256xf32>
    %321 = vector.extract_strided_slice %55 {offsets = [8, 0], sizes = [1, 256], strides = [1, 1]} : vector<9x256xf32> to vector<1x256xf32>
    %322 = vector.broadcast %321 : vector<1x256xf32> to vector<32x256xf32>
    %323 = arith.mulf %320, %322 : vector<32x256xf32>
    %324 = tpu.concatenate %295, %299, %303, %307, %256, %311, %315, %319, %323 in 0 : vector<32x256xf32>, vector<32x256xf32>, vector<32x256xf32>, vector<32x256xf32>, vector<32x256xf32>, vector<32x256xf32>, vector<32x256xf32>, vector<32x256xf32>, vector<32x256xf32> -> vector<288x256xf32>
    %325 = tpu.concatenate %291, %324 in 0 : vector<288x256xf32>, vector<288x256xf32> -> vector<576x256xf32>
    %c0_88 = arith.constant 0 : index
    %c0_89 = arith.constant 0 : index
    %326 = vector.load %arg9[%c0_88, %c0_89] : memref<16x576xf32, #tpu.memory_space<vmem>>, vector<16x576xf32>
    %cst_90 = arith.constant dense<0.000000e+00> : vector<16x256xf32>
    %327 = tpu.matmul %326, %325, %cst_90 {dimension_numbers = #tpu.dot_dimension_numbers<[1], [0], [0], [1], [0, 0, 1, 1], [], []>} : vector<16x576xf32>, vector<576x256xf32>, vector<16x256xf32> -> vector<16x256xf32>
    %328 = vector.extract_strided_slice %56 {offsets = [0, 14], sizes = [16, 1], strides = [1, 1]} : vector<32x18xf32> to vector<16x1xf32>
    %329 = vector.broadcast %328 : vector<16x1xf32> to vector<16x256xf32>
    %330 = arith.mulf %327, %329 : vector<16x256xf32>
    %331 = vector.extract_strided_slice %56 {offsets = [0, 15], sizes = [16, 1], strides = [1, 1]} : vector<32x18xf32> to vector<16x1xf32>
    %332 = vector.broadcast %331 : vector<16x1xf32> to vector<16x256xf32>
    %333 = arith.addf %330, %332 : vector<16x256xf32>
    %cst_91 = arith.constant 0.000000e+00 : f32
    %334 = vector.broadcast %cst_91 : f32 to vector<16x256xf32>
    %335 = arith.maximumf %333, %334 : vector<16x256xf32>
    %336 = vector.extract_strided_slice %56 {offsets = [0, 17], sizes = [1, 1], strides = [1, 1]} : vector<32x18xf32> to vector<1x1xf32>
    %337 = vector.extract_strided_slice %56 {offsets = [0, 16], sizes = [16, 1], strides = [1, 1]} : vector<32x18xf32> to vector<16x1xf32>
    %338 = vector.broadcast %337 : vector<16x1xf32> to vector<16x256xf32>
    %339 = arith.mulf %335, %338 : vector<16x256xf32>
    %cst_92 = arith.constant dense<0.000000e+00> : vector<256xf32>
    %340 = vector.multi_reduction <add>, %339, %cst_92 [0] : vector<16x256xf32> to vector<256xf32>
    %341 = vector.shape_cast %340 : vector<256xf32> to vector<1x256xf32>
    %342 = vector.broadcast %336 : vector<1x1xf32> to vector<1x256xf32>
    %343 = arith.addf %341, %342 : vector<1x256xf32>
    %344 = arith.addf %343, %4 : vector<1x256xf32>
    %345 = arith.addf %344, %30 : vector<1x256xf32>
    %346 = vector.shape_cast %345 : vector<1x256xf32> to vector<1x1x256xf32>
    %c0_93 = arith.constant 0 : index
    %c0_94 = arith.constant 0 : index
    %c0_95 = arith.constant 0 : index
    %347 = vector.load %arg11[%c0_93, %c0_94, %c0_95] : memref<1x1x256xf32, #tpu.memory_space<vmem>>, vector<1x1x256xf32>
    tpu.vector_store %arg11[%c0_93, %c0_94, %c0_95], %346 {strides = array<i32>} : memref<1x1x256xf32, #tpu.memory_space<vmem>>, vector<1x1x256xf32>,
    return
  }
  func.func @transform_0(%arg0: i32) -> (i32, i32, i32) {
    %c0_i32 = arith.constant 0 : i32
    %c0_i32_0 = arith.constant 0 : i32
    %c0_i32_1 = arith.constant 0 : i32
    return %arg0, %c0_i32, %c0_i32_0 : i32, i32, i32
  }
  func.func @transform_1(%arg0: i32) -> (i32, i32, i32) {
    %c0_i32 = arith.constant 0 : i32
    %c0_i32_0 = arith.constant 0 : i32
    %c0_i32_1 = arith.constant 0 : i32
    return %arg0, %c0_i32, %c0_i32_0 : i32, i32, i32
  }
  func.func @transform_2(%arg0: i32) -> (i32, i32, i32) {
    %c0_i32 = arith.constant 0 : i32
    %c0_i32_0 = arith.constant 0 : i32
    %c0_i32_1 = arith.constant 0 : i32
    return %arg0, %c0_i32, %c0_i32_0 : i32, i32, i32
  }
  func.func @transform_3(%arg0: i32) -> (i32, i32) {
    %c0_i32 = arith.constant 0 : i32
    %c0_i32_0 = arith.constant 0 : i32
    %c0_i32_1 = arith.constant 0 : i32
    return %c0_i32, %c0_i32_0 : i32, i32
  }
  func.func @transform_4(%arg0: i32) -> (i32, i32) {
    %c0_i32 = arith.constant 0 : i32
    %c0_i32_0 = arith.constant 0 : i32
    %c0_i32_1 = arith.constant 0 : i32
    return %c0_i32, %c0_i32_0 : i32, i32
  }
  func.func @transform_5(%arg0: i32) -> (i32, i32) {
    %c0_i32 = arith.constant 0 : i32
    %c0_i32_0 = arith.constant 0 : i32
    %c0_i32_1 = arith.constant 0 : i32
    return %c0_i32, %c0_i32_0 : i32, i32
  }
  func.func @transform_6(%arg0: i32) -> (i32, i32, i32) {
    %c0_i32 = arith.constant 0 : i32
    %c0_i32_0 = arith.constant 0 : i32
    %c0_i32_1 = arith.constant 0 : i32
    %c0_i32_2 = arith.constant 0 : i32
    return %c0_i32, %c0_i32_0, %c0_i32_1 : i32, i32, i32
  }
  func.func @transform_7(%arg0: i32) -> (i32, i32, i32) {
    %c0_i32 = arith.constant 0 : i32
    %c0_i32_0 = arith.constant 0 : i32
    %c0_i32_1 = arith.constant 0 : i32
    %c0_i32_2 = arith.constant 0 : i32
    return %c0_i32, %c0_i32_0, %c0_i32_1 : i32, i32, i32
  }
  func.func @transform_8(%arg0: i32) -> (i32, i32) {
    %c0_i32 = arith.constant 0 : i32
    %c0_i32_0 = arith.constant 0 : i32
    %c0_i32_1 = arith.constant 0 : i32
    return %c0_i32, %c0_i32_0 : i32, i32
  }
  func.func @transform_9(%arg0: i32) -> (i32, i32) {
    %c0_i32 = arith.constant 0 : i32
    %c0_i32_0 = arith.constant 0 : i32
    %c0_i32_1 = arith.constant 0 : i32
    return %c0_i32, %c0_i32_0 : i32, i32
  }
  func.func @transform_10(%arg0: i32) -> (i32, i32, i32) {
    %c0_i32 = arith.constant 0 : i32
    %c0_i32_0 = arith.constant 0 : i32
    %c0_i32_1 = arith.constant 0 : i32
    return %arg0, %c0_i32, %c0_i32_0 : i32, i32, i32
  }
}

</mosaic_0001>

<bundles_post_ra>
// kernel: drd2_forward.1
= control target key start
LH: loop header
LB: loop body
LE: loop exit
PB: predicated region body
PF: predicated region fallthrough
CT: control target
= control target key end

     0   :  { %15 = vsyncpa [#allocation3], 0  ;;  %s9090_s0 = inlined_call_operand.vmem [shape: f32[2,32,256], index: 0, kind: input, shape index: {}]   ;;  %s9091_s1 = inlined_call_operand.vmem [shape: f32[2,1,64], index: 1, kind: input, shape index: {}]   ;;  %s9092_s2 = inlined_call_operand.vmem [shape: f32[2,1,64], index: 2, kind: input, shape index: {}]   ;;  %s9093_s3 = inlined_call_operand.vmem [shape: f32[64,768], index: 3, kind: input, shape index: {}]   ;;  %s9094_s4 = inlined_call_operand.hbm [shape: f32[64,768], index: 4, kind: input, shape index: {}]   ;;  %s9095_s5 = inlined_call_operand.hbm [shape: f32[9,256], index: 5, kind: input, shape index: {}]   ;;  %s9096_s6 = inlined_call_operand.hbm [shape: f32[2,32,32], index: 6, kind: input, shape index: {}]   ;;  %s9097_s7 = inlined_call_operand.vmem [shape: f32[4,32,288], index: 7, kind: input, shape index: {}]   ;;  %s9098_s8 = inlined_call_operand.hbm [shape: f32[16,576], index: 8, kind: input, shape index: {}]   ;;  %s9099_s9 = inlined_call_operand.vmem [shape: f32[32,18], index: 9, kind: input, shape index: {}]   ;;  %s9100_s10 = inlined_call_operand.vmem [shape: f32[2,1,256], index: 10, kind: output, shape index: {}]  }
   0x1   :  { %16 = vsyncpa [#allocation5], 0 }
   0x2   :  { %17 = vsyncpa [#allocation8], 0  ;;  %s5672_s13 = smov 0  }
   0x3 LB: > { %s5577_s14 = smov [#allocation4]   ;;  %s5678_s16 = sadd.s32 4294967295, %s5575_s13   ;;  %s5575_s13 = sphi %s5672_s13, %s23_s13  }
   0x4   : > { %s307_s15 = sshll.u32 %s5577_s14, 4  ;;  %p4571_p0 = scmp.ge.s32.totalorder %s5575_s13, 1  ;;  %s5683_s15 = int_to_ptr.vmem [resolvable:$true] %s307_s15 }
   0x5   : > { %p279_p1 = scmp.lt.s32.totalorder %s5575_s13, 3  ;;  %p9101_p2 = scmp.eq.s32.totalorder %s5678_s16, 0 }
   0x6   : > { %s5578_s18 = smov [#allocation2]   ;;  %s5579_s21 = smov [#allocation6]  }
   0x7   : > { %p5685_p3 = pnand %p4571_p0, %p279_p1  ;;  %s294_s19 = sshll.u32 %s5578_s18, 4  ;;  %s5691_s19 = int_to_ptr.vmem [resolvable:$true] %s294_s19 }
   0x8   : > { %s5699_s22 = sshll.u32 %s5579_s21, 4  ;;  %s5445_s25 = scalar_lea.hbm %s9095_s5, 512  ;;  %s321_s22 = int_to_ptr.vmem [resolvable:$true] %s5699_s22 }
   0x9   : > { %s9146_s17 = scalar_select %p5685_p3, 1, 0 }
   0xa   : > { %p5266_p4 = pneg %p5685_p3  ;;  %p5446_p6 = scmp.ne.s32.totalorder %s9095_s5, %s5445_s25 }
   0xb   : > { %p5452_p10 = scmp.lt.u32.totalorder %s5445_s25, %s9095_s5 }
   0xc   : > { %p5695_p5 = pnand %p9101_p2, %p5266_p4 }
   0xe   : > { %p5709_p7 = pneg %p5695_p5 }
  0x10   : > { %p5448_p8 = pnand %p5709_p7, %p5446_p6 }
  0x12   : > { %p5449_p9 = pneg %p5448_p8 }
  0x14   : > { %p5454_p11 = pnand %p5452_p10, %p5449_p9 }
  0x16   : > { %5457 = shalt.err (!%p5454_p11)
}
  0x17   : > { %s5458_s11 = scalar_lea.vmem %s5683_s15, 512  ;;  %p5466_p1 = scmp.lt.s32.totalorder %s5683_s15, %s5683_s15 }
  0x18   : > { %p5459_p12 = scmp.ne.s32.totalorder %s5683_s15, %s5458_s11  ;;  %p5467_p4 = scmp.lt.s32.totalorder %s5458_s11, %s5458_s11 }
  0x1a   : > { %p5461_p13 = pnand %p5459_p12, %p5709_p7  ;;  %p5468_p6 = por %p5467_p4, %p5466_p1 }
  0x1c   : > { %p5462_p0 = pneg %p5461_p13 }
  0x1e   : > { %p5469_p8 = pnand %p5468_p6, %p5462_p0 }
  0x20   : > { %5472 = shalt.err (!%p5469_p8)
}
  0x21   : > { %s5580_s12 = smov 256   ;;  %s5581_s14 = smov 16  }
  0x22   : > { %5272 = dma.hbm_to_vmem [thread:$0]  (!%p5695_p5), %s9095_s5, 512, %s5683_s15, [#allocation5], %s5580_s12, %s5580_s12, %s5581_s14  }
  0x23   : > { %s5473_s25 = scalar_lea.hbm %s9094_s4, 6144 }
  0x24   : > { %p5474_p9 = scmp.ne.s32.totalorder %s9094_s4, %s5473_s25  ;;  %p5480_p12 = scmp.lt.u32.totalorder %s5473_s25, %s9094_s4 }
  0x26   : > { %p5476_p10 = pnand %p5474_p9, %p5709_p7 }
  0x28   : > { %p5477_p11 = pneg %p5476_p10 }
  0x2a   : > { %p5482_p13 = pnand %p5480_p12, %p5477_p11 }
  0x2c   : > { %5485 = shalt.err (!%p5482_p13)
}
  0x2d   : > { %s5486_s15 = scalar_lea.vmem %s5691_s19, 6144  ;;  %p5494_p6 = scmp.lt.s32.totalorder %s5691_s19, %s5691_s19 }
  0x2e   : > { %p5487_p0 = scmp.ne.s32.totalorder %s5691_s19, %s5486_s15  ;;  %p5495_p8 = scmp.lt.s32.totalorder %s5486_s15, %s5486_s15 }
  0x30   : > { %p5489_p1 = pnand %p5487_p0, %p5709_p7  ;;  %p5496_p9 = por %p5495_p8, %p5494_p6 }
  0x32   : > { %p5490_p4 = pneg %p5489_p1 }
  0x34   : > { %p5497_p10 = pnand %p5496_p9, %p5490_p4 }
  0x36   : > { %5500 = shalt.err (!%p5497_p10)
}
  0x37   : > { %s5582_s11 = smov 768   ;;  %s5583_s12 = smov 48  }
  0x38   : > { %5269 = dma.hbm_to_vmem [thread:$0]  (!%p5695_p5), %s9094_s4, 6144, %s5691_s19, [#allocation3], %s5582_s11, %s5582_s11, %s5583_s12  }
  0x39   : > { %s5501_s24 = scalar_lea.hbm %s9096_s6, 1024 }
  0x3a   : > { %p5502_p11 = scmp.ne.s32.totalorder %s9096_s6, %s5501_s24  ;;  %p5508_p0 = scmp.lt.u32.totalorder %s5501_s24, %s9096_s6 }
  0x3c   : > { %p5504_p12 = pnand %p5502_p11, %p5709_p7 }
  0x3e   : > { %p5505_p13 = pneg %p5504_p12 }
  0x40   : > { %p5510_p1 = pnand %p5508_p0, %p5505_p13 }
  0x42   : > { %5513 = shalt.err (!%p5510_p1)
}
  0x43   : > { %s5514_s30 = scalar_lea.vmem %s321_s22, 1024  ;;  %p5522_p9 = scmp.lt.s32.totalorder %s321_s22, %s321_s22 }
  0x44   : > { %p5515_p4 = scmp.ne.s32.totalorder %s321_s22, %s5514_s30  ;;  %p5523_p10 = scmp.lt.s32.totalorder %s5514_s30, %s5514_s30 }
  0x46   : > { %p5517_p6 = pnand %p5515_p4, %p5709_p7  ;;  %p5524_p2 = por %p5523_p10, %p5522_p9 }
  0x48   : > { %p5518_p8 = pneg %p5517_p6 }
  0x4a   : > { %p5525_p3 = pnand %p5524_p2, %p5518_p8 }
  0x4c   : > { %5528 = shalt.err (!%p5525_p3)
}
  0x4d   : > { %s5584_s19 = smov 128   ;;  %s5585_s15 = smov 8  }
  0x4e   : > { %5275 = dma.hbm_to_vmem [thread:$0]  (!%p5695_p5), %s9096_s6, 1024, %s321_s22, [#allocation5], %s5584_s19, %s5584_s19, %s5585_s15  }
  0x4f   : > { %s5586_s14 = smov [#allocation7]   ;;  %s5529_s24 = scalar_lea.hbm %s9098_s8, 1280 }
  0x50   : > { %s336_s18 = sshll.u32 %s5586_s14, 4  ;;  %p5530_p2 = scmp.ne.s32.totalorder %s9098_s8, %s5529_s24  ;;  %s337_s18 = int_to_ptr.vmem [resolvable:$true] %s336_s18 }
  0x51   : > { %p5536_p12 = scmp.lt.u32.totalorder %s5529_s24, %s9098_s8 }
  0x52   : > { %p5532_p3 = pnand %p5530_p2, %p5709_p7 }
  0x54   : > { %p5533_p11 = pneg %p5532_p3 }
  0x56   : > { %p5538_p13 = pnand %p5536_p12, %p5533_p11 }
  0x58   : > { %5541 = shalt.err (!%p5538_p13)
}
  0x59   : > { %s5542_s22 = scalar_lea.vmem %s337_s18, 1280  ;;  %p5550_p6 = scmp.lt.s32.totalorder %s337_s18, %s337_s18 }
  0x5a   : > { %p5543_p0 = scmp.ne.s32.totalorder %s337_s18, %s5542_s22  ;;  %p5551_p8 = scmp.lt.s32.totalorder %s5542_s22, %s5542_s22 }
  0x5c   : > { %p5545_p1 = pnand %p5543_p0, %p5709_p7  ;;  %p5552_p9 = por %p5551_p8, %p5550_p6 }
  0x5e   : > { %p5546_p4 = pneg %p5545_p1 }
  0x60   : > { %p5553_p10 = pnand %p5552_p9, %p5546_p4 }
  0x62   : > { %5556 = shalt.err (!%p5553_p10)
}
  0x63   : > { %s5587_s30 = smov 640   ;;  %s5588_s19 = smov 40  }
  0x64   : > { %5278 = dma.hbm_to_vmem [thread:$0]  (!%p5695_p5), %s9098_s8, 1280, %s337_s18, [#allocation8], %s5587_s30, %s5587_s30, %s5588_s19  }
  0x65   : > { %p9149_p2 = scmp.ne.s32.totalorder %s9146_s17, 0 }
  0x67   : > { %375 = sbr.rel (%p9149_p2) target bundleno = 3016 (0xbc8), region = 60 }
  0x6e   : > { %p9150_p3 = scmp.eq.s32.totalorder %s5678_s16, 0 }
  0x70   : > { %5562 = dma.done.wait (%p9150_p3), [#allocation3], 6144   ;;  %p9151_p7 = pmov %p9150_p3 }
  0x71   : > { %p9152_p11 = pmov %p9150_p3 }
  0x72   : > { %5564 = vsyncadd (%p9151_p7), [#allocation3], 4294961152 }
  0x73   : > { %5566 = dma.done.wait (%p9152_p11), [#allocation5], 1536   ;;  %p9153_p12 = pmov %p9150_p3 }
  0x74   : > { %p9154_p13 = pmov %p9150_p3 }
  0x75   : > { %5568 = vsyncadd (%p9153_p12), [#allocation5], 4294965760 }
  0x76   : > { %5570 = dma.done.wait (%p9154_p13), [#allocation8], 1280   ;;  %p9155_p5 = pmov %p9150_p3 }
  0x77   : > { %v9104_v0 = vmov 0.0   ;;  %v5590_v1 = vmov 13   ;;  %v5591_v2 = vmov 12   ;;  %v447_v3 = vld [vmem:[%s9093_s3 + $0x8] sm:$0xff]  ;;  %v453_v4 = vld [vmem:[%s9093_s3 + $0x38] sm:$0xff]  ;;  %v446_v8 = vld [vmem:[%s9093_s3] sm:$0xff] }
  0x78   : > { %5572 = vsyncadd (%p9155_p5), [#allocation8], 4294966016  ;;  %562 = vmatprep.mubr.f32.mxu0 %v9104_v0  ;;  %633 = vmatprep.mubr.f32.mxu1 %v9104_v0  ;;  %v449_v5 = vld [vmem:[%s9093_s3 + $0x18] sm:$0xff]  ;;  %v4666_v6 = vpack.c.bf16 %v453_v4, %v447_v3  ;;  %v455_v7 = vld [vmem:[%s9093_s3 + $0x48] sm:$0xff]  ;;  %p430_p0 = scmp.lt.s32.totalorder %s5678_s16, 1  ;;  %vm494_vm0 = vcmask 523264  }
  0x79   : > { %5336 = vset.pattern.permute.xlu1 %v5590_v1  ;;  %5335 = vset.pattern.permute.xlu0 %v5591_v2  ;;  %v452_v9 = vld [vmem:[%s9093_s3 + $0x30] sm:$0xff]  ;;  %v4682_v10 = vpack.c.bf16 %v455_v7, %v449_v5  ;;  %v454_v13 = vld [vmem:[%s9093_s3 + $0x40] sm:$0xff]  ;;  %v459_v14 = vld [vmem:[%s9093_s3 + $0x68] sm:$0xff]  ;;  %vm1134_vm1 = vcmask 261120   ;;  %s5594_s21 = smov 17   ;;  %s5595_s23 = smov 16  }
  0x7a   : > { %v4668_v11 = vpack.c.bf16 %v452_v9, %v446_v8  ;;  %v448_v12 = vld [vmem:[%s9093_s3 + $0x10] sm:$0xff]  ;;  %4667 = vmatprep.subr.bf16.mxu0 %v4666_v6  ;;  %v465_v16 = vld [vmem:[%s9093_s3 + $0x98] sm:$0xff]  ;;  %v467_v18 = vld [vmem:[%s9093_s3 + $0xa8] sm:$0xff]  ;;  %s9216_s16 = smov (!%p430_p0, %s5678_s16), 1  ;;  %s5596_s24 = smov 15  }
  0x7b   : > { %v4684_v15 = vpack.c.bf16 %v454_v13, %v448_v12  ;;  %v461_v17 = vld [vmem:[%s9093_s3 + $0x78] sm:$0xff]  ;;  %4683 = vmatprep.subr.bf16.mxu1 %v4682_v10  ;;  %v4670_v19 = vpack.c.bf16 %v465_v16, %v459_v14  ;;  %v458_v21 = vld [vmem:[%s9093_s3 + $0x60] sm:$0xff]  ;;  %v464_v22 = vld [vmem:[%s9093_s3 + $0x90] sm:$0xff]  ;;  %s437_s15 = scalar_lea.vmem %s9091_s1, %s9216_s16  ;;  %s440_s27 = scalar_lea.vmem %s9092_s2, %s9216_s16 }
  0x7c   : > { %4669 = vmatpush1.bf16.msra.mxu0 %v4668_v11  ;;  %v4686_v20 = vpack.c.bf16 %v467_v18, %v461_v17  ;;  %v460_v23 = vld [vmem:[%s9093_s3 + $0x70] sm:$0xff]  ;;  %v4672_v24 = vpack.c.bf16 %v464_v22, %v458_v21  ;;  %v466_v25 = vld [vmem:[%s9093_s3 + $0xa0] sm:$0xff]  ;;  %v471_v26 = vld [vmem:[%s9093_s3 + $0xc8] sm:$0xff]  ;;  %s4665_s29 = sshll.u32 %s9216_s16, 6  ;;  %s5597_s25 = smov 1  }
  0x7d   : > { %4685 = vmatpush1.bf16.msra.mxu1 %v4684_v15  ;;  %v477_v27 = vld [vmem:[%s9093_s3 + $0xf8] sm:$0xff]  ;;  %4671 = vmatprep.subr.bf16.mxu0 %v4670_v19  ;;  %v4688_v28 = vpack.c.bf16 %v466_v25, %v460_v23  ;;  %v479_v31 = vld [vmem:[%s9093_s3 + $0x108] sm:$0xff]  ;;  %v470_v32 = vld [vmem:[%s9093_s3 + $0xc0] sm:$0xff]  ;;  %s5990_s11 = scalar_lea.vmem %s9090_s0, %s4665_s29  ;;  %s5598_s26 = smov 127  }
  0x7e   : > { %4687 = vmatprep.subr.bf16.mxu1 %v4686_v20  ;;  %v4674_v29 = vpack.c.bf16 %v477_v27, %v471_v26  ;;  %v473_v30 = vld [vmem:[%s9093_s3 + $0xd8] sm:$0xff]  ;;  %v476_v34 = vld [vmem:[%s9093_s3 + $0xf0] sm:$0xff]  ;;  %v478_v36 = vld [vmem:[%s9093_s3 + $0x100] sm:$0xff]  ;;  %s5600_s29 = smov 112   ;;  %s5601_s19 = smov 111  }
  0x7f   : > { %v4690_v33 = vpack.c.bf16 %v479_v31, %v473_v30  ;;  %v472_v35 = vld [vmem:[%s9093_s3 + $0xd0] sm:$0xff]  ;;  %v4676_v37 = vpack.c.bf16 %v476_v34, %v470_v32  ;;  %v483_v38 = vld [vmem:[%s9093_s3 + $0x128] sm:$0xff]  ;;  %v489_v39 = vld [vmem:[%s9093_s3 + $0x158] sm:$0xff] }
  0x80   : > { %4673 = vmatpush1.bf16.msra.mxu0 %v4672_v24  ;;  %v485_v40 = vld [vmem:[%s9093_s3 + $0x138] sm:$0xff]  ;;  %v4692_v41 = vpack.c.bf16 %v478_v36, %v472_v35  ;;  %v4678_v42 = vpack.c.bf16 %v489_v39, %v483_v38  ;;  %v491_v43 = vld [vmem:[%s9093_s3 + $0x168] sm:$0xff]  ;;  %v482_v44 = vld [vmem:[%s9093_s3 + $0x120] sm:$0xff] }
  0x81   : > { %4689 = vmatpush1.bf16.msra.mxu1 %v4688_v28  ;;  %4675 = vmatprep.subr.bf16.mxu0 %v4674_v29  ;;  %v488_v45 = vld [vmem:[%s9093_s3 + $0x150] sm:$0xff]  ;;  %v4694_v46 = vpack.c.bf16 %v491_v43, %v485_v40  ;;  %v490_v48 = vld [vmem:[%s9093_s3 + $0x160] sm:$0xff]  ;;  %v451_v49 = vld [vmem:[%s9093_s3 + $0x28] sm:$0xff] }
  0x82   : > { %4691 = vmatprep.subr.bf16.mxu1 %v4690_v33  ;;  %v484_v47 = vld [vmem:[%s9093_s3 + $0x130] sm:$0xff]  ;;  %v457_v50 = vld [vmem:[%s9093_s3 + $0x58] sm:$0xff]  ;;  %v763_v51 = vld [vmem:[#allocation2 + $0x8] sm:$0xff]  ;;  %v4680_v52 = vpack.c.bf16 %v488_v45, %v482_v44 }
  0x83   : > { %v769_v53 = vld [vmem:[#allocation2 + $0x38] sm:$0xff]  ;;  %v4696_v54 = vpack.c.bf16 %v490_v48, %v484_v47  ;;  %v4698_v55 = vpack.c.bf16 %v457_v50, %v451_v49  ;;  %v450_v56 = vld [vmem:[%s9093_s3 + $0x20] sm:$0xff]  ;;  %v456_v57 = vld [vmem:[%s9093_s3 + $0x50] sm:$0xff] }
  0x84   : > { %4677 = vmatpush1.bf16.msra.mxu0 %v4676_v37  ;;  %v762_v58 = vld [vmem:[#allocation2] sm:$0xff]  ;;  %v4714_v59 = vpack.c.bf16 %v769_v53, %v763_v51  ;;  %v768_v60 = vld [vmem:[#allocation2 + $0x30] sm:$0xff]  ;;  %v463_v61 = vld [vmem:[%s9093_s3 + $0x88] sm:$0xff]  ;;  %v4700_v5 = vpack.c.bf16 %v456_v57, %v450_v56 }
  0x85   : > { %4693 = vmatpush1.bf16.msra.mxu1 %v4692_v41  ;;  %4679 = vmatprep.subr.bf16.mxu0 %v4678_v42  ;;  %v469_v62 = vld [vmem:[%s9093_s3 + $0xb8] sm:$0xff]  ;;  %v775_v63 = vld [vmem:[#allocation2 + $0x68] sm:$0xff]  ;;  %v5932_v4 = vld [vmem:[%s437_s15] sm:$0x1]  ;;  %v4716_v6 = vpack.c.bf16 %v768_v60, %v762_v58 }
  0x86   : > { %4695 = vmatprep.subr.bf16.mxu1 %v4694_v46  ;;  %v781_v3 = vld [vmem:[#allocation2 + $0x98] sm:$0xff]  ;;  %v4702_v7 = vpack.c.bf16 %v469_v62, %v463_v61  ;;  %v462_v8 = vld [vmem:[%s9093_s3 + $0x80] sm:$0xff]  ;;  %v468_v9 = vld [vmem:[%s9093_s3 + $0xb0] sm:$0xff] }
  0x87   : > { %v774_v10 = vld [vmem:[#allocation2 + $0x60] sm:$0xff]  ;;  %v4718_v11 = vpack.c.bf16 %v781_v3, %v775_v63  ;;  %v780_v12 = vld [vmem:[#allocation2 + $0x90] sm:$0xff]  ;;  %v475_v13 = vld [vmem:[%s9093_s3 + $0xe8] sm:$0xff]  ;;  %v4704_v17 = vpack.c.bf16 %v468_v9, %v462_v8 }
  0x88   : > { %4681 = vmatpush1.bf16.msra.mxu0 %v4680_v52  ;;  %v481_v14 = vld [vmem:[%s9093_s3 + $0x118] sm:$0xff]  ;;  %v787_v15 = vld [vmem:[#allocation2 + $0xc8] sm:$0xff]  ;;  %v4720_v18 = vpack.c.bf16 %v780_v12, %v774_v10  ;;  %v474_v20 = vld [vmem:[%s9093_s3 + $0xe0] sm:$0xff] }
  0x89   : > { %4697 = vmatpush1.bf16.msra.mxu1 %v4696_v54  ;;  %4699 = vmatprep.subr.bf16.mxu0 %v4698_v55  ;;  %v793_v16 = vld [vmem:[#allocation2 + $0xf8] sm:$0xff]  ;;  %v4706_v19 = vpack.c.bf16 %v481_v14, %v475_v13  ;;  %v480_v21 = vld [vmem:[%s9093_s3 + $0x110] sm:$0xff]  ;;  %v786_v22 = vld [vmem:[#allocation2 + $0xc0] sm:$0xff] }
  0x8a   : > { %4715 = vmatprep.subr.bf16.mxu1 %v4714_v59  ;;  %v4722_v23 = vpack.c.bf16 %v793_v16, %v787_v15  ;;  %v792_v24 = vld [vmem:[#allocation2 + $0xf0] sm:$0xff]  ;;  %v487_v25 = vld [vmem:[%s9093_s3 + $0x148] sm:$0xff]  ;;  %v493_v26 = vld [vmem:[%s9093_s3 + $0x178] sm:$0xff]  ;;  %v4708_v29 = vpack.c.bf16 %v480_v21, %v474_v20 }
  0x8b   : > { %4585 = vmatmul.mubr.msk.f32.vlgmr.msra.gmra.mrb[0].mxu0 %vm494_vm0, %v5932_v4  ;;  %v799_v27 = vld [vmem:[#allocation2 + $0x128] sm:$0xff]  ;;  %v805_v28 = vld [vmem:[#allocation2 + $0x158] sm:$0xff]  ;;  %v4724_v30 = vpack.c.bf16 %v792_v24, %v786_v22  ;;  %v4710_v31 = vpack.c.bf16 %v493_v26, %v487_v25  ;;  %v486_v32 = vld [vmem:[%s9093_s3 + $0x140] sm:$0xff] }
  0x8c   : > { %4586 = vmatmul.mubr.msk.f32.vlgmr.msra.gmra.mrb[0].mxu1 %vm494_vm0, %v5932_v4  ;;  %4701 = vmatpush1.bf16.msra.mxu0 %v4700_v5  ;;  %v492_v33 = vld [vmem:[%s9093_s3 + $0x170] sm:$0xff]  ;;  %v798_v34 = vld [vmem:[#allocation2 + $0x120] sm:$0xff]  ;;  %v4726_v35 = vpack.c.bf16 %v805_v28, %v799_v27  ;;  %v765_v37 = vld [vmem:[#allocation2 + $0x18] sm:$0xff] }
  0x8d   : > { %4717 = vmatpush1.bf16.msra.mxu1 %v4716_v6  ;;  %4703 = vmatprep.subr.bf16.mxu0 %v4702_v7  ;;  %v804_v36 = vld [vmem:[#allocation2 + $0x150] sm:$0xff]  ;;  %v771_v38 = vld [vmem:[#allocation2 + $0x48] sm:$0xff]  ;;  %v773_v40 = vld [vmem:[#allocation2 + $0x58] sm:$0xff]  ;;  %v4712_v41 = vpack.c.bf16 %v492_v33, %v486_v32 }
  0x8e   : > { %4719 = vmatprep.subr.bf16.mxu1 %v4718_v11  ;;  %704 = vmatprep.mubr.f32.mxu0 %v9104_v0  ;;  %v767_v39 = vld [vmem:[#allocation2 + $0x28] sm:$0xff]  ;;  %v4728_v42 = vpack.c.bf16 %v804_v36, %v798_v34  ;;  %v4730_v43 = vpack.c.bf16 %v771_v38, %v765_v37  ;;  %v764_v44 = vld [vmem:[#allocation2 + $0x10] sm:$0xff]  ;;  %v770_v45 = vld [vmem:[#allocation2 + $0x40] sm:$0xff] }
  0x8f   : > { %877 = vmatprep.mubr.f32.mxu1 %v9104_v0  ;;  %v766_v46 = vld [vmem:[#allocation2 + $0x20] sm:$0xff]  ;;  %v4746_v47 = vpack.c.bf16 %v773_v40, %v767_v39  ;;  %v772_v48 = vld [vmem:[#allocation2 + $0x50] sm:$0xff]  ;;  %v777_v49 = vld [vmem:[#allocation2 + $0x78] sm:$0xff]  ;;  %v4732_v54 = vpack.c.bf16 %v770_v45, %v764_v44  ;;  %v5593_v45 = vmov 1  }
  0x90   : > { %4705 = vmatpush1.bf16.msra.mxu0 %v4704_v17  ;;  %v783_v50 = vld [vmem:[#allocation2 + $0xa8] sm:$0xff]  ;;  %v785_v52 = vld [vmem:[#allocation2 + $0xb8] sm:$0xff]  ;;  %v5974_v53 = vld [vmem:[%s440_s27] sm:$0x1]  ;;  %v4748_v55 = vpack.c.bf16 %v772_v48, %v766_v46  ;;  %s5599_s27 = smov 113  }
  0x91   : > { %4721 = vmatpush1.bf16.msra.mxu1 %v4720_v18  ;;  %4707 = vmatprep.subr.bf16.mxu0 %v4706_v19  ;;  %v779_v51 = vld [vmem:[#allocation2 + $0x88] sm:$0xff]  ;;  %v4734_v56 = vpack.c.bf16 %v783_v50, %v777_v49  ;;  %v776_v57 = vld [vmem:[#allocation2 + $0x70] sm:$0xff]  ;;  %v782_v58 = vld [vmem:[#allocation2 + $0xa0] sm:$0xff] }
  0x92   : > { %4723 = vmatprep.subr.bf16.mxu1 %v4722_v23  ;;  %v778_v59 = vld [vmem:[#allocation2 + $0x80] sm:$0xff]  ;;  %v4750_v60 = vpack.c.bf16 %v785_v52, %v779_v51  ;;  %v784_v61 = vld [vmem:[#allocation2 + $0xb0] sm:$0xff]  ;;  %v789_v62 = vld [vmem:[#allocation2 + $0xd8] sm:$0xff]  ;;  %v4736_v6 = vpack.c.bf16 %v782_v58, %v776_v57 }
  0x93   : > { %v795_v63 = vld [vmem:[#allocation2 + $0x108] sm:$0xff]  ;;  %v797_v5 = vld [vmem:[#allocation2 + $0x118] sm:$0xff]  ;;  %v5984_v7 = vld [vmem:[%s9099_s9] sm:$0xff]  ;;  %v4752_v8 = vpack.c.bf16 %v784_v61, %v778_v59  ;;  %v9103_v61 = vlaneseq }
  0x94   : > { %4709 = vmatpush1.bf16.msra.mxu0 %v4708_v29  ;;  %v791_v3 = vld [vmem:[#allocation2 + $0xe8] sm:$0xff]  ;;  %v4738_v9 = vpack.c.bf16 %v795_v63, %v789_v62  ;;  %v788_v10 = vld [vmem:[#allocation2 + $0xd0] sm:$0xff]  ;;  %v794_v11 = vld [vmem:[#allocation2 + $0x100] sm:$0xff]  ;;  %1237 = vperm.xlu1 %5336, %v5984_v7  }
  0x95   : > { %4725 = vmatpush1.bf16.msra.mxu1 %v4724_v30  ;;  %4711 = vmatprep.subr.bf16.mxu0 %v4710_v31  ;;  %v4754_v12 = vpack.c.bf16 %v797_v5, %v791_v3  ;;  %v796_v13 = vld [vmem:[#allocation2 + $0x110] sm:$0xff]  ;;  %v801_v14 = vld [vmem:[#allocation2 + $0x138] sm:$0xff]  ;;  %v807_v15 = vld [vmem:[#allocation2 + $0x168] sm:$0xff]  ;;  %v4740_v18 = vpack.c.bf16 %v794_v11, %v788_v10  ;;  %v6062_v5 = vshrl.u32 %v9103_v61, 7 }
  0x96   : > { %4727 = vmatprep.subr.bf16.mxu1 %v4726_v35  ;;  %v803_v16 = vld [vmem:[#allocation2 + $0x148] sm:$0xff]  ;;  %v809_v17 = vld [vmem:[#allocation2 + $0x178] sm:$0xff]  ;;  %1100 = vperm.xlu0 %5335, %v5984_v7   ;;  %v4742_v21 = vpack.c.bf16 %v807_v15, %v801_v14  ;;  %v800_v22 = vld [vmem:[#allocation2 + $0x130] sm:$0xff] }
  0x97   : > { %v5998_v19 = vld [vmem:[%s9099_s9 + $0x8] sm:$0xff]  ;;  %v806_v23 = vld [vmem:[#allocation2 + $0x160] sm:$0xff]  ;;  %v4758_v25 = vpack.c.bf16 %v809_v17, %v803_v16  ;;  %v808_v26 = vld [vmem:[#allocation2 + $0x170] sm:$0xff]  ;;  %9160 = vst [vmem:[#allocation16_spill] sm:$0xff] %v6062_v5 }
  0x98   : > { %4713 = vmatpush1.bf16.msra.mxu0 %v4712_v41  ;;  %v802_v24 = vld [vmem:[#allocation2 + $0x140] sm:$0xff]  ;;  %v1079_v27 = vld [vmem:[%s5990_s11 + $0x8] sm:$0xff]  ;;  %v1081_v28 = vld [vmem:[%s5990_s11 + $0x18] sm:$0xff]  ;;  %1241 = vperm.xlu1 %5336, %v5998_v19   ;;  %v4744_v29 = vpack.c.bf16 %v806_v23, %v800_v22 }
  0x99   : > { %4729 = vmatpush1.bf16.msra.mxu1 %v4728_v42  ;;  %4731 = vmatprep.subr.bf16.mxu0 %v4730_v43  ;;  %v4760_v30 = vpack.c.bf16 %v808_v26, %v802_v24  ;;  %v4762_v31 = vpack.c.bf16 %v1081_v28, %v1079_v27  ;;  %v1078_v32 = vld [vmem:[%s5990_s11] sm:$0xff]  ;;  %v1080_v33 = vld [vmem:[%s5990_s11 + $0x10] sm:$0xff]  ;;  %v6009_v34 = vld [vmem:[%s9099_s9 + $0x18] sm:$0xff]  ;;  %v5592_v43 = vmov 0  }
  0x9a   : > { %4747 = vmatprep.subr.bf16.mxu1 %v4746_v47  ;;  %1105 = vperm.xlu0 %5335, %v5998_v19   ;;  %v1083_v35 = vld [vmem:[%s5990_s11 + $0x28] sm:$0xff]  ;;  %v1085_v36 = vld [vmem:[%s5990_s11 + $0x38] sm:$0xff]  ;;  %v6017_v37 = vld [vmem:[%s9099_s9 + $0x10] sm:$0xff]  ;;  %v4764_v38 = vpack.c.bf16 %v1080_v33, %v1078_v32 }
  0x9b   : > { %4587 = vmatmul.mubr.msk.f32.vlgmr.msra.gmra.mrb[2].mxu0 %vm494_vm0, %v5932_v4  ;;  %v790_v4 = vld [vmem:[#allocation2 + $0xe0] sm:$0xff]  ;;  %v4766_v39 = vpack.c.bf16 %v1085_v36, %v1083_v35  ;;  %v1084_v41 = vld [vmem:[%s5990_s11 + $0x30] sm:$0xff]  ;;  %v1095_v44 = vld [vmem:[#allocation6 + $0x8] sm:$0xff] }
  0x9c   : > { %4592 = vmatmul.mubr.msk.f32.vlgmr.msra.gmra.mrb[2].mxu1 %vm494_vm0, %v5974_v53  ;;  %4733 = vmatpush1.bf16.msra.mxu0 %v4732_v54  ;;  %v4756_v20 = vpack.c.bf16 %v796_v13, %v790_v4  ;;  %v1082_v40 = vld [vmem:[%s5990_s11 + $0x20] sm:$0xff]  ;;  %v1097_v46 = vld [vmem:[#allocation6 + $0x18] sm:$0xff] }
  0x9d   : > { %4749 = vmatpush1.bf16.msra.mxu1 %v4748_v55  ;;  %4735 = vmatprep.subr.bf16.mxu0 %v4734_v56  ;;  %v1094_v42 = vld [vmem:[#allocation6] sm:$0xff] }
  0x9e   : > { %4751 = vmatprep.subr.bf16.mxu1 %v4750_v60  ;;  %948 = vmatprep.mubr.f32.mxu0 %v9104_v0 }
  0x9f   : > { %1019 = vmatprep.mubr.f32.mxu1 %v9104_v0  ;;  %5337 = vset.pattern.permute.xlu1 %v5591_v2  ;;  %v4768_v2 = vpack.c.bf16 %v1084_v41, %v1082_v40 }
  0xa0   : > { %4737 = vmatpush1.bf16.msra.mxu0 %v4736_v6  ;;  %1115 = vperm.xlu1 %5337, %v6009_v34  }
  0xa1   : > { %4753 = vmatpush1.bf16.msra.mxu1 %v4752_v8  ;;  %4739 = vmatprep.subr.bf16.mxu0 %v4738_v9  ;;  %v6066_v9 = vsub.s32 0, %v6062_v5 }
  0xa2   : > { %4755 = vmatprep.subr.bf16.mxu1 %v4754_v12  ;;  %1110 = vperm.xlu0 %5335, %v6017_v37  }
  0xa3   : > { %9161 = vst [vmem:[#allocation17_spill] sm:$0xff] %v6066_v9 }
  0xa4   : > { %4741 = vmatpush1.bf16.msra.mxu0 %v4740_v18  ;;  %5339 = vset.pattern.permute.xlu1 %v5590_v1 }
  0xa5   : > { %4757 = vmatpush1.bf16.msra.mxu1 %v4756_v20  ;;  %4743 = vmatprep.subr.bf16.mxu0 %v4742_v21 }
  0xa6   : > { %4759 = vmatprep.subr.bf16.mxu1 %v4758_v25  ;;  %5338 = vset.pattern.permute.xlu0 %v5590_v1  ;;  %v1096_v1 = vld [vmem:[#allocation6 + $0x10] sm:$0xff] }
  0xa7   : > { %1249 = vperm.xlu1 %5339, %v6009_v34   ;;  %1245 = vperm.xlu0 %5338, %v6017_v37  }
  0xa8   : > { %4745 = vmatpush1.bf16.msra.mxu0 %v4744_v29 }
  0xa9   : > { %4761 = vmatpush1.bf16.msra.mxu1 %v4760_v30  ;;  %4763 = vmatprep.subr.bf16.mxu0 %v4762_v31 }
  0xab   : > { %4593 = vmatmul.mubr.msk.f32.vlgmr.msra.gmra.mrb[4].mxu0 %vm494_vm0, %v5974_v53  ;;  %5340 = vset.pattern.permute.xlu1 %v5592_v43 }
  0xac   : > { %4594 = vmatmul.mubr.msk.f32.vlgmr.msra.gmra.mrb[4].mxu1 %vm494_vm0, %v5974_v53  ;;  %4765 = vmatpush1.bf16.msra.mxu0 %v4764_v38 }
  0xad   : > { %4767 = vmatprep.subr.bf16.mxu0 %v4766_v39  ;;  %1211 = vmatprep.mubr.f32.mxu0 %v9104_v0 }
  0xae   : > { %1277 = vperm.xlu1 %5340, %v5984_v7   ;;  %5341 = vset.pattern.permute.xlu0 %v5592_v43 }
  0xaf   : > { %1281 = vperm.xlu0 %5341, %v5998_v19  }
  0xb0   : > { %4769 = vmatpush1.bf16.msra.mxu0 %v4768_v2 }
  0xb2   : > { %5342 = vset.pattern.permute.xlu1 %v5593_v45 }
  0xb3   : > { %4599 = vmatmul.mubr.msk.f32.vlgmr.msra.gmra.mrb[6].mxu0 %vm1134_vm1, %v1094_v42  ;;  %1301 = vperm.xlu1 %5342, %v5984_v7  }
  0xb4   : > { %1217 = vmatprep.mubr.f32.mxu0 %v9104_v0  ;;  %1285 = vperm.xlu0 %5341, %v6017_v37  }
  0xb7   : > { %4600 = vmatmul.mubr.msk.f32.gmra.mrb[8].mxu0 %vm1134_vm1, %v1095_v44  ;;  %1305 = vperm.xlu1 %5342, %v5998_v19  }
  0xb8   : > { %1223 = vmatprep.mubr.f32.mxu0 %v9104_v0  ;;  %5344 = vset.pattern.permute.xlu0 %v5593_v45 }
  0xb9   : > { %1309 = vperm.xlu0 %5344, %v6017_v37  }
  0xbb   : > { %4601 = vmatmul.mubr.msk.f32.gmra.mrb[10].mxu0 %vm1134_vm1, %v1096_v1  ;;  %5343 = vset.pattern.permute.xlu1 %v5592_v43 }
  0xbc   : > { %1229 = vmatprep.mubr.f32.mxu0 %v9104_v0  ;;  %1289 = vperm.xlu1 %5343, %v6009_v34  }
  0xbf   : > { %4602 = vmatmul.mubr.msk.f32.gmra.mrb[12].mxu0 %vm1134_vm1, %v1097_v46 }
  0xc0   : > { %2338 = vmatprep.mubr.f32.mxu0 %v9104_v0  ;;  %5345 = vset.pattern.permute.xlu1 %v5593_v45 }
  0xc1   : > { %1313 = vperm.xlu1 %5345, %v6009_v34  }
 0x113   : > { %v6052_v52 = vpop.permute.xlu1 %1237 }
 0x115   : > { %v1101_v6 = vpop.permute.xlu0 %1100 }
 0x117   : > { %v6058_v63 = vpop.permute.xlu1 %1241 }
 0x119   : > { %v1106_v4 = vpop.permute.xlu0 %1105 }
 0x11f   : > { %v6068_v10 = vpop.permute.xlu1 %1115 }
 0x121   : > { %v1111_v41 = vpop.permute.xlu0 %1110 }
 0x126   : > { %v6072_v16 = vpop.permute.xlu1 %1249 }
 0x12d   : > { %v6084_v42 = vpop.permute.xlu1 %1277 }
 0x15e   : > { %v6048_v47 = vpop.f32.mrb[0].mxu0 }
 0x15f   : > { %9156 = vst [vmem:[#allocation12_spill] sm:$0xff] %v6048_v47  ;;  %v6050_v48 = vpop.f32.mrb[1].mxu0  ;;  %v635_v49 = vpop.f32.mrb[0].mxu1  ;;  %v4590_v3 = vmul.f32 -1.442695, %v6048_v47  ;;  %v1121_v13 = vrot.slane %v6048_v47, %v6066_v9 }
 0x160   : > { %9157 = vst [vmem:[#allocation13_spill] sm:$0xff] %v6050_v48  ;;  %v637_v50 = vpop.f32.mrb[1].mxu1  ;;  %v711_v51 = vmul.f32 %v635_v49, %v635_v49  ;;  %v4591_v8 = vmul.f32 -1.442695, %v6050_v48  ;;  %v1125_v31 = vrot.slane %v6050_v48, %v6066_v9 }
 0x161   : > { %v712_v54 = vmul.f32 %v637_v50, %v637_v50  ;;  %v1126_v44 = vmul.f32 %v1121_v13, %v1101_v6 }
 0x162   : > { %v1127_v45 = vmul.f32 %v1125_v31, %v1101_v6 }
 0x16e   : > { %v706_v53 = vpop.f32.mrb[2].mxu0 }
 0x16f   : > { %v713_v55 = vmul.f32 %v706_v53, %v706_v53  ;;  %v708_v56 = vpop.f32.mrb[3].mxu0  ;;  %v6054_v57 = vpop.f32.mrb[2].mxu1 }
 0x170   : > { %9158 = vst [vmem:[#allocation14_spill] sm:$0xff] %v6054_v57  ;;  %v714_v58 = vmul.f32 %v708_v56, %v708_v56  ;;  %v6056_v59 = vpop.f32.mrb[3].mxu1  ;;  %v1255_v38 = vrot.slane %v6054_v57, %v6066_v9 }
 0x171   : > { %9159 = vst [vmem:[#allocation15_spill] sm:$0xff] %v6056_v59  ;;  %v715_v60 = vadd.f32 %v713_v55, %v711_v51  ;;  %v1259_v2 = vrot.slane %v6056_v59, %v6066_v9  ;;  %v4598_v6 = vmul.f32 -1.442695, %v6056_v59 }
 0x172   : > { %v716_v62 = vadd.f32 %v714_v58, %v712_v54  ;;  %v1260_v50 = vmul.f32 %v1255_v38, %v6052_v52  ;;  %v1246_v54 = vpop.permute.xlu0 %1245  ;;  %v1128_v58 = vmul.f32 %v1121_v13, %v1106_v4 }
 0x173   : > { %5383 = vrsqrt.f32 %v715_v60  ;;  %vm719_vm2 = vcmp.eq.f32.partialorder %v715_v60, inf  ;;  %vm721_vm3 = vcmp.eq.f32.partialorder %v715_v60, 0.0  ;;  %v722_v17 = vand.u32 2147483648, %v715_v60 }
 0x174   : > { %5385 = vrsqrt.f32 %v716_v62  ;;  %vm726_vm4 = vcmp.eq.f32.partialorder %v716_v62, inf  ;;  %v729_v24 = vand.u32 2147483648, %v716_v62  ;;  %vm728_vm5 = vcmp.eq.f32.partialorder %v716_v62, 0.0 }
 0x175   : > { %5387 = vpow2.f32 %v4590_v3  ;;  %v1261_v56 = vmul.f32 %v1259_v2, %v6052_v52  ;;  %v1129_v3 = vmul.f32 %v1125_v31, %v1106_v4 }
 0x176   : > { %5389 = vpow2.f32 %v4591_v8  ;;  %v1130_v8 = vmul.f32 %v1121_v13, %v1111_v41 }
 0x17d   : > { %v5384_v11 = vpop.eup %5383 }
 0x17e   : > { %v5386_v12 = vpop.eup %5385  ;;  %v718_v14 = vmul.f32 %v5384_v11, %v715_v60  ;;  %v950_v15 = vpop.f32.mrb[4].mxu0 }
 0x17f   : > { %v725_v18 = vmul.f32 %v5386_v12, %v716_v62  ;;  %v1026_v20 = vmul.f32 %v950_v15, %v950_v15  ;;  %v1021_v21 = vpop.f32.mrb[4].mxu1  ;;  %v952_v22 = vpop.f32.mrb[5].mxu0  ;;  %v1131_v15 = vmul.f32 %v1125_v31, %v1111_v41 }
 0x180   : > { %v720_v23 = vsel %vm719_vm2, %v715_v60, %v718_v14  ;;  %v1028_v25 = vmul.f32 %v1021_v21, %v1021_v21  ;;  %v1027_v26 = vmul.f32 %v952_v22, %v952_v22  ;;  %v1023_v27 = vpop.f32.mrb[5].mxu1  ;;  %v5388_v40 = vpop.eup %5387  ;;  %v4597_v60 = vmul.f32 -1.442695, %v6054_v57 }
 0x181   : > { %v723_v28 = vsel %vm721_vm3, %v722_v17, %v720_v23  ;;  %v727_v29 = vsel %vm726_vm4, %v716_v62, %v725_v18  ;;  %v1029_v30 = vmul.f32 %v1023_v27, %v1023_v27  ;;  %v5390_v43 = vpop.eup %5389  ;;  %v751_v46 = vadd.f32 1.0, %v5388_v40  ;;  %v6094_v12 = vpop.permute.xlu1 %1301 }
 0x182   : > { %v4588_v32 = vmul.f32 -1.442695, %v723_v28  ;;  %v730_v33 = vsel %vm728_vm5, %v729_v24, %v727_v29  ;;  %v6076_v35 = vadd.f32 %v1028_v25, %v1026_v20  ;;  %v752_v53 = vadd.f32 1.0, %v5390_v43  ;;  %v6106_v29 = vpop.permute.xlu0 %1281 }
 0x183   : > { %v4589_v36 = vmul.f32 -1.442695, %v730_v33  ;;  %v6080_v39 = vadd.f32 %v1029_v30, %v1027_v26  ;;  %v1132_v17 = vmul.f32 %v1121_v13, %v6068_v10  ;;  %v1262_v20 = vmul.f32 %v1255_v38, %v6058_v63 }
 0x184   : > { %5391 = vpow2.f32 %v4588_v32  ;;  %v1263_v22 = vmul.f32 %v1259_v2, %v6058_v63  ;;  %v1133_v23 = vmul.f32 %v1125_v31, %v6068_v10  ;;  %v1266_v24 = vmul.f32 %v1255_v38, %v6072_v16 }
 0x185   : > { %5393 = vpow2.f32 %v4589_v36  ;;  %v1267_v27 = vmul.f32 %v1259_v2, %v6072_v16  ;;  %v1264_v28 = vmul.f32 %v1255_v38, %v1246_v54  ;;  %v1265_v10 = vmul.f32 %v1259_v2, %v1246_v54  ;;  %v6115_v16 = vpop.permute.xlu1 %1305 }
 0x186   : > { %5395 = vrsqrt.f32 %v6076_v35  ;;  %v1213_v1 = vpop.f32.mrb[6].mxu0  ;;  %vm1034_vm6 = vcmp.eq.f32.partialorder %v6076_v35, inf  ;;  %vm1036_vm7 = vcmp.eq.f32.partialorder %v6076_v35, 0.0  ;;  %vm1041_vm8 = vcmp.eq.f32.partialorder %v6080_v39, inf }
 0x187   : > { %5397 = vrsqrt.f32 %v6080_v39  ;;  %v1214_v49 = vadd.f32 %v1213_v1, %v1126_v44  ;;  %v1215_v51 = vpop.f32.mrb[7].mxu0  ;;  %v1044_v54 = vand.u32 2147483648, %v6080_v39  ;;  %vm1043_vm9 = vcmp.eq.f32.partialorder %v6080_v39, 0.0 }
 0x188   : > { %v1216_v55 = vadd.f32 %v1215_v51, %v1127_v45  ;;  %5399 = vrcp.f32 %v751_v46  ;;  %v1037_v46 = vand.u32 2147483648, %v6076_v35 }
 0x189   : > { %v1268_v62 = vadd.f32 %v1260_v50, %v1214_v49  ;;  %5401 = vrcp.f32 %v752_v53 }
 0x18a   : > { %v6092_v11 = vadd.f32 %v1261_v56, %v1216_v55  ;;  %v1219_v14 = vpop.f32.mrb[8].mxu0  ;;  %5403 = vpow2.f32 %v4597_v60 }
 0x18b   : > { %v1292_v18 = vmul.f32 %v6084_v42, %v1268_v62  ;;  %v1220_v52 = vadd.f32 %v1219_v14, %v1128_v58  ;;  %v1221_v21 = vpop.f32.mrb[9].mxu0  ;;  %5405 = vpow2.f32 %v4598_v6 }
 0x18c   : > { %v1222_v4 = vadd.f32 %v1221_v21, %v1129_v3 }
 0x18d   : > { %v6103_v25 = vadd.f32 %v6094_v12, %v1292_v18  ;;  %v1270_v13 = vadd.f32 %v1262_v20, %v1220_v52 }
 0x18e   : > { %v5392_v26 = vpop.eup %5391  ;;  %v6108_v30 = vadd.f32 %v1263_v22, %v1222_v4  ;;  %v1225_v32 = vpop.f32.mrb[10].mxu0 }
 0x18f   : > { %v5394_v63 = vpop.eup %5393  ;;  %v737_v33 = vadd.f32 1.0, %v5392_v26  ;;  %v1294_v31 = vmul.f32 %v6106_v29, %v1270_v13  ;;  %v1226_v36 = vadd.f32 %v1225_v32, %v1130_v8  ;;  %v1227_v40 = vpop.f32.mrb[11].mxu0  ;;  %1336 = vrot.lane.b32.xlu1 %v6103_v25, %s5594_s21 }
 0x190   : > { %v5396_v41 = vpop.eup %5395  ;;  %v738_v43 = vadd.f32 1.0, %v5394_v63  ;;  %v1228_v38 = vadd.f32 %v1227_v40, %v1131_v15 }
 0x191   : > { %v5398_v44 = vpop.eup %5397  ;;  %5407 = vrcp.f32 %v737_v33  ;;  %v1033_v2 = vmul.f32 %v5396_v41, %v6076_v35  ;;  %v6119_v1 = vadd.f32 %v6115_v16, %v1294_v31  ;;  %v6121_v45 = vadd.f32 %v1264_v28, %v1226_v36 }
 0x192   : > { %5409 = vrcp.f32 %v738_v43  ;;  %v1040_v49 = vmul.f32 %v5398_v44, %v6080_v39  ;;  %v6125_v50 = vadd.f32 %v1265_v10, %v1228_v38  ;;  %v1231_v51 = vpop.f32.mrb[12].mxu0  ;;  %v5400_v3 = vpop.eup %5399  ;;  %v1295_v33 = vmul.f32 %v6106_v29, %v6108_v30 }
 0x193   : > { %v1035_v53 = vsel %vm1034_vm6, %v6076_v35, %v1033_v2  ;;  %v1232_v55 = vadd.f32 %v1231_v51, %v1132_v17  ;;  %v1233_v56 = vpop.f32.mrb[13].mxu0  ;;  %1338 = vrot.lane.b32.xlu0 %v6119_v1, %s5594_s21  ;;  %1379 = vrot.lane.b32.xlu1 %v6103_v25, %s5595_s23  ;;  %v5402_v15 = vpop.eup %5401  ;;  %v757_v21 = vsub.f32 1.0, %v5400_v3 }
 0x194   : > { %v1038_v58 = vsel %vm1036_vm7, %v1037_v46, %v1035_v53  ;;  %v1042_v60 = vsel %vm1041_vm8, %v6080_v39, %v1040_v49  ;;  %v1234_v62 = vadd.f32 %v1233_v56, %v1133_v23  ;;  %v5404_v52 = vpop.eup %5403  ;;  %v758_v22 = vsub.f32 1.0, %v5402_v15  ;;  %v1290_v30 = vpop.permute.xlu1 %1289 }
 0x195   : > { %v4595_v8 = vmul.f32 -1.442695, %v1038_v58  ;;  %v1045_v6 = vsel %vm1043_vm9, %v1044_v54, %v1042_v60  ;;  %v1274_v14 = vadd.f32 %v1266_v24, %v1232_v55  ;;  %v5406_v35 = vpop.eup %5405  ;;  %v1293_v24 = vmul.f32 %v6084_v42, %v6092_v11 }
 0x196   : > { %v4596_v17 = vmul.f32 -1.442695, %v1045_v6  ;;  %v6138_v18 = vadd.f32 %v1267_v27, %v1234_v62  ;;  %v1066_v26 = vadd.f32 1.0, %v5404_v52  ;;  %v1067_v28 = vadd.f32 1.0, %v5406_v35 }
 0x197   : > { %5411 = vpow2.f32 %v4595_v8  ;;  %1381 = vrot.lane.b32.xlu0 %v6119_v1, %s5595_s23  ;;  %1420 = vrot.lane.b32.xlu1 %v6103_v25, %s5596_s24  ;;  %v6155_v63 = vadd.f32 %v6094_v12, %v1293_v24  ;;  %v6164_v31 = vadd.f32 %v6115_v16, %v1295_v33  ;;  %v1286_v12 = vpop.permute.xlu0 %1285  ;;  %v1298_v51 = vmul.f32 %v1290_v30, %v1274_v14 }
 0x198   : > { %5413 = vpow2.f32 %v4596_v17  ;;  %v1296_v40 = vmul.f32 %v1286_v12, %v6121_v45  ;;  %v1314_v55 = vpop.permute.xlu1 %1313  ;;  %v1297_v60 = vmul.f32 %v1286_v12, %v6125_v50  ;;  %v1299_v62 = vmul.f32 %v1290_v30, %v6138_v18  ;;  %v1325_v50 = vld [vmem:[%s9097_s7 + $0x8] sm:$0xff] }
 0x199   : > { %5415 = vrcp.f32 %v1066_v26  ;;  %v6189_v58 = vadd.f32 %v1314_v55, %v1298_v51  ;;  %1742 = vmatprep.mubr.f32.mxu1 %v1325_v50 }
 0x19a   : > { %5417 = vrcp.f32 %v1067_v28  ;;  %v6211_v8 = vadd.f32 %v1314_v55, %v1299_v62 }
 0x19b   : > { %v5408_v39 = vpop.eup %5407  ;;  %1422 = vrot.lane.b32.xlu0 %v6119_v1, %s5596_s24  ;;  %1461 = vrot.lane.b32.xlu1 %v6103_v25, %s5597_s25  ;;  %v1310_v43 = vpop.permute.xlu0 %1309 }
 0x19c   : > { %v5410_v20 = vpop.eup %5409  ;;  %v743_v4 = vsub.f32 1.0, %v5408_v39  ;;  %v6179_v53 = vadd.f32 %v1310_v43, %v1296_v40  ;;  %v6205_v3 = vadd.f32 %v1310_v43, %v1297_v60  ;;  %v6301_v39 = vand.u32 127, %v9103_v61 }
 0x19d   : > { %v744_v23 = vsub.f32 1.0, %v5410_v20 }
 0x19e   : > { %v759_v13 = vadd.f32 %v757_v21, %v743_v4  ;;  %v6307_v4 = vld [vmem:[#allocation4] sm:$0xff]  ;;  %vm1354_vm10 = vcmp.lt.s32.totalorder %v6301_v39, 17  ;;  %vm1395_vm11 = vcmp.lt.s32.totalorder %v6301_v39, 16  ;;  %vm1436_vm12 = vcmp.lt.s32.totalorder %v6301_v39, 15 }
 0x19f   : > { %v760_v27 = vadd.f32 %v758_v22, %v744_v23  ;;  %1463 = vrot.lane.b32.xlu0 %v6119_v1, %s5597_s25  ;;  %1502 = vrot.lane.b32.xlu1 %v6103_v25, %s5598_s26  ;;  %v6309_v22 = vld [vmem:[#allocation4 + $0x8] sm:$0xff]  ;;  %vm1477_vm13 = vcmp.lt.s32.totalorder %v6301_v39, 1  ;;  %vm1518_vm14 = vcmp.lt.s32.totalorder %v6301_v39, 127  ;;  %vm1559_vm15 = vcmp.lt.s32.totalorder %v6301_v39, 113 }
 0x1a0   : > { %v6320_v26 = vrot.slane %v6309_v22, %v6066_v9  ;;  %vm1600_vm2 = vcmp.lt.s32.totalorder %v6301_v39, 112  ;;  %vm1641_vm3 = vcmp.lt.s32.totalorder %v6301_v39, 111  ;;  %v4132_v39 = vld [vmem:[#allocation7 + $0x48] sm:$0xff] }
 0x1a1   : > { %v5412_v32 = vpop.eup %5411 }
 0x1a2   : > { %v5414_v10 = vpop.eup %5413  ;;  %v1052_v42 = vadd.f32 1.0, %v5412_v32  ;;  %v5602_v32 = vmov 2  }
 0x1a3   : > { %v1053_v11 = vadd.f32 1.0, %v5414_v10  ;;  %1504 = vrot.lane.b32.xlu0 %v6119_v1, %s5598_s26  ;;  %1344 = vrot.lane.b32.xlu1 %v6155_v63, %s5594_s21  ;;  %v5416_v29 = vpop.eup %5415 }
 0x1a4   : > { %5419 = vrcp.f32 %v1052_v42  ;;  %v5418_v36 = vpop.eup %5417  ;;  %v1072_v38 = vsub.f32 1.0, %v5416_v29  ;;  %5346 = vset.pattern.permute.xlu1 %v5602_v32  ;;  %5347 = vset.pattern.permute.xlu0 %v5602_v32 }
 0x1a5   : > { %5421 = vrcp.f32 %v1053_v11  ;;  %v1073_v2 = vsub.f32 1.0, %v5418_v36 }
 0x1a7   : > { %1346 = vrot.lane.b32.xlu0 %v6164_v31, %s5594_s21  ;;  %1387 = vrot.lane.b32.xlu1 %v6155_v63, %s5595_s23 }
 0x1ab   : > { %1389 = vrot.lane.b32.xlu0 %v6164_v31, %s5595_s23  ;;  %1428 = vrot.lane.b32.xlu1 %v6155_v63, %s5596_s24 }
 0x1ae   : > { %v5420_v41 = vpop.eup %5419 }
 0x1af   : > { %v5422_v16 = vpop.eup %5421  ;;  %v1058_v44 = vsub.f32 1.0, %v5420_v41  ;;  %1430 = vrot.lane.b32.xlu0 %v6164_v31, %s5596_s24  ;;  %1469 = vrot.lane.b32.xlu1 %v6155_v63, %s5597_s25 }
 0x1b0   : > { %v1059_v46 = vsub.f32 1.0, %v5422_v16 }
 0x1b1   : > { %v1074_v49 = vadd.f32 %v1072_v38, %v1058_v44  ;;  %v5603_v38 = vmov 3  }
 0x1b2   : > { %v1075_v54 = vadd.f32 %v1073_v2, %v1059_v46 }
 0x1b3   : > { %v6181_v45 = vadd.f32 %v1074_v49, %v759_v13  ;;  %1471 = vrot.lane.b32.xlu0 %v6164_v31, %s5597_s25  ;;  %1340 = vrot.lane.b32.xlu1 %v6179_v53, %s5594_s21  ;;  %v6316_v13 = vrot.slane %v6307_v4, %v6066_v9 }
 0x1b4   : > { %v6187_v56 = vadd.f32 %v1075_v54, %v760_v27 }
 0x1b5   : > { %9162 = vst [vmem:[#allocation18_spill] sm:$0xff] %v6181_v45 }
 0x1b6   : > { %9163 = vst [vmem:[#allocation19_spill] sm:$0xff] %v6187_v56 }
 0x1b7   : > { %1342 = vrot.lane.b32.xlu0 %v6189_v58, %s5594_s21  ;;  %1383 = vrot.lane.b32.xlu1 %v6179_v53, %s5595_s23 }
 0x1bb   : > { %1385 = vrot.lane.b32.xlu0 %v6189_v58, %s5595_s23  ;;  %1424 = vrot.lane.b32.xlu1 %v6179_v53, %s5596_s24 }
 0x1bf   : > { %1426 = vrot.lane.b32.xlu0 %v6189_v58, %s5596_s24  ;;  %1465 = vrot.lane.b32.xlu1 %v6179_v53, %s5597_s25 }
 0x1c3   : > { %1467 = vrot.lane.b32.xlu0 %v6189_v58, %s5597_s25  ;;  %1348 = vrot.lane.b32.xlu1 %v6205_v3, %s5594_s21 }
 0x1c7   : > { %1350 = vrot.lane.b32.xlu0 %v6211_v8, %s5594_s21  ;;  %1510 = vrot.lane.b32.xlu1 %v6155_v63, %s5598_s26 }
 0x1cb   : > { %1512 = vrot.lane.b32.xlu0 %v6164_v31, %s5598_s26  ;;  %1391 = vrot.lane.b32.xlu1 %v6205_v3, %s5595_s23 }
 0x1cf   : > { %1393 = vrot.lane.b32.xlu0 %v6211_v8, %s5595_s23  ;;  %1432 = vrot.lane.b32.xlu1 %v6205_v3, %s5596_s24 }
 0x1d3   : > { %1508 = vrot.lane.b32.xlu0 %v6189_v58, %s5598_s26  ;;  %1473 = vrot.lane.b32.xlu1 %v6205_v3, %s5597_s25 }
 0x1d7   : > { %1434 = vrot.lane.b32.xlu0 %v6211_v8, %s5596_s24  ;;  %1506 = vrot.lane.b32.xlu1 %v6179_v53, %s5598_s26 }
 0x1db   : > { %1545 = vrot.lane.b32.xlu0 %v6119_v1, %s5599_s27  ;;  %1514 = vrot.lane.b32.xlu1 %v6205_v3, %s5598_s26 }
 0x1df   : > { %1475 = vrot.lane.b32.xlu0 %v6211_v8, %s5597_s25  ;;  %1543 = vrot.lane.b32.xlu1 %v6103_v25, %s5599_s27 }
 0x1e3   : > { %1553 = vrot.lane.b32.xlu0 %v6164_v31, %s5599_s27  ;;  %1551 = vrot.lane.b32.xlu1 %v6155_v63, %s5599_s27 }
 0x1e7   : > { %1549 = vrot.lane.b32.xlu0 %v6189_v58, %s5599_s27  ;;  %1547 = vrot.lane.b32.xlu1 %v6179_v53, %s5599_s27 }
 0x1eb   : > { %1586 = vrot.lane.b32.xlu0 %v6119_v1, %s5600_s29  ;;  %1555 = vrot.lane.b32.xlu1 %v6205_v3, %s5599_s27 }
 0x1ef   : > { %1516 = vrot.lane.b32.xlu0 %v6211_v8, %s5598_s26  ;;  %1584 = vrot.lane.b32.xlu1 %v6103_v25, %s5600_s29 }
 0x1f3   : > { %1594 = vrot.lane.b32.xlu0 %v6164_v31, %s5600_s29  ;;  %1592 = vrot.lane.b32.xlu1 %v6155_v63, %s5600_s29 }
 0x1f7   : > { %1557 = vrot.lane.b32.xlu0 %v6211_v8, %s5599_s27  ;;  %1588 = vrot.lane.b32.xlu1 %v6179_v53, %s5600_s29 }
 0x1fb   : > { %1590 = vrot.lane.b32.xlu0 %v6189_v58, %s5600_s29  ;;  %1596 = vrot.lane.b32.xlu1 %v6205_v3, %s5600_s29 }
 0x1ff   : > { %1598 = vrot.lane.b32.xlu0 %v6211_v8, %s5600_s29  ;;  %1625 = vrot.lane.b32.xlu1 %v6103_v25, %s5601_s19 }
 0x201   : > { %v1337_v6 = vpop.permute.xlu1 %1336 }
 0x203   : > { %1627 = vrot.lane.b32.xlu0 %v6119_v1, %s5601_s19  ;;  %1633 = vrot.lane.b32.xlu1 %v6155_v63, %s5601_s19 }
 0x205   : > { %v1339_v14 = vpop.permute.xlu0 %1338  ;;  %v6280_v15 = vpop.permute.xlu1 %1379 }
 0x207   : > { %1635 = vrot.lane.b32.xlu0 %v6164_v31, %s5601_s19  ;;  %1629 = vrot.lane.b32.xlu1 %v6179_v53, %s5601_s19 }
 0x209   : > { %v6286_v17 = vpop.permute.xlu0 %1381  ;;  %v6288_v18 = vpop.permute.xlu1 %1420 }
 0x20b   : > { %1631 = vrot.lane.b32.xlu0 %v6189_v58, %s5601_s19  ;;  %1637 = vrot.lane.b32.xlu1 %v6205_v3, %s5601_s19 }
 0x20d   : > { %v6294_v52 = vpop.permute.xlu0 %1422  ;;  %v6296_v35 = vpop.permute.xlu1 %1461 }
 0x20f   : > { %1639 = vrot.lane.b32.xlu0 %v6211_v8, %s5601_s19  ;;  %1857 = vperm.xlu1 %5346, %v5984_v7  }
 0x211   : > { %v6303_v20 = vpop.permute.xlu0 %1463  ;;  %v6305_v21 = vpop.permute.xlu1 %1502 }
 0x213   : > { %1861 = vperm.xlu0 %5347, %v5998_v19   ;;  %5348 = vset.pattern.permute.xlu1 %v5603_v38 }
 0x214   : > { %1881 = vperm.xlu1 %5348, %v5984_v7  }
 0x215   : > { %v6312_v23 = vpop.permute.xlu0 %1504  ;;  %v1345_v24 = vpop.permute.xlu1 %1344 }
 0x216   : > { %v1355_v27 = vsel %vm1354_vm10, %v1337_v6, %v1345_v24  ;;  %v1359_v28 = vsel %vm1354_vm10, %v1345_v24, %v1337_v6 }
 0x217   : > { %v1371_v12 = vmul.f32 %v6316_v13, %v1359_v28  ;;  %v1372_v29 = vmul.f32 %v6320_v26, %v1355_v27  ;;  %1865 = vperm.xlu0 %5347, %v6017_v37  }
 0x218   : > { %1885 = vperm.xlu1 %5348, %v5998_v19   ;;  %v1406_v19 = vsub.s32 1, %v6062_v5 }
 0x219   : > { %v1347_v33 = vpop.permute.xlu0 %1346  ;;  %v1388_v10 = vpop.permute.xlu1 %1387 }
 0x21a   : > { %v1356_v42 = vsel %vm1354_vm10, %v1339_v14, %v1347_v33  ;;  %v1360_v11 = vsel %vm1354_vm10, %v1347_v33, %v1339_v14  ;;  %v6369_v27 = vrot.slane %v6307_v4, %v1406_v19  ;;  %v1396_v28 = vsel %vm1395_vm11, %v6280_v15, %v1388_v10 }
 0x21b   : > { %v1373_v30 = vmul.f32 %v6316_v13, %v1360_v11  ;;  %v1374_v36 = vmul.f32 %v6320_v26, %v1356_v42  ;;  %5350 = vset.pattern.permute.xlu0 %v5603_v38 }
 0x21c   : > { %1889 = vperm.xlu0 %5350, %v6017_v37   ;;  %5349 = vset.pattern.permute.xlu1 %v5602_v32 }
 0x21d   : > { %v4772_v40 = vpack.c.bf16 %v1373_v30, %v1371_v12  ;;  %v1390_v41 = vpop.permute.xlu0 %1389  ;;  %v6336_v43 = vpop.permute.xlu1 %1428  ;;  %v4770_v16 = vpack.c.bf16 %v1374_v36, %v1372_v29  ;;  %1869 = vperm.xlu1 %5349, %v6009_v34  }
 0x21e   : > { %v1397_v6 = vsel %vm1395_vm11, %v6286_v17, %v1390_v41  ;;  %v1401_v42 = vsel %vm1395_vm11, %v1390_v41, %v6286_v17  ;;  %v1400_v17 = vsel %vm1395_vm11, %v1388_v10, %v6280_v15 }
 0x21f   : > { %4771 = vmatprep.subr.bf16.mxu1 %v4770_v16 }
 0x220   : > { %4773 = vmatpush1.bf16.msra.mxu1 %v4772_v40 }
 0x221   : > { %v1431_v44 = vpop.permute.xlu0 %1430  ;;  %v6340_v2 = vpop.permute.xlu1 %1469  ;;  %5351 = vset.pattern.permute.xlu1 %v5603_v38  ;;  %v1447_v38 = vsub.s32 2, %v6062_v5 }
 0x222   : > { %1893 = vperm.xlu1 %5351, %v6009_v34   ;;  %v6362_v34 = vrot.slane %v6309_v22, %v1406_v19 }
 0x223   : > { %v6402_v15 = vrot.slane %v6309_v22, %v1447_v38 }
 0x224   : > { %v1415_v11 = vmul.f32 %v6362_v34, %v1397_v6  ;;  %v1413_v41 = vmul.f32 %v6362_v34, %v1396_v28 }
 0x225   : > { %v6344_v46 = vpop.permute.xlu0 %1471  ;;  %v1341_v49 = vpop.permute.xlu1 %1340 }
 0x229   : > { %v1343_v51 = vpop.permute.xlu0 %1342  ;;  %v1384_v54 = vpop.permute.xlu1 %1383 }
 0x22d   : > { %v1386_v7 = vpop.permute.xlu0 %1385  ;;  %v6348_v55 = vpop.permute.xlu1 %1424 }
 0x231   : > { %v6350_v60 = vpop.permute.xlu0 %1426  ;;  %v6352_v62 = vpop.permute.xlu1 %1465 }
 0x235   : > { %v6355_v37 = vpop.permute.xlu0 %1467  ;;  %v1349_v50 = vpop.permute.xlu1 %1348 }
 0x236   : > { %v1357_v14 = vsel %vm1354_vm10, %v1341_v49, %v1349_v50  ;;  %v1361_v24 = vsel %vm1354_vm10, %v1349_v50, %v1341_v49  ;;  %v1414_v49 = vmul.f32 %v6369_v27, %v1401_v42  ;;  %v6409_v42 = vrot.slane %v6307_v4, %v1447_v38 }
 0x237   : > { %v1375_v30 = vmul.f32 %v6316_v13, %v1361_v24  ;;  %v1376_v36 = vmul.f32 %v6320_v26, %v1357_v14  ;;  %v1412_v14 = vmul.f32 %v6369_v27, %v1400_v17  ;;  %v1438_v24 = vsel %vm1436_vm12, %v6294_v52, %v1431_v44 }
 0x239   : > { %v1351_v32 = vpop.permute.xlu0 %1350  ;;  %v6374_v33 = vpop.permute.xlu1 %1510 }
 0x23a   : > { %v1358_v12 = vsel %vm1354_vm10, %v1343_v51, %v1351_v32  ;;  %v1362_v29 = vsel %vm1354_vm10, %v1351_v32, %v1343_v51  ;;  %v4778_v32 = vpack.c.bf16 %v1415_v11, %v1413_v41 }
 0x23b   : > { %v1377_v40 = vmul.f32 %v6316_v13, %v1362_v29  ;;  %v1378_v16 = vmul.f32 %v6320_v26, %v1358_v12  ;;  %v4780_v12 = vpack.c.bf16 %v1414_v49, %v1412_v14  ;;  %v1437_v29 = vsel %vm1436_vm12, %v6288_v18, %v6336_v43 }
 0x23d   : > { %v4776_v19 = vpack.c.bf16 %v1377_v40, %v1375_v30  ;;  %v6394_v51 = vpop.permute.xlu0 %1512  ;;  %v1392_v50 = vpop.permute.xlu1 %1391  ;;  %v4774_v6 = vpack.c.bf16 %v1378_v16, %v1376_v36  ;;  %v1442_v36 = vsel %vm1436_vm12, %v1431_v44, %v6294_v52  ;;  %v1456_v40 = vmul.f32 %v6402_v15, %v1438_v24 }
 0x23e   : > { %v1398_v10 = vsel %vm1395_vm11, %v1384_v54, %v1392_v50  ;;  %v1402_v28 = vsel %vm1395_vm11, %v1392_v50, %v1384_v54  ;;  %v1441_v52 = vsel %vm1436_vm12, %v6336_v43, %v6288_v18  ;;  %v1454_v44 = vmul.f32 %v6402_v15, %v1437_v29 }
 0x23f   : > { %4775 = vmatprep.subr.bf16.mxu1 %v4774_v6  ;;  %v1416_v38 = vmul.f32 %v6369_v27, %v1402_v28  ;;  %v1417_v17 = vmul.f32 %v6362_v34, %v1398_v10  ;;  %v1479_v10 = vsel %vm1477_vm13, %v6303_v20, %v6344_v46 }
 0x240   : > { %4777 = vmatpush1.bf16.msra.mxu1 %v4776_v19  ;;  %v1488_v19 = vsub.s32 3, %v6062_v5  ;;  %v4786_v18 = vpack.c.bf16 %v1456_v40, %v1454_v44 }
 0x241   : > { %v1394_v11 = vpop.permute.xlu0 %1393  ;;  %4779 = vmatprep.subr.bf16.mxu1 %v4778_v32  ;;  %v1433_v30 = vpop.permute.xlu1 %1432  ;;  %v1453_v32 = vmul.f32 %v6409_v42, %v1441_v52 }
 0x242   : > { %v1399_v54 = vsel %vm1395_vm11, %v1386_v7, %v1394_v11  ;;  %v1403_v16 = vsel %vm1395_vm11, %v1394_v11, %v1386_v7  ;;  %v1455_v7 = vmul.f32 %v6409_v42, %v1442_v36  ;;  %v6443_v43 = vrot.slane %v6309_v22, %v1488_v19 }
 0x243   : > { %v1418_v41 = vmul.f32 %v6369_v27, %v1403_v16  ;;  %v1419_v49 = vmul.f32 %v6362_v34, %v1399_v54  ;;  %v1439_v28 = vsel %vm1436_vm12, %v6348_v55, %v1433_v30  ;;  %v1478_v11 = vsel %vm1477_vm13, %v6296_v35, %v6340_v2 }
 0x244   : > { %4781 = vmatpush1.bf16.msra.mxu1 %v4780_v12  ;;  %v1443_v12 = vsel %vm1436_vm12, %v1433_v30, %v6348_v55  ;;  %v4788_v29 = vpack.c.bf16 %v1455_v7, %v1453_v32  ;;  %v1483_v54 = vsel %vm1477_vm13, %v6344_v46, %v6303_v20  ;;  %v1497_v16 = vmul.f32 %v6443_v43, %v1479_v10 }
 0x245   : > { %v4784_v50 = vpack.c.bf16 %v1418_v41, %v1416_v38  ;;  %v6434_v6 = vpop.permute.xlu0 %1508  ;;  %v1474_v14 = vpop.permute.xlu1 %1473  ;;  %v4782_v24 = vpack.c.bf16 %v1419_v49, %v1417_v17  ;;  %v1457_v38 = vmul.f32 %v6409_v42, %v1443_v12  ;;  %v1458_v17 = vmul.f32 %v6402_v15, %v1439_v28 }
 0x246   : > { %v6473_v20 = vrot.slane %v6307_v4, %v1488_v19  ;;  %v1482_v46 = vsel %vm1477_vm13, %v6340_v2, %v6296_v35  ;;  %v1495_v52 = vmul.f32 %v6443_v43, %v1478_v11  ;;  %v1480_v10 = vsel %vm1477_vm13, %v6352_v62, %v1474_v14 }
 0x247   : > { %4783 = vmatprep.subr.bf16.mxu1 %v4782_v24  ;;  %v1484_v35 = vsel %vm1477_vm13, %v1474_v14, %v6352_v62  ;;  %v1529_v14 = vsub.s32 5, %v6062_v5 }
 0x248   : > { %4785 = vmatpush1.bf16.msra.mxu1 %v4784_v50  ;;  %v1496_v24 = vmul.f32 %v6473_v20, %v1483_v54  ;;  %v4794_v32 = vpack.c.bf16 %v1497_v16, %v1495_v52  ;;  %v1494_v19 = vmul.f32 %v6473_v20, %v1482_v46  ;;  %v1498_v11 = vmul.f32 %v6473_v20, %v1484_v35 }
 0x249   : > { %v1435_v36 = vpop.permute.xlu0 %1434  ;;  %4787 = vmatprep.subr.bf16.mxu1 %v4786_v18  ;;  %v6455_v40 = vpop.permute.xlu1 %1506  ;;  %v1523_v52 = vsel %vm1518_vm14, %v6374_v33, %v6305_v21 }
 0x24a   : > { %v1440_v55 = vsel %vm1436_vm12, %v6350_v60, %v1435_v36  ;;  %v1444_v30 = vsel %vm1436_vm12, %v1435_v36, %v6350_v60  ;;  %v4796_v28 = vpack.c.bf16 %v1496_v24, %v1494_v19  ;;  %v1499_v36 = vmul.f32 %v6443_v43, %v1480_v10 }
 0x24b   : > { %v1459_v41 = vmul.f32 %v6409_v42, %v1444_v30  ;;  %v1460_v49 = vmul.f32 %v6402_v15, %v1440_v55  ;;  %v1519_v19 = vsel %vm1518_vm14, %v6305_v21, %v6374_v33 }
 0x24c   : > { %4789 = vmatpush1.bf16.msra.mxu1 %v4788_v29 }
 0x24d   : > { %v4792_v60 = vpack.c.bf16 %v1459_v41, %v1457_v38  ;;  %v6480_v44 = vpop.permute.xlu0 %1545  ;;  %v1515_v7 = vpop.permute.xlu1 %1514  ;;  %v4790_v50 = vpack.c.bf16 %v1460_v49, %v1458_v17  ;;  %v1524_v17 = vsel %vm1518_vm14, %v6394_v51, %v6312_v23  ;;  %v6509_v41 = vrot.slane %v6309_v22, %v1529_v14 }
 0x24e   : > { %v1521_v10 = vsel %vm1518_vm14, %v6455_v40, %v1515_v7 }
 0x24f   : > { %4791 = vmatprep.subr.bf16.mxu1 %v4790_v50  ;;  %v1570_v50 = vsub.s32 6, %v6062_v5  ;;  %v1538_v24 = vmul.f32 %v6509_v41, %v1524_v17 }
 0x250   : > { %4793 = vmatpush1.bf16.msra.mxu1 %v4792_v60  ;;  %v6524_v60 = vrot.slane %v6307_v4, %v1529_v14 }
 0x251   : > { %v1476_v2 = vpop.permute.xlu0 %1475  ;;  %4795 = vmatprep.subr.bf16.mxu1 %v4794_v32  ;;  %v1544_v18 = vpop.permute.xlu1 %1543  ;;  %v4806_v32 = vpack.c.bf16 %v6211_v8, %v6205_v3  ;;  %v1525_v3 = vsel %vm1518_vm14, %v1515_v7, %v6455_v40  ;;  %v4808_v8 = vpack.c.bf16 %v6189_v58, %v6179_v53  ;;  %v6546_v21 = vrot.slane %v6309_v22, %v1570_v50 }
 0x252   : > { %v1481_v12 = vsel %vm1477_vm13, %v6355_v37, %v1476_v2  ;;  %v1485_v29 = vsel %vm1477_vm13, %v1476_v2, %v6355_v37  ;;  %v4802_v37 = vpack.c.bf16 %v6164_v31, %v6155_v63  ;;  %v1520_v63 = vsel %vm1518_vm14, %v6312_v23, %v6394_v51 }
 0x253   : > { %v1500_v54 = vmul.f32 %v6473_v20, %v1485_v29  ;;  %v1501_v62 = vmul.f32 %v6443_v43, %v1481_v12  ;;  %v4804_v31 = vpack.c.bf16 %v6119_v1, %v6103_v25  ;;  %v1536_v25 = vmul.f32 %v6509_v41, %v1523_v52  ;;  %9164 = vst [vmem:[#allocation20_spill] sm:$0xff] %v6546_v21 }
 0x254   : > { %4797 = vmatpush1.bf16.msra.mxu1 %v4796_v28  ;;  %v1537_v1 = vmul.f32 %v6524_v60, %v1520_v63  ;;  %v1535_v33 = vmul.f32 %v6524_v60, %v1519_v19  ;;  %v6550_v2 = vrot.slane %v6307_v4, %v1570_v50  ;;  %v1611_v40 = vsub.s32 7, %v6062_v5 }
 0x255   : > { %v4800_v16 = vpack.c.bf16 %v1500_v54, %v1498_v11  ;;  %v1554_v55 = vpop.permute.xlu0 %1553  ;;  %v1552_v30 = vpop.permute.xlu1 %1551  ;;  %v4798_v38 = vpack.c.bf16 %v1501_v62, %v1499_v36  ;;  %v4810_v35 = vpack.c.bf16 %v1538_v24, %v1536_v25  ;;  %v1539_v58 = vmul.f32 %v6524_v60, %v1521_v10 }
 0x256   : > { %9165 = vst [vmem:[#allocation21_spill] sm:$0xff] %v6550_v2  ;;  %v1565_v28 = vsel %vm1559_vm15, %v1554_v55, %v6480_v44  ;;  %v1564_v12 = vsel %vm1559_vm15, %v1552_v30, %v1544_v18  ;;  %v4812_v53 = vpack.c.bf16 %v1537_v1, %v1535_v33  ;;  %v1540_v7 = vmul.f32 %v6509_v41, %v1525_v3 }
 0x257   : > { %4799 = vmatprep.subr.bf16.mxu1 %v4798_v38  ;;  %v1561_v36 = vsel %vm1559_vm15, %v6480_v44, %v1554_v55  ;;  %v1560_v54 = vsel %vm1559_vm15, %v1544_v18, %v1552_v30  ;;  %v1577_v38 = vmul.f32 %v6546_v21, %v1564_v12  ;;  %v6583_v50 = vrot.slane %v6309_v22, %v1611_v40 }
 0x258   : > { %4801 = vmatpush1.bf16.msra.mxu1 %v4800_v16  ;;  %v1579_v16 = vmul.f32 %v6546_v21, %v1565_v28  ;;  %v1578_v44 = vmul.f32 %v6550_v2, %v1561_v36  ;;  %v1576_v18 = vmul.f32 %v6550_v2, %v1560_v54  ;;  %v6590_v25 = vrot.slane %v6307_v4, %v1611_v40 }
 0x259   : > { %v6511_v49 = vpop.permute.xlu0 %1549  ;;  %4803 = vmatprep.subr.bf16.mxu1 %v4802_v37  ;;  %v1548_v46 = vpop.permute.xlu1 %1547  ;;  %9166 = vst [vmem:[#allocation22_spill] sm:$0xff] %v6583_v50 }
 0x25a   : > { %v4818_v24 = vpack.c.bf16 %v1579_v16, %v1577_v38  ;;  %9167 = vst [vmem:[#allocation23_spill] sm:$0xff] %v6590_v25  ;;  %v4820_v1 = vpack.c.bf16 %v1578_v44, %v1576_v18 }
 0x25c   : > { %4805 = vmatpush1.bf16.msra.mxu1 %v4804_v31 }
 0x25d   : > { %v1587_v23 = vpop.permute.xlu0 %1586  ;;  %v1556_v51 = vpop.permute.xlu1 %1555  ;;  %4807 = vmatprep.subr.bf16.mxu1 %v4806_v32 }
 0x25e   : > { %v1566_v31 = vsel %vm1559_vm15, %v1556_v51, %v1548_v46 }
 0x260   : > { %4809 = vmatpush1.bf16.msra.mxu1 %v4808_v8 }
 0x261   : > { %v1517_v29 = vpop.permute.xlu0 %1516  ;;  %v1585_v11 = vpop.permute.xlu1 %1584  ;;  %4811 = vmatprep.subr.bf16.mxu1 %v4810_v35 }
 0x262   : > { %v1522_v62 = vsel %vm1518_vm14, %v6434_v6, %v1517_v29  ;;  %v1526_v14 = vsel %vm1518_vm14, %v1517_v29, %v6434_v6  ;;  %v1562_v6 = vsel %vm1559_vm15, %v1548_v46, %v1556_v51  ;;  %v1581_v46 = vmul.f32 %v6546_v21, %v1566_v31  ;;  %v6623_v31 = vld [vmem:[#allocation4 + $0x10] ss:$0 sm:$0xff] }
 0x263   : > { %v1541_v37 = vmul.f32 %v6524_v60, %v1522_v62  ;;  %v1542_v17 = vmul.f32 %v6509_v41, %v1526_v14  ;;  %v1580_v10 = vmul.f32 %v6550_v2, %v1562_v6 }
 0x264   : > { %4813 = vmatpush1.bf16.msra.mxu1 %v4812_v53 }
 0x265   : > { %v4816_v55 = vpack.c.bf16 %v1541_v37, %v1539_v58  ;;  %v1595_v30 = vpop.permute.xlu0 %1594  ;;  %v1593_v52 = vpop.permute.xlu1 %1592  ;;  %v4814_v63 = vpack.c.bf16 %v1542_v17, %v1540_v7 }
 0x266   : > { %v1606_v32 = vsel %vm1600_vm2, %v1595_v30, %v1587_v23  ;;  %v1605_v19 = vsel %vm1600_vm2, %v1593_v52, %v1585_v11  ;;  %v1602_v3 = vsel %vm1600_vm2, %v1587_v23, %v1595_v30  ;;  %v1601_v8 = vsel %vm1600_vm2, %v1585_v11, %v1593_v52 }
 0x267   : > { %4815 = vmatprep.subr.bf16.mxu1 %v4814_v63  ;;  %v1620_v35 = vmul.f32 %v6583_v50, %v1606_v32  ;;  %v1618_v28 = vmul.f32 %v6583_v50, %v1605_v19  ;;  %v1619_v29 = vmul.f32 %v6590_v25, %v1602_v3  ;;  %v1617_v11 = vmul.f32 %v6590_v25, %v1601_v8 }
 0x268   : > { %4817 = vmatpush1.bf16.msra.mxu1 %v4816_v55 }
 0x269   : > { %v1558_v51 = vpop.permute.xlu0 %1557  ;;  %v1589_v22 = vpop.permute.xlu1 %1588  ;;  %4819 = vmatprep.subr.bf16.mxu1 %v4818_v24  ;;  %v4826_v36 = vpack.c.bf16 %v1620_v35, %v1618_v28  ;;  %v4828_v16 = vpack.c.bf16 %v1619_v29, %v1617_v11  ;;  %v6625_v24 = vld [vmem:[#allocation4 + $0x18] ss:$0 sm:$0xff]  ;;  %v1330_v11 = vld [vmem:[%s9097_s7 + $0x30] sm:$0xff] }
 0x26a   : > { %v1563_v33 = vsel %vm1559_vm15, %v6511_v49, %v1558_v51  ;;  %v1567_v4 = vsel %vm1559_vm15, %v1558_v51, %v6511_v49  ;;  %v1328_v51 = vld [vmem:[%s9097_s7 + $0x20] sm:$0xff]  ;;  %v1327_v28 = vld [vmem:[%s9097_s7 + $0x18] sm:$0xff] }
 0x26b   : > { %v1582_v12 = vmul.f32 %v6550_v2, %v1563_v33  ;;  %v1583_v40 = vmul.f32 %v6546_v21, %v1567_v4 }
 0x26c   : > { %4821 = vmatpush1.bf16.msra.mxu1 %v4820_v1  ;;  %v1324_v1 = vld [vmem:[%s9097_s7] sm:$0xff] }
 0x26d   : > { %v4824_v23 = vpack.c.bf16 %v1582_v12, %v1580_v10  ;;  %v1591_v53 = vpop.permute.xlu0 %1590  ;;  %v1597_v58 = vpop.permute.xlu1 %1596  ;;  %v4822_v7 = vpack.c.bf16 %v1583_v40, %v1581_v46 }
 0x26e   : > { %v1603_v49 = vsel %vm1600_vm2, %v1589_v22, %v1597_v58  ;;  %v1607_v54 = vsel %vm1600_vm2, %v1597_v58, %v1589_v22  ;;  %v1331_v58 = vld [vmem:[%s9097_s7 + $0x38] sm:$0xff] }
 0x26f   : > { %4823 = vmatprep.subr.bf16.mxu1 %v4822_v7  ;;  %v1621_v17 = vmul.f32 %v6590_v25, %v1603_v49  ;;  %v1622_v44 = vmul.f32 %v6583_v50, %v1607_v54  ;;  %v1334_v49 = vld [vmem:[%s9097_s7 + $0x50] sm:$0xff] }
 0x270   : > { %4825 = vmatpush1.bf16.msra.mxu1 %v4824_v23 }
 0x271   : > { %v1599_v62 = vpop.permute.xlu0 %1598  ;;  %v1626_v14 = vpop.permute.xlu1 %1625  ;;  %4827 = vmatprep.subr.bf16.mxu1 %v4826_v36 }
 0x272   : > { %v1604_v38 = vsel %vm1600_vm2, %v1591_v53, %v1599_v62  ;;  %v1608_v37 = vsel %vm1600_vm2, %v1599_v62, %v1591_v53 }
 0x273   : > { %v1623_v18 = vmul.f32 %v6590_v25, %v1604_v38  ;;  %v1624_v55 = vmul.f32 %v6583_v50, %v1608_v37 }
 0x274   : > { %4829 = vmatpush1.bf16.msra.mxu1 %v4828_v16 }
 0x275   : > { %v4832_v30 = vpack.c.bf16 %v1623_v18, %v1621_v17  ;;  %v1628_v52 = vpop.permute.xlu0 %1627  ;;  %v1634_v63 = vpop.permute.xlu1 %1633  ;;  %v4830_v6 = vpack.c.bf16 %v1624_v55, %v1622_v44  ;;  %v1333_v17 = vld [vmem:[%s9097_s7 + $0x48] sm:$0xff]  ;;  %v1326_v55 = vld [vmem:[%s9097_s7 + $0x10] sm:$0xff] }
 0x276   : > { %v1642_v32 = vsel %vm1641_vm3, %v1626_v14, %v1634_v63  ;;  %v1646_v19 = vsel %vm1641_vm3, %v1634_v63, %v1626_v14  ;;  %v1335_v63 = vld [vmem:[%s9097_s7 + $0x58] sm:$0xff] }
 0x277   : > { %4831 = vmatprep.subr.bf16.mxu1 %v4830_v6  ;;  %v1658_v8 = vmul.f32 %v6623_v31, %v1642_v32  ;;  %v1659_v33 = vmul.f32 %v6625_v24, %v1646_v19 }
 0x278   : > { %4833 = vmatpush1.bf16.msra.mxu1 %v4832_v30  ;;  %v1329_v30 = vld [vmem:[%s9097_s7 + $0x28] sm:$0xff] }
 0x279   : > { %v1636_v10 = vpop.permute.xlu0 %1635  ;;  %v1630_v46 = vpop.permute.xlu1 %1629 }
 0x27a   : > { %v1643_v22 = vsel %vm1641_vm3, %v1628_v52, %v1636_v10  ;;  %v1647_v3 = vsel %vm1641_vm3, %v1636_v10, %v1628_v52  ;;  %v1332_v52 = vld [vmem:[%s9097_s7 + $0x40] sm:$0xff] }
 0x27b   : > { %v1660_v4 = vmul.f32 %v6623_v31, %v1643_v22  ;;  %v1661_v35 = vmul.f32 %v6625_v24, %v1647_v3  ;;  %1743 = vmatmul.mubr.f32.vlgmr.msra.gmra.mrb[6].mxu1 %v1324_v1 }
 0x27c   : > { %1748 = vmatprep.mubr.f32.mxu1 %v1328_v51 }
 0x27d   : > { %v4836_v12 = vpack.c.bf16 %v1660_v4, %v1658_v8  ;;  %v1632_v40 = vpop.permute.xlu0 %1631  ;;  %v1638_v23 = vpop.permute.xlu1 %1637  ;;  %v4834_v53 = vpack.c.bf16 %v1661_v35, %v1659_v33 }
 0x27e   : > { %v1644_v7 = vsel %vm1641_vm3, %v1630_v46, %v1638_v23  ;;  %v1648_v29 = vsel %vm1641_vm3, %v1638_v23, %v1630_v46 }
 0x27f   : > { %1749 = vmatmul.mubr.f32.gmra.mrb[8].mxu1 %v1327_v28  ;;  %4835 = vmatprep.subr.bf16.mxu1 %v4834_v53  ;;  %v1662_v14 = vmul.f32 %v6623_v31, %v1644_v7  ;;  %v1663_v16 = vmul.f32 %v6625_v24, %v1648_v29 }
 0x280   : > { %4837 = vmatpush1.bf16.msra.mxu1 %v4836_v12  ;;  %1754 = vmatprep.mubr.f32.mxu1 %v1331_v58 }
 0x281   : > { %v1640_v36 = vpop.permute.xlu0 %1639 }
 0x282   : > { %v1645_v54 = vsel %vm1641_vm3, %v1632_v40, %v1640_v36  ;;  %v1649_v62 = vsel %vm1641_vm3, %v1640_v36, %v1632_v40 }
 0x283   : > { %v1664_v38 = vmul.f32 %v6623_v31, %v1645_v54  ;;  %v1665_v37 = vmul.f32 %v6625_v24, %v1649_v62  ;;  %1755 = vmatmul.mubr.f32.gmra.mrb[10].mxu1 %v1330_v11 }
 0x284   : > { %1760 = vmatprep.mubr.f32.mxu1 %v1334_v49 }
 0x285   : > { %v4840_v44 = vpack.c.bf16 %v1664_v38, %v1662_v14  ;;  %v4838_v18 = vpack.c.bf16 %v1665_v37, %v1663_v16 }
 0x287   : > { %1761 = vmatmul.mubr.f32.gmra.mrb[12].mxu1 %v1333_v17  ;;  %4839 = vmatprep.subr.bf16.mxu1 %v4838_v18 }
 0x288   : > { %4841 = vmatpush1.bf16.msra.mxu1 %v4840_v44  ;;  %1831 = vmatprep.mubr.f32.mxu1 %v9104_v0 }
 0x28b   : > { %4605 = vmatmul.mubr.msk.f32.vlgmr.msra.gmra.mrb[6].mxu1 %vm1134_vm1, %v1326_v55 }
 0x28c   : > { %1837 = vmatprep.mubr.f32.mxu1 %v9104_v0 }
 0x28e   : > { %v1858_v6 = vpop.permute.xlu1 %1857 }
 0x28f   : > { %4606 = vmatmul.mubr.msk.f32.gmra.mrb[8].mxu1 %vm1134_vm1, %v1329_v30 }
 0x290   : > { %1843 = vmatprep.mubr.f32.mxu1 %v9104_v0 }
 0x292   : > { %v1862_v51 = vpop.permute.xlu0 %1861 }
 0x293   : > { %4607 = vmatmul.mubr.msk.f32.gmra.mrb[10].mxu1 %vm1134_vm1, %v1332_v52  ;;  %v1882_v32 = vpop.permute.xlu1 %1881  ;;  %v4610_v52 = vld [vmem:[%s9097_s7 + $0x68] sm:$0xff] }
 0x294   : > { %1849 = vmatprep.mubr.f32.mxu1 %v9104_v0 }
 0x296   : > { %v1866_v29 = vpop.permute.xlu0 %1865 }
 0x297   : > { %4608 = vmatmul.mubr.msk.f32.gmra.mrb[12].mxu1 %vm1134_vm1, %v1335_v63  ;;  %v1886_v33 = vpop.permute.xlu1 %1885 }
 0x298   : > { %2249 = vmatprep.mubr.f32.mxu1 %v4610_v52 }
 0x29b   : > { %v1890_v49 = vpop.permute.xlu0 %1889 }
 0x29c   : > { %v1870_v11 = vpop.permute.xlu1 %1869 }
 0x2a1   : > { %v1894_v14 = vpop.permute.xlu1 %1893 }
 0x35e   : > { %v1833_v19 = vpop.f32.mrb[6].mxu1 }
 0x35f   : > { %v1872_v1 = vmul.f32 %v1858_v6, %v1833_v19  ;;  %v1835_v10 = vpop.f32.mrb[7].mxu1 }
 0x360   : > { %v1873_v23 = vmul.f32 %v1858_v6, %v1835_v10 }
 0x361   : > { %v6692_v46 = vadd.f32 %v1882_v32, %v1872_v1 }
 0x362   : > { %v1839_v22 = vpop.f32.mrb[8].mxu1  ;;  %v6718_v53 = vadd.f32 %v1882_v32, %v1873_v23 }
 0x363   : > { %v1874_v3 = vmul.f32 %v1862_v51, %v1839_v22  ;;  %1917 = vrot.lane.b32.xlu1 %v6692_v46, %s5594_s21  ;;  %v1841_v8 = vpop.f32.mrb[9].mxu1 }
 0x364   : > { %v1875_v58 = vmul.f32 %v1862_v51, %v1841_v8 }
 0x365   : > { %v6696_v4 = vadd.f32 %v1886_v33, %v1874_v3  ;;  %v5604_v3 = vmov 4  }
 0x366   : > { %v1845_v35 = vpop.f32.mrb[10].mxu1  ;;  %v6724_v7 = vadd.f32 %v1886_v33, %v1875_v58  ;;  %5352 = vset.pattern.permute.xlu1 %v5604_v3  ;;  %5353 = vset.pattern.permute.xlu0 %v5604_v3 }
 0x367   : > { %1949 = vrot.lane.b32.xlu1 %v6692_v46, %s5595_s23  ;;  %1919 = vrot.lane.b32.xlu0 %v6696_v4, %s5594_s21  ;;  %v1847_v28 = vpop.f32.mrb[11].mxu1  ;;  %v1876_v36 = vmul.f32 %v1866_v29, %v1845_v35  ;;  %v6862_v35 = vld [vmem:[%s9099_s9] sm:$0xff] }
 0x368   : > { %v1877_v38 = vmul.f32 %v1866_v29, %v1847_v28  ;;  %9168 = vst [vmem:[#allocation24_spill] sm:$0xff] %v6862_v35  ;;  %v6868_v28 = vld [vmem:[%s9099_s9 + $0x8] sm:$0xff]  ;;  %v5605_v29 = vmov 5  }
 0x369   : > { %v6746_v54 = vadd.f32 %v1890_v49, %v1876_v36  ;;  %9169 = vst [vmem:[#allocation25_spill] sm:$0xff] %v6868_v28 }
 0x36a   : > { %v1851_v12 = vpop.f32.mrb[12].mxu1  ;;  %v6770_v37 = vadd.f32 %v1890_v49, %v1877_v38 }
 0x36b   : > { %1981 = vrot.lane.b32.xlu1 %v6692_v46, %s5596_s24  ;;  %1951 = vrot.lane.b32.xlu0 %v6696_v4, %s5595_s23  ;;  %v1853_v40 = vpop.f32.mrb[13].mxu1  ;;  %v1878_v62 = vmul.f32 %v1870_v11, %v1851_v12 }
 0x36c   : > { %v1879_v17 = vmul.f32 %v1870_v11, %v1853_v40  ;;  %v6878_v11 = vld [vmem:[%s9099_s9 + $0x10] sm:$0xff] }
 0x36d   : > { %v6752_v16 = vadd.f32 %v1894_v14, %v1878_v62  ;;  %9170 = vst [vmem:[#allocation26_spill] sm:$0xff] %v6878_v11 }
 0x36e   : > { %v6776_v44 = vadd.f32 %v1894_v14, %v1879_v17 }
 0x36f   : > { %2013 = vrot.lane.b32.xlu1 %v6692_v46, %s5597_s25  ;;  %1983 = vrot.lane.b32.xlu0 %v6696_v4, %s5596_s24 }
 0x373   : > { %2045 = vrot.lane.b32.xlu1 %v6692_v46, %s5598_s26  ;;  %2015 = vrot.lane.b32.xlu0 %v6696_v4, %s5597_s25 }
 0x377   : > { %2077 = vrot.lane.b32.xlu1 %v6692_v46, %s5599_s27  ;;  %2047 = vrot.lane.b32.xlu0 %v6696_v4, %s5598_s26 }
 0x37b   : > { %1925 = vrot.lane.b32.xlu1 %v6718_v53, %s5594_s21  ;;  %2079 = vrot.lane.b32.xlu0 %v6696_v4, %s5599_s27 }
 0x37f   : > { %1957 = vrot.lane.b32.xlu1 %v6718_v53, %s5595_s23  ;;  %1927 = vrot.lane.b32.xlu0 %v6724_v7, %s5594_s21 }
 0x383   : > { %1989 = vrot.lane.b32.xlu1 %v6718_v53, %s5596_s24  ;;  %1959 = vrot.lane.b32.xlu0 %v6724_v7, %s5595_s23 }
 0x387   : > { %2021 = vrot.lane.b32.xlu1 %v6718_v53, %s5597_s25  ;;  %1991 = vrot.lane.b32.xlu0 %v6724_v7, %s5596_s24 }
 0x38b   : > { %2053 = vrot.lane.b32.xlu1 %v6718_v53, %s5598_s26  ;;  %2023 = vrot.lane.b32.xlu0 %v6724_v7, %s5597_s25 }
 0x38f   : > { %2085 = vrot.lane.b32.xlu1 %v6718_v53, %s5599_s27  ;;  %2055 = vrot.lane.b32.xlu0 %v6724_v7, %s5598_s26 }
 0x393   : > { %2087 = vrot.lane.b32.xlu0 %v6724_v7, %s5599_s27  ;;  %1921 = vrot.lane.b32.xlu1 %v6746_v54, %s5594_s21 }
 0x397   : > { %1953 = vrot.lane.b32.xlu1 %v6746_v54, %s5595_s23  ;;  %1923 = vrot.lane.b32.xlu0 %v6752_v16, %s5594_s21 }
 0x39b   : > { %1985 = vrot.lane.b32.xlu1 %v6746_v54, %s5596_s24  ;;  %1955 = vrot.lane.b32.xlu0 %v6752_v16, %s5595_s23 }
 0x39f   : > { %2017 = vrot.lane.b32.xlu1 %v6746_v54, %s5597_s25  ;;  %1987 = vrot.lane.b32.xlu0 %v6752_v16, %s5596_s24 }
 0x3a3   : > { %2049 = vrot.lane.b32.xlu1 %v6746_v54, %s5598_s26  ;;  %2019 = vrot.lane.b32.xlu0 %v6752_v16, %s5597_s25 }
 0x3a7   : > { %1929 = vrot.lane.b32.xlu1 %v6770_v37, %s5594_s21  ;;  %2051 = vrot.lane.b32.xlu0 %v6752_v16, %s5598_s26 }
 0x3ab   : > { %2081 = vrot.lane.b32.xlu1 %v6746_v54, %s5599_s27  ;;  %1931 = vrot.lane.b32.xlu0 %v6776_v44, %s5594_s21 }
 0x3af   : > { %1961 = vrot.lane.b32.xlu1 %v6770_v37, %s5595_s23  ;;  %2083 = vrot.lane.b32.xlu0 %v6752_v16, %s5599_s27 }
 0x3b3   : > { %1993 = vrot.lane.b32.xlu1 %v6770_v37, %s5596_s24  ;;  %1963 = vrot.lane.b32.xlu0 %v6776_v44, %s5595_s23 }
 0x3b7   : > { %2025 = vrot.lane.b32.xlu1 %v6770_v37, %s5597_s25  ;;  %2111 = vrot.lane.b32.xlu0 %v6696_v4, %s5600_s29 }
 0x3bb   : > { %2057 = vrot.lane.b32.xlu1 %v6770_v37, %s5598_s26  ;;  %1995 = vrot.lane.b32.xlu0 %v6776_v44, %s5596_s24 }
 0x3bf   : > { %2089 = vrot.lane.b32.xlu1 %v6770_v37, %s5599_s27  ;;  %2119 = vrot.lane.b32.xlu0 %v6724_v7, %s5600_s29 }
 0x3c3   : > { %2109 = vrot.lane.b32.xlu1 %v6692_v46, %s5600_s29  ;;  %2027 = vrot.lane.b32.xlu0 %v6776_v44, %s5597_s25 }
 0x3c7   : > { %2117 = vrot.lane.b32.xlu1 %v6718_v53, %s5600_s29  ;;  %2143 = vrot.lane.b32.xlu0 %v6696_v4, %s5601_s19 }
 0x3cb   : > { %2141 = vrot.lane.b32.xlu1 %v6692_v46, %s5601_s19  ;;  %2151 = vrot.lane.b32.xlu0 %v6724_v7, %s5601_s19 }
 0x3cf   : > { %2149 = vrot.lane.b32.xlu1 %v6718_v53, %s5601_s19  ;;  %2115 = vrot.lane.b32.xlu0 %v6752_v16, %s5600_s29 }
 0x3d3   : > { %2113 = vrot.lane.b32.xlu1 %v6746_v54, %s5600_s29  ;;  %2059 = vrot.lane.b32.xlu0 %v6776_v44, %s5598_s26 }
 0x3d5   : > { %v1918_v18 = vpop.permute.xlu1 %1917 }
 0x3d7   : > { %2121 = vrot.lane.b32.xlu1 %v6770_v37, %s5600_s29  ;;  %2147 = vrot.lane.b32.xlu0 %v6752_v16, %s5601_s19 }
 0x3d9   : > { %v6826_v55 = vpop.permute.xlu1 %1949  ;;  %v1920_v30 = vpop.permute.xlu0 %1919 }
 0x3db   : > { %2145 = vrot.lane.b32.xlu1 %v6746_v54, %s5601_s19  ;;  %2091 = vrot.lane.b32.xlu0 %v6776_v44, %s5599_s27 }
 0x3dd   : > { %v6835_v63 = vpop.permute.xlu1 %1981  ;;  %v6837_v6 = vpop.permute.xlu0 %1951 }
 0x3df   : > { %2153 = vrot.lane.b32.xlu1 %v6770_v37, %s5601_s19  ;;  %2123 = vrot.lane.b32.xlu0 %v6776_v44, %s5600_s29 }
 0x3e1   : > { %v6843_v32 = vpop.permute.xlu1 %2013  ;;  %v6845_v19 = vpop.permute.xlu0 %1983 }
 0x3e3   : > { %2155 = vrot.lane.b32.xlu0 %v6776_v44, %s5601_s19  ;;  %2364 = vperm.xlu1 %5352, %v6862_v35  }
 0x3e5   : > { %v6849_v1 = vpop.permute.xlu1 %2045  ;;  %v6851_v10 = vpop.permute.xlu0 %2015 }
 0x3e7   : > { %2368 = vperm.xlu0 %5353, %v6868_v28   ;;  %5354 = vset.pattern.permute.xlu1 %v5605_v29 }
 0x3e8   : > { %2388 = vperm.xlu1 %5354, %v6862_v35  }
 0x3e9   : > { %v6853_v51 = vpop.permute.xlu1 %2077  ;;  %v6855_v22 = vpop.permute.xlu0 %2047 }
 0x3eb   : > { %2372 = vperm.xlu0 %5353, %v6878_v11  }
 0x3ec   : > { %2392 = vperm.xlu1 %5354, %v6868_v28  }
 0x3ed   : > { %v1926_v8 = vpop.permute.xlu1 %1925  ;;  %v6857_v33 = vpop.permute.xlu0 %2079 }
 0x3ee   : > { %v1933_v12 = vsel %vm1354_vm10, %v1918_v18, %v1926_v8  ;;  %v1937_v40 = vsel %vm1354_vm10, %v1926_v8, %v1918_v18 }
 0x3ef   : > { %v1941_v62 = vmul.f32 %v1937_v40, %v6316_v13  ;;  %v1942_v14 = vmul.f32 %v1933_v12, %v6320_v26  ;;  %5356 = vset.pattern.permute.xlu0 %v5605_v29  ;;  %v6899_v12 = vld [vmem:[%s9099_s9 + $0x18] sm:$0xff] }
 0x3f0   : > { %2396 = vperm.xlu0 %5356, %v6878_v11   ;;  %5355 = vset.pattern.permute.xlu1 %v5604_v3  ;;  %9171 = vst [vmem:[#allocation27_spill] sm:$0xff] %v6899_v12 }
 0x3f1   : > { %v1958_v23 = vpop.permute.xlu1 %1957  ;;  %v1928_v58 = vpop.permute.xlu0 %1927  ;;  %2376 = vperm.xlu1 %5355, %v6899_v12  }
 0x3f2   : > { %v1934_v36 = vsel %vm1354_vm10, %v1920_v30, %v1928_v58  ;;  %v1938_v49 = vsel %vm1354_vm10, %v1928_v58, %v1920_v30  ;;  %v1965_v9 = vsel %vm1395_vm11, %v6826_v55, %v1958_v23 }
 0x3f3   : > { %v1943_v38 = vmul.f32 %v1938_v49, %v6316_v13  ;;  %v1944_v17 = vmul.f32 %v1934_v36, %v6320_v26 }
 0x3f5   : > { %v4844_v18 = vpack.c.bf16 %v1943_v38, %v1941_v62  ;;  %v6890_v52 = vpop.permute.xlu1 %1989  ;;  %v1960_v8 = vpop.permute.xlu0 %1959  ;;  %v4842_v61 = vpack.c.bf16 %v1944_v17, %v1942_v14  ;;  %5357 = vset.pattern.permute.xlu1 %v5605_v29 }
 0x3f6   : > { %2400 = vperm.xlu1 %5357, %v6899_v12   ;;  %v1966_v47 = vsel %vm1395_vm11, %v6837_v6, %v1960_v8  ;;  %v1970_v28 = vsel %vm1395_vm11, %v1960_v8, %v6837_v6  ;;  %v1969_v6 = vsel %vm1395_vm11, %v1958_v23, %v6826_v55 }
 0x3f7   : > { %4843 = vmatprep.subr.bf16.mxu1 %v4842_v61  ;;  %v1976_v35 = vmul.f32 %v1966_v47, %v6362_v34  ;;  %v1974_v47 = vmul.f32 %v1965_v9, %v6362_v34  ;;  %v1975_v8 = vmul.f32 %v1970_v28, %v6369_v27 }
 0x3f8   : > { %4845 = vmatpush1.bf16.msra.mxu1 %v4844_v18 }
 0x3f9   : > { %v6894_v30 = vpop.permute.xlu1 %2021  ;;  %v1992_v40 = vpop.permute.xlu0 %1991 }
 0x3fd   : > { %v6902_v58 = vpop.permute.xlu1 %2053  ;;  %v6904_v36 = vpop.permute.xlu0 %2023 }
 0x401   : > { %v6907_v61 = vpop.permute.xlu1 %2085  ;;  %v6909_v49 = vpop.permute.xlu0 %2055 }
 0x402   : > { %9172 = vst [vmem:[#allocation28_spill] sm:$0xff] %v6907_v61 }
 0x405   : > { %v6911_v62 = vpop.permute.xlu0 %2087  ;;  %v1922_v3 = vpop.permute.xlu1 %1921 }
 0x409   : > { %v1954_v14 = vpop.permute.xlu1 %1953  ;;  %v1924_v38 = vpop.permute.xlu0 %1923 }
 0x40d   : > { %v6913_v17 = vpop.permute.xlu1 %1985  ;;  %v1956_v18 = vpop.permute.xlu0 %1955 }
 0x411   : > { %v6915_v0 = vpop.permute.xlu1 %2017  ;;  %v6917_v59 = vpop.permute.xlu0 %1987 }
 0x415   : > { %v6919_v5 = vpop.permute.xlu1 %2049  ;;  %v6921_v29 = vpop.permute.xlu0 %2019 }
 0x419   : > { %v1930_v57 = vpop.permute.xlu1 %1929  ;;  %v6923_v48 = vpop.permute.xlu0 %2051 }
 0x41a   : > { %9173 = vst [vmem:[#allocation29_spill] sm:$0xff] %v6923_v48  ;;  %v1935_v56 = vsel %vm1354_vm10, %v1922_v3, %v1930_v57  ;;  %v1939_v45 = vsel %vm1354_vm10, %v1930_v57, %v1922_v3 }
 0x41b   : > { %v1945_v57 = vmul.f32 %v1939_v45, %v6316_v13  ;;  %v1946_v3 = vmul.f32 %v1935_v56, %v6320_v26  ;;  %v1973_v45 = vmul.f32 %v1969_v6, %v6369_v27  ;;  %v1998_v56 = vsel %vm1436_vm12, %v6845_v19, %v1992_v40 }
 0x41d   : > { %v6935_v12 = vpop.permute.xlu1 %2081  ;;  %v1932_v11 = vpop.permute.xlu0 %1931  ;;  %v4852_v55 = vpack.c.bf16 %v1975_v8, %v1973_v45 }
 0x41e   : > { %9174 = vst [vmem:[#allocation30_spill] sm:$0xff] %v6935_v12  ;;  %v1936_v25 = vsel %vm1354_vm10, %v1924_v38, %v1932_v11  ;;  %v1940_v50 = vsel %vm1354_vm10, %v1932_v11, %v1924_v38 }
 0x41f   : > { %v1947_v2 = vmul.f32 %v1940_v50, %v6316_v13  ;;  %v1948_v12 = vmul.f32 %v1936_v25, %v6320_v26  ;;  %v4850_v50 = vpack.c.bf16 %v1976_v35, %v1974_v47  ;;  %v2002_v35 = vsel %vm1436_vm12, %v1992_v40, %v6845_v19 }
 0x420   : > { %v2001_v19 = vsel %vm1436_vm12, %v6890_v52, %v6835_v63  ;;  %v2007_v6 = vmul.f32 %v2002_v35, %v6409_v42 }
 0x421   : > { %v4848_v48 = vpack.c.bf16 %v1947_v2, %v1945_v57  ;;  %v1962_v21 = vpop.permute.xlu1 %1961  ;;  %v6954_v61 = vpop.permute.xlu0 %2083  ;;  %v4846_v11 = vpack.c.bf16 %v1948_v12, %v1946_v3  ;;  %v1997_v2 = vsel %vm1436_vm12, %v6835_v63, %v6890_v52  ;;  %v2008_v12 = vmul.f32 %v1998_v56, %v6402_v15 }
 0x422   : > { %v1967_v25 = vsel %vm1395_vm11, %v1954_v14, %v1962_v21  ;;  %v1971_v9 = vsel %vm1395_vm11, %v1962_v21, %v1954_v14  ;;  %v2006_v40 = vmul.f32 %v1997_v2, %v6402_v15  ;;  %v2005_v45 = vmul.f32 %v2001_v19, %v6409_v42 }
 0x423   : > { %4847 = vmatprep.subr.bf16.mxu1 %v4846_v11  ;;  %v1977_v21 = vmul.f32 %v1971_v9, %v6369_v27  ;;  %v1978_v14 = vmul.f32 %v1967_v25, %v6362_v34  ;;  %v2030_v56 = vsel %vm1477_vm13, %v6851_v10, %v6904_v36  ;;  %v2029_v25 = vsel %vm1477_vm13, %v6843_v32, %v6894_v30 }
 0x424   : > { %4849 = vmatpush1.bf16.msra.mxu1 %v4848_v48  ;;  %v4860_v9 = vpack.c.bf16 %v2007_v6, %v2005_v45  ;;  %v2040_v35 = vmul.f32 %v2030_v56, %v6443_v43 }
 0x425   : > { %v1994_v28 = vpop.permute.xlu1 %1993  ;;  %4851 = vmatprep.subr.bf16.mxu1 %v4850_v50  ;;  %v1964_v23 = vpop.permute.xlu0 %1963  ;;  %v4858_v50 = vpack.c.bf16 %v2008_v12, %v2006_v40 }
 0x426   : > { %v1968_v38 = vsel %vm1395_vm11, %v1956_v18, %v1964_v23  ;;  %v1972_v48 = vsel %vm1395_vm11, %v1964_v23, %v1956_v18  ;;  %v1999_v63 = vsel %vm1436_vm12, %v6913_v17, %v1994_v28  ;;  %v2003_v52 = vsel %vm1436_vm12, %v1994_v28, %v6913_v17 }
 0x427   : > { %v1979_v57 = vmul.f32 %v1972_v48, %v6369_v27  ;;  %v1980_v3 = vmul.f32 %v1968_v38, %v6362_v34  ;;  %v2034_v23 = vsel %vm1477_vm13, %v6904_v36, %v6851_v10  ;;  %v2009_v12 = vmul.f32 %v2003_v52, %v6409_v42 }
 0x428   : > { %4853 = vmatpush1.bf16.msra.mxu1 %v4852_v55  ;;  %v2010_v38 = vmul.f32 %v1999_v63, %v6402_v15  ;;  %v2033_v10 = vsel %vm1477_vm13, %v6894_v30, %v6843_v32  ;;  %v2038_v36 = vmul.f32 %v2029_v25, %v6443_v43  ;;  %v2039_v19 = vmul.f32 %v2034_v23, %v6473_v20 }
 0x429   : > { %v4856_v47 = vpack.c.bf16 %v1979_v57, %v1977_v21  ;;  %v2026_v18 = vpop.permute.xlu1 %2025  ;;  %v6986_v8 = vpop.permute.xlu0 %2111  ;;  %v4854_v11 = vpack.c.bf16 %v1980_v3, %v1978_v14  ;;  %v2037_v6 = vmul.f32 %v2033_v10, %v6473_v20 }
 0x42a   : > { %v4866_v40 = vpack.c.bf16 %v2040_v35, %v2038_v36  ;;  %v2035_v32 = vsel %vm1477_vm13, %v2026_v18, %v6915_v0  ;;  %v2066_v35 = vsel %vm1518_vm14, %v6909_v49, %v6855_v22 }
 0x42b   : > { %4855 = vmatprep.subr.bf16.mxu1 %v4854_v11  ;;  %v4868_v45 = vpack.c.bf16 %v2039_v19, %v2037_v6  ;;  %v2041_v63 = vmul.f32 %v2035_v32, %v6473_v20  ;;  %v9175_v32 = vld [vmem:[#allocation28_spill] sm:$0xff] }
 0x42c   : > { %4857 = vmatpush1.bf16.msra.mxu1 %v4856_v47  ;;  %v2031_v47 = vsel %vm1477_vm13, %v6915_v0, %v2026_v18 }
 0x42d   : > { %v7003_v2 = vpop.permute.xlu1 %2057  ;;  %4859 = vmatprep.subr.bf16.mxu1 %v4858_v50  ;;  %v1996_v55 = vpop.permute.xlu0 %1995  ;;  %v2042_v52 = vmul.f32 %v2031_v47, %v6443_v43 }
 0x42e   : > { %v2000_v17 = vsel %vm1436_vm12, %v6917_v59, %v1996_v55  ;;  %v2004_v28 = vsel %vm1436_vm12, %v1996_v55, %v6917_v59  ;;  %v2067_v47 = vsel %vm1518_vm14, %v7003_v2, %v6919_v5 }
 0x42f   : > { %v2011_v48 = vmul.f32 %v2004_v28, %v6409_v42  ;;  %v2012_v21 = vmul.f32 %v2000_v17, %v6402_v15  ;;  %v2065_v17 = vsel %vm1518_vm14, %v6902_v58, %v6849_v1 }
 0x430   : > { %4861 = vmatpush1.bf16.msra.mxu1 %v4860_v9  ;;  %v2070_v10 = vmul.f32 %v2065_v17, %v6509_v41 }
 0x431   : > { %v4864_v14 = vpack.c.bf16 %v2011_v48, %v2009_v12  ;;  %v7025_v57 = vpop.permute.xlu1 %2089  ;;  %v7027_v59 = vpop.permute.xlu0 %2119  ;;  %v4862_v3 = vpack.c.bf16 %v2012_v21, %v2010_v38  ;;  %v2061_v38 = vsel %vm1518_vm14, %v6849_v1, %v6902_v58  ;;  %v2062_v48 = vsel %vm1518_vm14, %v6855_v22, %v6909_v49 }
 0x432   : > { %v4878_v21 = vpack.c.bf16 %v6776_v44, %v6770_v37  ;;  %v2069_v58 = vmul.f32 %v2061_v38, %v6524_v60  ;;  %v2071_v22 = vmul.f32 %v2062_v48, %v6524_v60 }
 0x433   : > { %4863 = vmatprep.subr.bf16.mxu1 %v4862_v3 }
 0x434   : > { %4865 = vmatpush1.bf16.msra.mxu1 %v4864_v14 }
 0x435   : > { %v7037_v30 = vpop.permute.xlu1 %2109  ;;  %4867 = vmatprep.subr.bf16.mxu1 %v4866_v40  ;;  %v2028_v11 = vpop.permute.xlu0 %2027 }
 0x436   : > { %v2032_v56 = vsel %vm1477_vm13, %v6921_v29, %v2028_v11  ;;  %v2036_v50 = vsel %vm1477_vm13, %v2028_v11, %v6921_v29  ;;  %v4874_v29 = vpack.c.bf16 %v6724_v7, %v6718_v53  ;;  %v2072_v53 = vmul.f32 %v2066_v35, %v6509_v41 }
 0x437   : > { %v2043_v0 = vmul.f32 %v2036_v50, %v6473_v20  ;;  %v2044_v18 = vmul.f32 %v2032_v56, %v6443_v43  ;;  %v4876_v7 = vpack.c.bf16 %v6696_v4, %v6692_v46  ;;  %v4880_v46 = vpack.c.bf16 %v6752_v16, %v6746_v54 }
 0x438   : > { %4869 = vmatpush1.bf16.msra.mxu1 %v4868_v45  ;;  %v2098_v4 = vsel %vm1559_vm15, %v6911_v62, %v6857_v33  ;;  %v4882_v3 = vpack.c.bf16 %v2072_v53, %v2070_v10  ;;  %v2063_v16 = vsel %vm1518_vm14, %v6919_v5, %v7003_v2  ;;  %v2097_v11 = vsel %vm1559_vm15, %v9175_v32, %v6853_v51  ;;  %v9177_v5 = vld [vmem:[#allocation29_spill] sm:$0xff]  ;;  %v9179_v10 = vld [vmem:[#allocation30_spill] sm:$0xff] }
 0x439   : > { %v4872_v25 = vpack.c.bf16 %v2043_v0, %v2041_v63  ;;  %v7049_v9 = vpop.permute.xlu1 %2117  ;;  %v2144_v55 = vpop.permute.xlu0 %2143  ;;  %v4870_v23 = vpack.c.bf16 %v2044_v18, %v2042_v52  ;;  %v4884_v45 = vpack.c.bf16 %v2071_v22, %v2069_v58  ;;  %v2094_v0 = vsel %vm1559_vm15, %v6857_v33, %v6911_v62  ;;  %v9176_v18 = vld [vmem:[#allocation20_spill] sm:$0xff] }
 0x43a   : > { %v2074_v35 = vmul.f32 %v2067_v47, %v6509_v41  ;;  %v2093_v33 = vsel %vm1559_vm15, %v6853_v51, %v9175_v32  ;;  %v2102_v62 = vmul.f32 %v2097_v11, %v9176_v18  ;;  %v2099_v51 = vsel %vm1559_vm15, %v7025_v57, %v9179_v10 }
 0x43b   : > { %4871 = vmatprep.subr.bf16.mxu1 %v4870_v23  ;;  %v2073_v23 = vmul.f32 %v2063_v16, %v6524_v60  ;;  %v2129_v58 = vsel %vm1600_vm2, %v7049_v9, %v7037_v30 }
 0x43c   : > { %4873 = vmatpush1.bf16.msra.mxu1 %v4872_v25  ;;  %v2104_v25 = vmul.f32 %v2098_v4, %v9176_v18 }
 0x43d   : > { %v2142_v28 = vpop.permute.xlu1 %2141  ;;  %4875 = vmatprep.subr.bf16.mxu1 %v4874_v29  ;;  %v2152_v12 = vpop.permute.xlu0 %2151 }
 0x43e   : > { %v2158_v36 = vsel %vm1641_vm3, %v2144_v55, %v2152_v12  ;;  %v2162_v1 = vsel %vm1641_vm3, %v2152_v12, %v2144_v55 }
 0x43f   : > { %v2167_v19 = vmul.f32 %v6623_v31, %v2158_v36  ;;  %v2168_v40 = vmul.f32 %v6625_v24, %v2162_v1  ;;  %v2095_v36 = vsel %vm1559_vm15, %v9179_v10, %v7025_v57  ;;  %v4890_v1 = vpack.c.bf16 %v2104_v25, %v2102_v62 }
 0x440   : > { %4877 = vmatpush1.bf16.msra.mxu1 %v4876_v7 }
 0x441   : > { %v2150_v49 = vpop.permute.xlu1 %2149  ;;  %v7081_v14 = vpop.permute.xlu0 %2115  ;;  %4879 = vmatprep.subr.bf16.mxu1 %v4878_v21 }
 0x442   : > { %v2157_v37 = vsel %vm1641_vm3, %v2142_v28, %v2150_v49  ;;  %v2161_v44 = vsel %vm1641_vm3, %v2150_v49, %v2142_v28  ;;  %v9178_v28 = vld [vmem:[#allocation21_spill] sm:$0xff]  ;;  %v2126_v49 = vsel %vm1600_vm2, %v6986_v8, %v7027_v59 }
 0x443   : > { %v2165_v6 = vmul.f32 %v6623_v31, %v2157_v37  ;;  %v2166_v54 = vmul.f32 %v6625_v24, %v2161_v44  ;;  %v2103_v12 = vmul.f32 %v2094_v0, %v9178_v28  ;;  %v2101_v21 = vmul.f32 %v2093_v33, %v9178_v28 }
 0x444   : > { %4881 = vmatpush1.bf16.msra.mxu1 %v4880_v46  ;;  %v2130_v46 = vsel %vm1600_vm2, %v7027_v59, %v6986_v8  ;;  %v2105_v57 = vmul.f32 %v2095_v36, %v9178_v28  ;;  %v2125_v44 = vsel %vm1600_vm2, %v7037_v30, %v7049_v9  ;;  %v2106_v8 = vmul.f32 %v2099_v51, %v9176_v18  ;;  %v9180_v59 = vld [vmem:[#allocation22_spill] sm:$0xff]  ;;  %v9181_v30 = vld [vmem:[#allocation23_spill] sm:$0xff]  ;;  %v4612_v51 = vld [vmem:[%s9097_s7 + $0x78] sm:$0xff] }
 0x445   : > { %v4908_v56 = vpack.c.bf16 %v2167_v19, %v2165_v6  ;;  %v2114_v50 = vpop.permute.xlu1 %2113  ;;  %v2060_v63 = vpop.permute.xlu0 %2059  ;;  %4883 = vmatprep.subr.bf16.mxu1 %v4882_v3  ;;  %v4906_v52 = vpack.c.bf16 %v2168_v40, %v2166_v54  ;;  %v4892_v22 = vpack.c.bf16 %v2103_v12, %v2101_v21  ;;  %v2134_v40 = vmul.f32 %v2129_v58, %v9180_v59  ;;  %v4614_v58 = vld [vmem:[%s9097_s7 + $0x88] sm:$0xff] }
 0x446   : > { %v2064_v2 = vsel %vm1518_vm14, %v9177_v5, %v2060_v63  ;;  %v2068_v55 = vsel %vm1518_vm14, %v2060_v63, %v9177_v5  ;;  %v2136_v16 = vmul.f32 %v2130_v46, %v9180_v59  ;;  %v2133_v9 = vmul.f32 %v2125_v44, %v9181_v30  ;;  %v4617_v46 = vld [vmem:[%s9097_s7 + $0xa0] sm:$0xff] }
 0x447   : > { %v2075_v29 = vmul.f32 %v2064_v2, %v6524_v60  ;;  %v2076_v17 = vmul.f32 %v2068_v55, %v6509_v41  ;;  %4907 = vmatprep.subr.bf16.mxu0 %v4906_v52  ;;  %v5606_v44 = vmov 6  }
 0x448   : > { %4885 = vmatpush1.bf16.msra.mxu1 %v4884_v45  ;;  %4909 = vmatpush1.bf16.msra.mxu0 %v4908_v56  ;;  %v2135_v56 = vmul.f32 %v2126_v49, %v9181_v30  ;;  %v4898_v5 = vpack.c.bf16 %v2136_v16, %v2134_v40  ;;  %v4615_v49 = vld [vmem:[%s9097_s7 + $0x90] sm:$0xff]  ;;  %v9185_v40 = vld [vmem:[#allocation26_spill] sm:$0xff] }
 0x449   : > { %v4888_v38 = vpack.c.bf16 %v2075_v29, %v2073_v23  ;;  %v2122_v48 = vpop.permute.xlu1 %2121  ;;  %v2148_v53 = vpop.permute.xlu0 %2147  ;;  %v4886_v7 = vpack.c.bf16 %v2076_v17, %v2074_v35  ;;  %5358 = vset.pattern.permute.xlu1 %v5606_v44  ;;  %5359 = vset.pattern.permute.xlu0 %v5606_v44 }
 0x44a   : > { %v4900_v55 = vpack.c.bf16 %v2135_v56, %v2133_v9  ;;  %v2127_v23 = vsel %vm1600_vm2, %v2114_v50, %v2122_v48 }
 0x44b   : > { %4887 = vmatprep.subr.bf16.mxu1 %v4886_v7  ;;  %v2137_v7 = vmul.f32 %v2127_v23, %v9181_v30 }
 0x44c   : > { %4889 = vmatpush1.bf16.msra.mxu1 %v4888_v38 }
 0x44d   : > { %v2146_v4 = vpop.permute.xlu1 %2145  ;;  %v2092_v37 = vpop.permute.xlu0 %2091  ;;  %4891 = vmatprep.subr.bf16.mxu1 %v4890_v1  ;;  %v9182_v1 = vmov 0.0  }
 0x44e   : > { %v2096_v3 = vsel %vm1559_vm15, %v6954_v61, %v2092_v37  ;;  %v2100_v19 = vsel %vm1559_vm15, %v2092_v37, %v6954_v61  ;;  %v2131_v61 = vsel %vm1600_vm2, %v2122_v48, %v2114_v50  ;;  %v4618_v37 = vld [vmem:[%s9097_s7 + $0xa8] sm:$0xff] }
 0x44f   : > { %v2107_v6 = vmul.f32 %v2096_v3, %v9178_v28  ;;  %v2108_v54 = vmul.f32 %v2100_v19, %v9176_v18  ;;  %v2138_v35 = vmul.f32 %v2131_v61, %v9180_v59  ;;  %v9183_v3 = vld [vmem:[#allocation24_spill] sm:$0xff]  ;;  %v9184_v19 = vld [vmem:[#allocation25_spill] sm:$0xff] }
 0x450   : > { %4893 = vmatpush1.bf16.msra.mxu1 %v4892_v22  ;;  %v4616_v22 = vld [vmem:[%s9097_s7 + $0x98] sm:$0xff]  ;;  %2526 = vperm.xlu1 %5358, %v9183_v3  }
 0x451   : > { %v4896_v47 = vpack.c.bf16 %v2107_v6, %v2105_v57  ;;  %v2154_v32 = vpop.permute.xlu1 %2153  ;;  %v2124_v11 = vpop.permute.xlu0 %2123  ;;  %v4894_v45 = vpack.c.bf16 %v2108_v54, %v2106_v8  ;;  %v4620_v57 = vld [vmem:[%s9097_s7 + $0xb8] sm:$0xff]  ;;  %2530 = vperm.xlu0 %5359, %v9184_v19   ;;  %v5607_v8 = vmov 7   ;;  %v9186_v6 = vld [vmem:[#allocation27_spill] sm:$0xff] }
 0x452   : > { %v2132_v63 = vsel %vm1600_vm2, %v2124_v11, %v7081_v14  ;;  %v2159_v52 = vsel %vm1641_vm3, %v2146_v4, %v2154_v32  ;;  %v2128_v0 = vsel %vm1600_vm2, %v7081_v14, %v2124_v11  ;;  %v2163_v2 = vsel %vm1641_vm3, %v2154_v32, %v2146_v4  ;;  %v4619_v4 = vld [vmem:[%s9097_s7 + $0xb0] sm:$0xff] }
 0x453   : > { %v2140_v25 = vmul.f32 %v2132_v63, %v9180_v59  ;;  %4895 = vmatprep.subr.bf16.mxu1 %v4894_v45  ;;  %v2169_v17 = vmul.f32 %v6623_v31, %v2159_v52  ;;  %v2139_v14 = vmul.f32 %v2128_v0, %v9181_v30  ;;  %v2170_v12 = vmul.f32 %v6625_v24, %v2163_v2 }
 0x454   : > { %4897 = vmatpush1.bf16.msra.mxu1 %v4896_v47  ;;  %5360 = vset.pattern.permute.xlu1 %v5607_v8 }
 0x455   : > { %v2156_v29 = vpop.permute.xlu0 %2155  ;;  %4899 = vmatprep.subr.bf16.mxu1 %v4898_v5  ;;  %v4902_v48 = vpack.c.bf16 %v2140_v25, %v2138_v35  ;;  %v4904_v36 = vpack.c.bf16 %v2139_v14, %v2137_v7  ;;  %2534 = vperm.xlu0 %5359, %v9185_v40  }
 0x456   : > { %v2160_v33 = vsel %vm1641_vm3, %v2148_v53, %v2156_v29  ;;  %v2164_v62 = vsel %vm1641_vm3, %v2156_v29, %v2148_v53  ;;  %v4609_v53 = vld [vmem:[%s9097_s7 + $0x60] sm:$0xff]  ;;  %2550 = vperm.xlu1 %5360, %v9183_v3  }
 0x457   : > { %v2171_v38 = vmul.f32 %v6623_v31, %v2160_v33  ;;  %v2172_v50 = vmul.f32 %v6625_v24, %v2164_v62  ;;  %v4611_v31 = vld [vmem:[%s9097_s7 + $0x70] sm:$0xff]  ;;  %v4613_v24 = vld [vmem:[%s9097_s7 + $0x80] sm:$0xff] }
 0x458   : > { %4901 = vmatpush1.bf16.msra.mxu1 %v4900_v55 }
 0x459   : > { %v4912_v21 = vpack.c.bf16 %v2171_v38, %v2169_v17  ;;  %4903 = vmatprep.subr.bf16.mxu1 %v4902_v48  ;;  %v4910_v10 = vpack.c.bf16 %v2172_v50, %v2170_v12  ;;  %5362 = vset.pattern.permute.xlu0 %v5607_v8 }
 0x45a   : > { %2554 = vperm.xlu1 %5360, %v9184_v19   ;;  %2558 = vperm.xlu0 %5362, %v9185_v40  }
 0x45b   : > { %4911 = vmatprep.subr.bf16.mxu0 %v4910_v10 }
 0x45c   : > { %4905 = vmatpush1.bf16.msra.mxu1 %v4904_v36  ;;  %4913 = vmatpush1.bf16.msra.mxu0 %v4912_v21 }
 0x45e   : > { %5361 = vset.pattern.permute.xlu1 %v5606_v44 }
 0x45f   : > { %2250 = vmatmul.mubr.f32.vlgmr.msra.gmra.mrb[14].mxu1 %v4609_v53  ;;  %4621 = vmatmul.mubr.msk.f32.vlgmr.msra.gmra.mrb[14].mxu0 %vm1134_vm1, %v4611_v31 }
 0x460   : > { %2255 = vmatprep.mubr.f32.mxu1 %v4613_v24  ;;  %2344 = vmatprep.mubr.f32.mxu0 %v9182_v1 }
 0x461   : > { %2538 = vperm.xlu1 %5361, %v9186_v6  }
 0x462   : > { %v2365_v54 = vpop.permute.xlu1 %2364 }
 0x463   : > { %2256 = vmatmul.mubr.f32.gmra.mrb[16].mxu1 %v4612_v51  ;;  %4622 = vmatmul.mubr.msk.f32.gmra.mrb[16].mxu0 %vm1134_vm1, %v4614_v58 }
 0x464   : > { %2261 = vmatprep.mubr.f32.mxu1 %v4616_v22  ;;  %2350 = vmatprep.mubr.f32.mxu0 %v9182_v1 }
 0x465   : > { %5363 = vset.pattern.permute.xlu1 %v5607_v8 }
 0x466   : > { %2562 = vperm.xlu1 %5363, %v9186_v6   ;;  %v2369_v9 = vpop.permute.xlu0 %2368 }
 0x467   : > { %2262 = vmatmul.mubr.f32.gmra.mrb[18].mxu1 %v4615_v49  ;;  %4623 = vmatmul.mubr.msk.f32.gmra.mrb[18].mxu0 %vm1134_vm1, %v4617_v46  ;;  %v2389_v16 = vpop.permute.xlu1 %2388 }
 0x468   : > { %2267 = vmatprep.mubr.f32.mxu1 %v4619_v4  ;;  %2356 = vmatprep.mubr.f32.mxu0 %v9182_v1 }
 0x46a   : > { %v2373_v0 = vpop.permute.xlu0 %2372 }
 0x46b   : > { %2268 = vmatmul.mubr.f32.gmra.mrb[20].mxu1 %v4618_v37  ;;  %4624 = vmatmul.mubr.msk.f32.gmra.mrb[20].mxu0 %vm1134_vm1, %v4620_v57  ;;  %v2393_v52 = vpop.permute.xlu1 %2392 }
 0x46c   : > { %2500 = vmatprep.mubr.f32.mxu1 %v9182_v1 }
 0x46f   : > { %v2397_v58 = vpop.permute.xlu0 %2396 }
 0x470   : > { %v2377_v33 = vpop.permute.xlu1 %2376 }
 0x532   : > { %v2251_v47 = vpop.f32.mrb[14].mxu1  ;;  %v2340_v32 = vpop.f32.mrb[14].mxu0 }
 0x533   : > { %v2341_v11 = vadd.f32 %v2340_v32, %v2251_v47  ;;  %v2253_v45 = vpop.f32.mrb[15].mxu1  ;;  %v2342_v56 = vpop.f32.mrb[15].mxu0 }
 0x534   : > { %v2343_v61 = vadd.f32 %v2342_v56, %v2253_v45 }
 0x535   : > { %v2379_v63 = vmul.f32 %v2365_v54, %v2341_v11 }
 0x536   : > { %v2380_v25 = vmul.f32 %v2365_v54, %v2343_v61  ;;  %v2257_v5 = vpop.f32.mrb[16].mxu1  ;;  %v2346_v2 = vpop.f32.mrb[16].mxu0 }
 0x537   : > { %v2347_v55 = vadd.f32 %v2346_v2, %v2257_v5  ;;  %v2259_v23 = vpop.f32.mrb[17].mxu1  ;;  %v2348_v35 = vpop.f32.mrb[17].mxu0  ;;  %v2403_v17 = vadd.f32 %v2389_v16, %v2379_v63 }
 0x538   : > { %v2349_v29 = vadd.f32 %v2348_v35, %v2259_v23  ;;  %v2404_v62 = vadd.f32 %v2389_v16, %v2380_v25  ;;  %v2420_v23 = vld [vmem:[#allocation6 + $0x20] sm:$0xff]  ;;  %v2421_v35 = vld [vmem:[#allocation6 + $0x28] sm:$0xff] }
 0x539   : > { %v2381_v14 = vmul.f32 %v2369_v9, %v2347_v55  ;;  %v2411_v31 = vmax.f32 %v2403_v17, 0.0  ;;  %v2423_v17 = vld [vmem:[#allocation6 + $0x38] sm:$0xff] }
 0x53a   : > { %v2382_v12 = vmul.f32 %v2369_v9, %v2349_v29  ;;  %v2263_v38 = vpop.f32.mrb[18].mxu1  ;;  %v2352_v50 = vpop.f32.mrb[18].mxu0  ;;  %v2412_v22 = vmax.f32 %v2404_v62, 0.0  ;;  %v2422_v29 = vld [vmem:[#allocation6 + $0x30] sm:$0xff] }
 0x53b   : > { %v2405_v48 = vadd.f32 %v2393_v52, %v2381_v14  ;;  %v2353_v7 = vadd.f32 %v2352_v50, %v2263_v38  ;;  %v2265_v21 = vpop.f32.mrb[19].mxu1  ;;  %v2354_v10 = vpop.f32.mrb[19].mxu0 }
 0x53c   : > { %v2406_v36 = vadd.f32 %v2393_v52, %v2382_v12  ;;  %v2355_v53 = vadd.f32 %v2354_v10, %v2265_v21  ;;  %v2401_v9 = vpop.permute.xlu1 %2400 }
 0x53d   : > { %v2413_v24 = vmax.f32 %v2405_v48, 0.0  ;;  %v2383_v51 = vmul.f32 %v2373_v0, %v2353_v7  ;;  %v2531_v48 = vpop.permute.xlu0 %2530 }
 0x53e   : > { %v2414_v49 = vmax.f32 %v2406_v36, 0.0  ;;  %v2384_v46 = vmul.f32 %v2373_v0, %v2355_v53  ;;  %v2358_v4 = vpop.f32.mrb[20].mxu0  ;;  %v2269_v37 = vpop.f32.mrb[20].mxu1 }
 0x53f   : > { %v4916_v57 = vpack.c.bf16 %v2413_v24, %v2411_v31  ;;  %v2359_v44 = vadd.f32 %v2358_v4, %v2269_v37  ;;  %v2271_v8 = vpop.f32.mrb[21].mxu1  ;;  %v2360_v54 = vpop.f32.mrb[21].mxu0  ;;  %v2407_v32 = vadd.f32 %v2397_v58, %v2383_v51 }
 0x540   : > { %v2361_v16 = vadd.f32 %v2360_v54, %v2271_v8  ;;  %v4914_v47 = vpack.c.bf16 %v2414_v49, %v2412_v22  ;;  %v2408_v45 = vadd.f32 %v2397_v58, %v2384_v46  ;;  %v2527_v14 = vpop.permute.xlu1 %2526 }
 0x541   : > { %v2385_v11 = vmul.f32 %v2377_v33, %v2359_v44  ;;  %v2415_v52 = vmax.f32 %v2407_v32, 0.0  ;;  %v2535_v37 = vpop.permute.xlu0 %2534 }
 0x542   : > { %v2386_v56 = vmul.f32 %v2377_v33, %v2361_v16  ;;  %4915 = vmatprep.subr.bf16.mxu1 %v4914_v47  ;;  %v2416_v0 = vmax.f32 %v2408_v45, 0.0 }
 0x543   : > { %v2409_v61 = vadd.f32 %v2401_v9, %v2385_v11  ;;  %4917 = vmatpush1.bf16.msra.mxu1 %v4916_v57 }
 0x544   : > { %v2410_v63 = vadd.f32 %v2401_v9, %v2386_v56  ;;  %v2551_v33 = vpop.permute.xlu1 %2550 }
 0x545   : > { %v2417_v25 = vmax.f32 %v2409_v61, 0.0  ;;  %v2559_v8 = vpop.permute.xlu0 %2558  ;;  %v4630_v61 = vld [vmem:[%s9097_s7 + $0xc8] sm:$0xff] }
 0x546   : > { %v2418_v5 = vmax.f32 %v2410_v63, 0.0  ;;  %2918 = vmatprep.mubr.f32.mxu0 %v4630_v61 }
 0x547   : > { %v4920_v2 = vpack.c.bf16 %v2417_v25, %v2415_v52 }
 0x548   : > { %v4918_v55 = vpack.c.bf16 %v2418_v5, %v2416_v0  ;;  %v2555_v36 = vpop.permute.xlu1 %2554 }
 0x54a   : > { %4919 = vmatprep.subr.bf16.mxu1 %v4918_v55 }
 0x54b   : > { %4921 = vmatpush1.bf16.msra.mxu1 %v4920_v2 }
 0x54c   : > { %v2539_v57 = vpop.permute.xlu1 %2538 }
 0x54e   : > { %4625 = vmatmul.mubr.msk.f32.vlgmr.msra.gmra.mrb[22].mxu1 %vm1134_vm1, %v2420_v23 }
 0x54f   : > { %2506 = vmatprep.mubr.f32.mxu1 %v9182_v1 }
 0x550   : > { %v2563_v9 = vpop.permute.xlu1 %2562 }
 0x552   : > { %4626 = vmatmul.mubr.msk.f32.gmra.mrb[24].mxu1 %vm1134_vm1, %v2421_v35 }
 0x553   : > { %2512 = vmatprep.mubr.f32.mxu1 %v9182_v1 }
 0x556   : > { %4627 = vmatmul.mubr.msk.f32.gmra.mrb[26].mxu1 %vm1134_vm1, %v2422_v29 }
 0x557   : > { %2518 = vmatprep.mubr.f32.mxu1 %v9182_v1 }
 0x55a   : > { %4628 = vmatmul.mubr.msk.f32.gmra.mrb[28].mxu1 %vm1134_vm1, %v2423_v17 }
 0x621   : > { %v2502_v62 = vpop.f32.mrb[22].mxu1 }
 0x622   : > { %v2541_v12 = vmul.f32 %v2527_v14, %v2502_v62  ;;  %v2504_v38 = vpop.f32.mrb[23].mxu1  ;;  %v5608_v62 = vmov 8  }
 0x623   : > { %v2542_v22 = vmul.f32 %v2527_v14, %v2504_v38  ;;  %5364 = vset.pattern.permute.xlu1 %v5608_v62  ;;  %5365 = vset.pattern.permute.xlu0 %v5608_v62 }
 0x624   : > { %v7251_v50 = vadd.f32 %v2551_v33, %v2541_v12 }
 0x625   : > { %v2508_v7 = vpop.f32.mrb[24].mxu1  ;;  %v7273_v49 = vadd.f32 %v2551_v33, %v2542_v22  ;;  %v7434_v22 = vld [vmem:[%s9099_s9] sm:$0xff] }
 0x626   : > { %v2543_v21 = vmul.f32 %v2531_v48, %v2508_v7  ;;  %2586 = vrot.lane.b32.xlu1 %v7251_v50, %s5594_s21  ;;  %v2510_v10 = vpop.f32.mrb[25].mxu1 }
 0x627   : > { %v2544_v46 = vmul.f32 %v2531_v48, %v2510_v10 }
 0x628   : > { %v7255_v53 = vadd.f32 %v2555_v36, %v2543_v21 }
 0x629   : > { %v2514_v31 = vpop.f32.mrb[26].mxu1  ;;  %v7279_v4 = vadd.f32 %v2555_v36, %v2544_v46 }
 0x62a   : > { %2618 = vrot.lane.b32.xlu1 %v7251_v50, %s5595_s23  ;;  %2588 = vrot.lane.b32.xlu0 %v7255_v53, %s5594_s21  ;;  %v2516_v24 = vpop.f32.mrb[27].mxu1  ;;  %v2545_v44 = vmul.f32 %v2535_v37, %v2514_v31 }
 0x62b   : > { %v2546_v32 = vmul.f32 %v2535_v37, %v2516_v24 }
 0x62c   : > { %v7293_v54 = vadd.f32 %v2559_v8, %v2545_v44 }
 0x62d   : > { %v2520_v51 = vpop.f32.mrb[28].mxu1  ;;  %v7313_v11 = vadd.f32 %v2559_v8, %v2546_v32 }
 0x62e   : > { %2650 = vrot.lane.b32.xlu1 %v7251_v50, %s5596_s24  ;;  %2620 = vrot.lane.b32.xlu0 %v7255_v53, %s5595_s23  ;;  %v2522_v58 = vpop.f32.mrb[29].mxu1  ;;  %v2547_v16 = vmul.f32 %v2539_v57, %v2520_v51 }
 0x62f   : > { %v2548_v45 = vmul.f32 %v2539_v57, %v2522_v58  ;;  %v7442_v57 = vld [vmem:[%s9099_s9 + $0x8] sm:$0xff] }
 0x630   : > { %v7299_v47 = vadd.f32 %v2563_v9, %v2547_v16 }
 0x631   : > { %v7319_v56 = vadd.f32 %v2563_v9, %v2548_v45 }
 0x632   : > { %2682 = vrot.lane.b32.xlu1 %v7251_v50, %s5597_s25  ;;  %2652 = vrot.lane.b32.xlu0 %v7255_v53, %s5596_s24 }
 0x636   : > { %2714 = vrot.lane.b32.xlu1 %v7251_v50, %s5598_s26  ;;  %2684 = vrot.lane.b32.xlu0 %v7255_v53, %s5597_s25 }
 0x63a   : > { %2594 = vrot.lane.b32.xlu1 %v7273_v49, %s5594_s21  ;;  %2716 = vrot.lane.b32.xlu0 %v7255_v53, %s5598_s26 }
 0x63e   : > { %2626 = vrot.lane.b32.xlu1 %v7273_v49, %s5595_s23  ;;  %2596 = vrot.lane.b32.xlu0 %v7279_v4, %s5594_s21 }
 0x642   : > { %2658 = vrot.lane.b32.xlu1 %v7273_v49, %s5596_s24  ;;  %2628 = vrot.lane.b32.xlu0 %v7279_v4, %s5595_s23 }
 0x646   : > { %2690 = vrot.lane.b32.xlu1 %v7273_v49, %s5597_s25  ;;  %2660 = vrot.lane.b32.xlu0 %v7279_v4, %s5596_s24 }
 0x64a   : > { %2692 = vrot.lane.b32.xlu0 %v7279_v4, %s5597_s25  ;;  %2590 = vrot.lane.b32.xlu1 %v7293_v54, %s5594_s21 }
 0x64e   : > { %2622 = vrot.lane.b32.xlu1 %v7293_v54, %s5595_s23  ;;  %2592 = vrot.lane.b32.xlu0 %v7299_v47, %s5594_s21 }
 0x652   : > { %2654 = vrot.lane.b32.xlu1 %v7293_v54, %s5596_s24  ;;  %2624 = vrot.lane.b32.xlu0 %v7299_v47, %s5595_s23 }
 0x656   : > { %2686 = vrot.lane.b32.xlu1 %v7293_v54, %s5597_s25  ;;  %2656 = vrot.lane.b32.xlu0 %v7299_v47, %s5596_s24 }
 0x65a   : > { %2598 = vrot.lane.b32.xlu1 %v7313_v11, %s5594_s21  ;;  %2688 = vrot.lane.b32.xlu0 %v7299_v47, %s5597_s25 }
 0x65e   : > { %2722 = vrot.lane.b32.xlu1 %v7273_v49, %s5598_s26  ;;  %2600 = vrot.lane.b32.xlu0 %v7319_v56, %s5594_s21 }
 0x662   : > { %2630 = vrot.lane.b32.xlu1 %v7313_v11, %s5595_s23  ;;  %2724 = vrot.lane.b32.xlu0 %v7279_v4, %s5598_s26 }
 0x666   : > { %2662 = vrot.lane.b32.xlu1 %v7313_v11, %s5596_s24  ;;  %2632 = vrot.lane.b32.xlu0 %v7319_v56, %s5595_s23 }
 0x66a   : > { %2694 = vrot.lane.b32.xlu1 %v7313_v11, %s5597_s25  ;;  %2720 = vrot.lane.b32.xlu0 %v7299_v47, %s5598_s26 }
 0x66e   : > { %2718 = vrot.lane.b32.xlu1 %v7293_v54, %s5598_s26  ;;  %2664 = vrot.lane.b32.xlu0 %v7319_v56, %s5596_s24 }
 0x672   : > { %2726 = vrot.lane.b32.xlu1 %v7313_v11, %s5598_s26  ;;  %2748 = vrot.lane.b32.xlu0 %v7255_v53, %s5599_s27 }
 0x676   : > { %2746 = vrot.lane.b32.xlu1 %v7251_v50, %s5599_s27  ;;  %2696 = vrot.lane.b32.xlu0 %v7319_v56, %s5597_s25 }
 0x67a   : > { %2754 = vrot.lane.b32.xlu1 %v7273_v49, %s5599_s27  ;;  %2756 = vrot.lane.b32.xlu0 %v7279_v4, %s5599_s27 }
 0x67e   : > { %2750 = vrot.lane.b32.xlu1 %v7293_v54, %s5599_s27  ;;  %2752 = vrot.lane.b32.xlu0 %v7299_v47, %s5599_s27 }
 0x682   : > { %2758 = vrot.lane.b32.xlu1 %v7313_v11, %s5599_s27  ;;  %2780 = vrot.lane.b32.xlu0 %v7255_v53, %s5600_s29 }
 0x686   : > { %2778 = vrot.lane.b32.xlu1 %v7251_v50, %s5600_s29  ;;  %2728 = vrot.lane.b32.xlu0 %v7319_v56, %s5598_s26 }
 0x68a   : > { %2786 = vrot.lane.b32.xlu1 %v7273_v49, %s5600_s29  ;;  %2788 = vrot.lane.b32.xlu0 %v7279_v4, %s5600_s29 }
 0x68e   : > { %2782 = vrot.lane.b32.xlu1 %v7293_v54, %s5600_s29  ;;  %2760 = vrot.lane.b32.xlu0 %v7319_v56, %s5599_s27 }
 0x692   : > { %2790 = vrot.lane.b32.xlu1 %v7313_v11, %s5600_s29  ;;  %2784 = vrot.lane.b32.xlu0 %v7299_v47, %s5600_s29 }
 0x696   : > { %2810 = vrot.lane.b32.xlu1 %v7251_v50, %s5601_s19  ;;  %2792 = vrot.lane.b32.xlu0 %v7319_v56, %s5600_s29 }
 0x698   : > { %v2587_v63 = vpop.permute.xlu1 %2586 }
 0x69a   : > { %2818 = vrot.lane.b32.xlu1 %v7273_v49, %s5601_s19  ;;  %2812 = vrot.lane.b32.xlu0 %v7255_v53, %s5601_s19 }
 0x69c   : > { %v7388_v52 = vpop.permute.xlu1 %2618  ;;  %v2589_v25 = vpop.permute.xlu0 %2588 }
 0x69e   : > { %2814 = vrot.lane.b32.xlu1 %v7293_v54, %s5601_s19  ;;  %2820 = vrot.lane.b32.xlu0 %v7279_v4, %s5601_s19 }
 0x6a0   : > { %v7394_v0 = vpop.permute.xlu1 %2650  ;;  %v7396_v5 = vpop.permute.xlu0 %2620 }
 0x6a2   : > { %2822 = vrot.lane.b32.xlu1 %v7313_v11, %s5601_s19  ;;  %2816 = vrot.lane.b32.xlu0 %v7299_v47, %s5601_s19 }
 0x6a4   : > { %v7402_v2 = vpop.permute.xlu1 %2682  ;;  %v7404_v55 = vpop.permute.xlu0 %2652 }
 0x6a6   : > { %2824 = vrot.lane.b32.xlu0 %v7319_v56, %s5601_s19  ;;  %3033 = vperm.xlu1 %5364, %v9183_v3  }
 0x6a8   : > { %v7408_v23 = vpop.permute.xlu1 %2714  ;;  %v7410_v35 = vpop.permute.xlu0 %2684 }
 0x6aa   : > { %3037 = vperm.xlu0 %5365, %v9184_v19   ;;  %v5609_v19 = vmov 9  }
 0x6ab   : > { %5366 = vset.pattern.permute.xlu1 %v5609_v19 }
 0x6ac   : > { %v2595_v29 = vpop.permute.xlu1 %2594  ;;  %v7412_v17 = vpop.permute.xlu0 %2716  ;;  %3057 = vperm.xlu1 %5366, %v7434_v22  }
 0x6ad   : > { %v2602_v14 = vsel %vm1354_vm10, %v2587_v63, %v2595_v29  ;;  %v2606_v33 = vsel %vm1354_vm10, %v2595_v29, %v2587_v63 }
 0x6ae   : > { %v2610_v21 = vmul.f32 %v2606_v33, %v6316_v13  ;;  %v2611_v10 = vmul.f32 %v2602_v14, %v6320_v26  ;;  %3041 = vperm.xlu0 %5365, %v9185_v40  }
 0x6b0   : > { %v2627_v12 = vpop.permute.xlu1 %2626  ;;  %v2597_v38 = vpop.permute.xlu0 %2596  ;;  %3061 = vperm.xlu1 %5366, %v7442_v57  }
 0x6b1   : > { %v2603_v48 = vsel %vm1354_vm10, %v2589_v25, %v2597_v38  ;;  %v2607_v7 = vsel %vm1354_vm10, %v2597_v38, %v2589_v25 }
 0x6b2   : > { %v2612_v36 = vmul.f32 %v2607_v7, %v6316_v13  ;;  %v2613_v31 = vmul.f32 %v2603_v48, %v6320_v26  ;;  %5368 = vset.pattern.permute.xlu0 %v5609_v19 }
 0x6b3   : > { %3065 = vperm.xlu0 %5368, %v9185_v40  }
 0x6b4   : > { %v4924_v24 = vpack.c.bf16 %v2612_v36, %v2610_v21  ;;  %v7428_v51 = vpop.permute.xlu1 %2658  ;;  %v2629_v3 = vpop.permute.xlu0 %2628  ;;  %v4922_v58 = vpack.c.bf16 %v2613_v31, %v2611_v10  ;;  %5367 = vset.pattern.permute.xlu1 %v5608_v62 }
 0x6b5   : > { %3045 = vperm.xlu1 %5367, %v9186_v6   ;;  %v2635_v40 = vsel %vm1395_vm11, %v7396_v5, %v2629_v3  ;;  %v2639_v48 = vsel %vm1395_vm11, %v2629_v3, %v7396_v5  ;;  %v2638_v5 = vsel %vm1395_vm11, %v2627_v12, %v7388_v52 }
 0x6b6   : > { %4923 = vmatprep.subr.bf16.mxu0 %v4922_v58  ;;  %v2645_v7 = vmul.f32 %v2635_v40, %v6362_v34 }
 0x6b7   : > { %4925 = vmatpush1.bf16.msra.mxu0 %v4924_v24 }
 0x6b8   : > { %v7437_v46 = vpop.permute.xlu1 %2690  ;;  %v2661_v37 = vpop.permute.xlu0 %2660 }
 0x6b9   : > { %5369 = vset.pattern.permute.xlu1 %v5609_v19  ;;  %v2644_v19 = vmul.f32 %v2639_v48, %v6369_v27 }
 0x6ba   : > { %3069 = vperm.xlu1 %5369, %v9186_v6   ;;  %v2634_v6 = vsel %vm1395_vm11, %v7388_v52, %v2627_v12 }
 0x6bb   : > { %v2643_v3 = vmul.f32 %v2634_v6, %v6362_v34  ;;  %v2666_v6 = vsel %vm1436_vm12, %v7394_v0, %v7428_v51 }
 0x6bc   : > { %v7446_v44 = vpop.permute.xlu0 %2692  ;;  %v2591_v8 = vpop.permute.xlu1 %2590 }
 0x6c0   : > { %v2623_v16 = vpop.permute.xlu1 %2622  ;;  %v2593_v9 = vpop.permute.xlu0 %2592 }
 0x6c4   : > { %v2655_v32 = vpop.permute.xlu1 %2654  ;;  %v2625_v45 = vpop.permute.xlu0 %2624 }
 0x6c8   : > { %v7450_v61 = vpop.permute.xlu1 %2686  ;;  %v7452_v63 = vpop.permute.xlu0 %2656 }
 0x6cc   : > { %v2599_v25 = vpop.permute.xlu1 %2598  ;;  %v7454_v29 = vpop.permute.xlu0 %2688 }
 0x6cd   : > { %v2604_v14 = vsel %vm1354_vm10, %v2591_v8, %v2599_v25  ;;  %v2608_v33 = vsel %vm1354_vm10, %v2599_v25, %v2591_v8 }
 0x6ce   : > { %v2614_v36 = vmul.f32 %v2608_v33, %v6316_v13  ;;  %v2615_v31 = vmul.f32 %v2604_v14, %v6320_v26  ;;  %v2642_v33 = vmul.f32 %v2638_v5, %v6369_v27  ;;  %v2667_v14 = vsel %vm1436_vm12, %v7404_v55, %v2661_v37 }
 0x6d0   : > { %v7466_v62 = vpop.permute.xlu1 %2722  ;;  %v2601_v38 = vpop.permute.xlu0 %2600  ;;  %v4932_v48 = vpack.c.bf16 %v2644_v19, %v2642_v33 }
 0x6d1   : > { %v2605_v21 = vsel %vm1354_vm10, %v2593_v9, %v2601_v38  ;;  %v2609_v10 = vsel %vm1354_vm10, %v2601_v38, %v2593_v9  ;;  %v4930_v38 = vpack.c.bf16 %v2645_v7, %v2643_v3  ;;  %v2671_v7 = vsel %vm1436_vm12, %v2661_v37, %v7404_v55 }
 0x6d2   : > { %v2616_v24 = vmul.f32 %v2609_v10, %v6316_v13  ;;  %v2617_v58 = vmul.f32 %v2605_v21, %v6320_v26  ;;  %v2670_v55 = vsel %vm1436_vm12, %v7428_v51, %v7394_v0  ;;  %v2675_v37 = vmul.f32 %v2666_v6, %v6402_v15 }
 0x6d3   : > { %v2676_v19 = vmul.f32 %v2671_v7, %v6409_v42  ;;  %v2674_v33 = vmul.f32 %v2670_v55, %v6409_v42 }
 0x6d4   : > { %v4928_v8 = vpack.c.bf16 %v2616_v24, %v2614_v36  ;;  %v2631_v25 = vpop.permute.xlu1 %2630  ;;  %v7485_v40 = vpop.permute.xlu0 %2724  ;;  %v4926_v9 = vpack.c.bf16 %v2617_v58, %v2615_v31  ;;  %v2677_v36 = vmul.f32 %v2667_v14, %v6402_v15  ;;  %v2699_v14 = vsel %vm1477_vm13, %v7410_v35, %v7446_v44 }
 0x6d5   : > { %v2636_v52 = vsel %vm1395_vm11, %v2623_v16, %v2631_v25  ;;  %v2640_v12 = vsel %vm1395_vm11, %v2631_v25, %v2623_v16  ;;  %v2709_v7 = vmul.f32 %v2699_v14, %v6443_v43 }
 0x6d6   : > { %4927 = vmatprep.subr.bf16.mxu0 %v4926_v9  ;;  %v2646_v24 = vmul.f32 %v2640_v12, %v6369_v27  ;;  %v2647_v58 = vmul.f32 %v2636_v52, %v6362_v34  ;;  %v2698_v52 = vsel %vm1477_vm13, %v7402_v2, %v7437_v46  ;;  %v4940_v12 = vpack.c.bf16 %v2676_v19, %v2674_v33 }
 0x6d7   : > { %4929 = vmatpush1.bf16.msra.mxu0 %v4928_v8 }
 0x6d8   : > { %v2663_v21 = vpop.permute.xlu1 %2662  ;;  %4931 = vmatprep.subr.bf16.mxu0 %v4930_v38  ;;  %v2633_v10 = vpop.permute.xlu0 %2632  ;;  %v4938_v38 = vpack.c.bf16 %v2677_v36, %v2675_v37 }
 0x6d9   : > { %v2637_v31 = vsel %vm1395_vm11, %v2625_v45, %v2633_v10  ;;  %v2641_v16 = vsel %vm1395_vm11, %v2633_v10, %v2625_v45  ;;  %v2668_v0 = vsel %vm1436_vm12, %v2655_v32, %v2663_v21  ;;  %v2672_v51 = vsel %vm1436_vm12, %v2663_v21, %v2655_v32 }
 0x6da   : > { %v2648_v5 = vmul.f32 %v2641_v16, %v6369_v27  ;;  %v2649_v3 = vmul.f32 %v2637_v31, %v6362_v34  ;;  %v2703_v10 = vsel %vm1477_vm13, %v7446_v44, %v7410_v35  ;;  %v2678_v36 = vmul.f32 %v2672_v51, %v6409_v42 }
 0x6db   : > { %4933 = vmatpush1.bf16.msra.mxu0 %v4932_v48  ;;  %v2679_v31 = vmul.f32 %v2668_v0, %v6402_v15  ;;  %v2702_v35 = vsel %vm1477_vm13, %v7437_v46, %v7402_v2  ;;  %v2707_v44 = vmul.f32 %v2698_v52, %v6443_v43  ;;  %v2708_v55 = vmul.f32 %v2703_v10, %v6473_v20 }
 0x6dc   : > { %v4936_v8 = vpack.c.bf16 %v2648_v5, %v2646_v24  ;;  %v2695_v45 = vpop.permute.xlu1 %2694  ;;  %v7517_v25 = vpop.permute.xlu0 %2720  ;;  %v4934_v9 = vpack.c.bf16 %v2649_v3, %v2647_v58  ;;  %v2706_v19 = vmul.f32 %v2702_v35, %v6473_v20 }
 0x6dd   : > { %v4946_v37 = vpack.c.bf16 %v2709_v7, %v2707_v44  ;;  %v2704_v2 = vsel %vm1477_vm13, %v2695_v45, %v7450_v61  ;;  %v4954_v7 = vpack.c.bf16 %v7279_v4, %v7273_v49  ;;  %v4956_v49 = vpack.c.bf16 %v7255_v53, %v7251_v50 }
 0x6de   : > { %4935 = vmatprep.subr.bf16.mxu0 %v4934_v9  ;;  %v4948_v33 = vpack.c.bf16 %v2708_v55, %v2706_v19  ;;  %v2710_v0 = vmul.f32 %v2704_v2, %v6473_v20 }
 0x6df   : > { %4937 = vmatpush1.bf16.msra.mxu0 %v4936_v8  ;;  %v2700_v8 = vsel %vm1477_vm13, %v7450_v61, %v2695_v45 }
 0x6e0   : > { %v2719_v6 = vpop.permute.xlu1 %2718  ;;  %4939 = vmatprep.subr.bf16.mxu0 %v4938_v38  ;;  %v2665_v48 = vpop.permute.xlu0 %2664  ;;  %v2711_v51 = vmul.f32 %v2700_v8, %v6443_v43 }
 0x6e1   : > { %v2669_v32 = vsel %vm1436_vm12, %v7452_v63, %v2665_v48  ;;  %v2673_v21 = vsel %vm1436_vm12, %v2665_v48, %v7452_v63 }
 0x6e2   : > { %v2680_v16 = vmul.f32 %v2673_v21, %v6409_v42  ;;  %v2681_v24 = vmul.f32 %v2669_v32, %v6402_v15 }
 0x6e3   : > { %4941 = vmatpush1.bf16.msra.mxu0 %v4940_v12 }
 0x6e4   : > { %v4944_v58 = vpack.c.bf16 %v2680_v16, %v2678_v36  ;;  %v2727_v5 = vpop.permute.xlu1 %2726  ;;  %v2749_v3 = vpop.permute.xlu0 %2748  ;;  %v4942_v63 = vpack.c.bf16 %v2681_v24, %v2679_v31  ;;  %v2734_v36 = vsel %vm1518_vm14, %v7466_v62, %v7408_v23  ;;  %v2731_v31 = vsel %vm1518_vm14, %v7412_v17, %v7485_v40 }
 0x6e5   : > { %v4958_v16 = vpack.c.bf16 %v7319_v56, %v7313_v11  ;;  %v2730_v24 = vsel %vm1518_vm14, %v7408_v23, %v7466_v62  ;;  %v2739_v35 = vmul.f32 %v2734_v36, %v6509_v41  ;;  %v2740_v44 = vmul.f32 %v2731_v31, %v6524_v60 }
 0x6e6   : > { %4943 = vmatprep.subr.bf16.mxu0 %v4942_v63  ;;  %v2732_v50 = vsel %vm1518_vm14, %v2719_v6, %v2727_v5  ;;  %v2736_v53 = vsel %vm1518_vm14, %v2727_v5, %v2719_v6  ;;  %v4960_v11 = vpack.c.bf16 %v7299_v47, %v7293_v54  ;;  %v2738_v56 = vmul.f32 %v2730_v24, %v6524_v60 }
 0x6e7   : > { %4945 = vmatpush1.bf16.msra.mxu0 %v4944_v58  ;;  %v2742_v55 = vmul.f32 %v2732_v50, %v6524_v60 }
 0x6e8   : > { %v2747_v46 = vpop.permute.xlu1 %2746  ;;  %4947 = vmatprep.subr.bf16.mxu0 %v4946_v37  ;;  %v2697_v9 = vpop.permute.xlu0 %2696  ;;  %v4964_v63 = vpack.c.bf16 %v2740_v44, %v2738_v56  ;;  %v2743_v37 = vmul.f32 %v2736_v53, %v6509_v41 }
 0x6e9   : > { %v2701_v14 = vsel %vm1477_vm13, %v7454_v29, %v2697_v9  ;;  %v2705_v38 = vsel %vm1477_vm13, %v2697_v9, %v7454_v29  ;;  %v2735_v29 = vsel %vm1518_vm14, %v7485_v40, %v7412_v17 }
 0x6ea   : > { %v2712_v52 = vmul.f32 %v2705_v38, %v6473_v20  ;;  %v2713_v61 = vmul.f32 %v2701_v14, %v6443_v43  ;;  %v2741_v4 = vmul.f32 %v2735_v29, %v6509_v41 }
 0x6eb   : > { %4949 = vmatpush1.bf16.msra.mxu0 %v4948_v33 }
 0x6ec   : > { %v4952_v45 = vpack.c.bf16 %v2712_v52, %v2710_v0  ;;  %v2755_v12 = vpop.permute.xlu1 %2754  ;;  %v2757_v48 = vpop.permute.xlu0 %2756  ;;  %v4950_v10 = vpack.c.bf16 %v2713_v61, %v2711_v51  ;;  %v4962_v23 = vpack.c.bf16 %v2741_v4, %v2739_v35 }
 0x6ed   : > { %v2766_v62 = vsel %vm1559_vm15, %v2755_v12, %v2747_v46  ;;  %v2767_v40 = vsel %vm1559_vm15, %v2757_v48, %v2749_v3  ;;  %v2762_v54 = vsel %vm1559_vm15, %v2747_v46, %v2755_v12  ;;  %v2763_v47 = vsel %vm1559_vm15, %v2749_v3, %v2757_v48 }
 0x6ee   : > { %4951 = vmatprep.subr.bf16.mxu0 %v4950_v10  ;;  %v2771_v2 = vmul.f32 %v2766_v62, %v9176_v18  ;;  %v2773_v9 = vmul.f32 %v2767_v40, %v9176_v18  ;;  %v2770_v46 = vmul.f32 %v2762_v54, %v9178_v28  ;;  %v2772_v3 = vmul.f32 %v2763_v47, %v9178_v28 }
 0x6ef   : > { %4953 = vmatpush1.bf16.msra.mxu0 %v4952_v45 }
 0x6f0   : > { %v2751_v32 = vpop.permute.xlu1 %2750  ;;  %4955 = vmatprep.subr.bf16.mxu0 %v4954_v7  ;;  %v2753_v21 = vpop.permute.xlu0 %2752  ;;  %v4970_v45 = vpack.c.bf16 %v2773_v9, %v2771_v2  ;;  %v4972_v10 = vpack.c.bf16 %v2772_v3, %v2770_v46 }
 0x6f3   : > { %4957 = vmatpush1.bf16.msra.mxu0 %v4956_v49 }
 0x6f4   : > { %v2759_v58 = vpop.permute.xlu1 %2758  ;;  %v2781_v17 = vpop.permute.xlu0 %2780  ;;  %4959 = vmatprep.subr.bf16.mxu0 %v4958_v16 }
 0x6f5   : > { %v2768_v61 = vsel %vm1559_vm15, %v2759_v58, %v2751_v32 }
 0x6f6   : > { %v2775_v29 = vmul.f32 %v2768_v61, %v9176_v18 }
 0x6f7   : > { %4961 = vmatpush1.bf16.msra.mxu0 %v4960_v11 }
 0x6f8   : > { %v2779_v19 = vpop.permute.xlu1 %2778  ;;  %v2729_v6 = vpop.permute.xlu0 %2728  ;;  %4963 = vmatprep.subr.bf16.mxu0 %v4962_v23 }
 0x6f9   : > { %v2733_v5 = vsel %vm1518_vm14, %v7517_v25, %v2729_v6  ;;  %v2737_v8 = vsel %vm1518_vm14, %v2729_v6, %v7517_v25  ;;  %v2764_v25 = vsel %vm1559_vm15, %v2751_v32, %v2759_v58 }
 0x6fa   : > { %v2744_v33 = vmul.f32 %v2733_v5, %v6524_v60  ;;  %v2745_v14 = vmul.f32 %v2737_v8, %v6509_v41  ;;  %v2774_v7 = vmul.f32 %v2764_v25, %v9178_v28 }
 0x6fb   : > { %4965 = vmatpush1.bf16.msra.mxu0 %v4964_v63 }
 0x6fc   : > { %v4968_v38 = vpack.c.bf16 %v2744_v33, %v2742_v55  ;;  %v2787_v0 = vpop.permute.xlu1 %2786  ;;  %v2789_v51 = vpop.permute.xlu0 %2788  ;;  %v4966_v52 = vpack.c.bf16 %v2745_v14, %v2743_v37 }
 0x6fd   : > { %v2798_v12 = vsel %vm1600_vm2, %v2787_v0, %v2779_v19  ;;  %v2799_v48 = vsel %vm1600_vm2, %v2789_v51, %v2781_v17  ;;  %v2794_v32 = vsel %vm1600_vm2, %v2779_v19, %v2787_v0  ;;  %v2795_v49 = vsel %vm1600_vm2, %v2781_v17, %v2789_v51 }
 0x6fe   : > { %4967 = vmatprep.subr.bf16.mxu0 %v4966_v52  ;;  %v2803_v24 = vmul.f32 %v2798_v12, %v9180_v59  ;;  %v2805_v35 = vmul.f32 %v2799_v48, %v9180_v59  ;;  %v2802_v17 = vmul.f32 %v2794_v32, %v9181_v30  ;;  %v2804_v23 = vmul.f32 %v2795_v49, %v9181_v30  ;;  %v4633_v52 = vld [vmem:[%s9097_s7 + $0xe0] sm:$0xff]  ;;  %v7677_v48 = vld [vmem:[#allocation4 + $0x18] ss:$0 sm:$0xff] }
 0x6ff   : > { %4969 = vmatpush1.bf16.msra.mxu0 %v4968_v38  ;;  %v4629_v38 = vld [vmem:[%s9097_s7 + $0xc0] sm:$0xff]  ;;  %9188 = vst [vmem:[#allocation20_spill] sm:$0xff] %v7677_v48 }
 0x700   : > { %v2783_v36 = vpop.permute.xlu1 %2782  ;;  %v2761_v31 = vpop.permute.xlu0 %2760  ;;  %4971 = vmatprep.subr.bf16.mxu0 %v4970_v45  ;;  %v4978_v62 = vpack.c.bf16 %v2805_v35, %v2803_v24  ;;  %v4980_v37 = vpack.c.bf16 %v2804_v23, %v2802_v17  ;;  %v7674_v45 = vld [vmem:[#allocation4 + $0x10] ss:$0 sm:$0xff] }
 0x701   : > { %v2765_v4 = vsel %vm1559_vm15, %v2753_v21, %v2761_v31  ;;  %v2769_v16 = vsel %vm1559_vm15, %v2761_v31, %v2753_v21  ;;  %9187 = vst [vmem:[#allocation28_spill] sm:$0xff] %v7674_v45 }
 0x702   : > { %v2776_v44 = vmul.f32 %v2765_v4, %v9178_v28  ;;  %v2777_v58 = vmul.f32 %v2769_v16, %v9176_v18  ;;  %v4636_v16 = vld [vmem:[%s9097_s7 + $0xf8] sm:$0xff] }
 0x703   : > { %4973 = vmatpush1.bf16.msra.mxu0 %v4972_v10 }
 0x704   : > { %v4976_v50 = vpack.c.bf16 %v2776_v44, %v2774_v7  ;;  %v2791_v53 = vpop.permute.xlu1 %2790  ;;  %v2785_v11 = vpop.permute.xlu0 %2784  ;;  %v4974_v56 = vpack.c.bf16 %v2777_v58, %v2775_v29  ;;  %v4635_v44 = vld [vmem:[%s9097_s7 + $0xf0] sm:$0xff] }
 0x705   : > { %v2796_v21 = vsel %vm1600_vm2, %v2783_v36, %v2791_v53  ;;  %v2800_v40 = vsel %vm1600_vm2, %v2791_v53, %v2783_v36  ;;  %v4632_v36 = vld [vmem:[%s9097_s7 + $0xd8] sm:$0xff] }
 0x706   : > { %4975 = vmatprep.subr.bf16.mxu0 %v4974_v56  ;;  %v2806_v54 = vmul.f32 %v2796_v21, %v9181_v30  ;;  %v2807_v47 = vmul.f32 %v2800_v40, %v9180_v59  ;;  %v4638_v21 = vld [vmem:[%s9097_s7 + $0x108] sm:$0xff] }
 0x707   : > { %4977 = vmatpush1.bf16.msra.mxu0 %v4976_v50  ;;  %v4639_v50 = vld [vmem:[%s9097_s7 + $0x110] sm:$0xff] }
 0x708   : > { %v2811_v63 = vpop.permute.xlu1 %2810  ;;  %v2793_v55 = vpop.permute.xlu0 %2792  ;;  %4979 = vmatprep.subr.bf16.mxu0 %v4978_v62 }
 0x709   : > { %v2797_v19 = vsel %vm1600_vm2, %v2785_v11, %v2793_v55  ;;  %v2801_v6 = vsel %vm1600_vm2, %v2793_v55, %v2785_v11  ;;  %v4631_v55 = vld [vmem:[%s9097_s7 + $0xd0] sm:$0xff] }
 0x70a   : > { %v2808_v5 = vmul.f32 %v2797_v19, %v9181_v30  ;;  %v2809_v8 = vmul.f32 %v2801_v6, %v9180_v59  ;;  %v4637_v19 = vld [vmem:[%s9097_s7 + $0x100] sm:$0xff]  ;;  %v4640_v6 = vld [vmem:[%s9097_s7 + $0x118] sm:$0xff] }
 0x70b   : > { %4981 = vmatpush1.bf16.msra.mxu0 %v4980_v37  ;;  %v4634_v37 = vld [vmem:[%s9097_s7 + $0xe8] sm:$0xff] }
 0x70c   : > { %v4984_v2 = vpack.c.bf16 %v2808_v5, %v2806_v54  ;;  %v2819_v9 = vpop.permute.xlu1 %2818  ;;  %v2813_v33 = vpop.permute.xlu0 %2812  ;;  %v4982_v14 = vpack.c.bf16 %v2809_v8, %v2807_v47 }
 0x70d   : > { %v2826_v46 = vsel %vm1641_vm3, %v2811_v63, %v2819_v9  ;;  %v2830_v3 = vsel %vm1641_vm3, %v2819_v9, %v2811_v63 }
 0x70e   : > { %4983 = vmatprep.subr.bf16.mxu0 %v4982_v14  ;;  %v2834_v12 = vmul.f32 %v7674_v45, %v2826_v46  ;;  %v2835_v10 = vmul.f32 %v7677_v48, %v2830_v3 }
 0x70f   : > { %4985 = vmatpush1.bf16.msra.mxu0 %v4984_v2 }
 0x710   : > { %v2815_v0 = vpop.permute.xlu1 %2814  ;;  %v2821_v51 = vpop.permute.xlu0 %2820 }
 0x711   : > { %v2827_v25 = vsel %vm1641_vm3, %v2813_v33, %v2821_v51  ;;  %v2831_v61 = vsel %vm1641_vm3, %v2821_v51, %v2813_v33 }
 0x712   : > { %v2836_v7 = vmul.f32 %v7674_v45, %v2827_v25  ;;  %v2837_v29 = vmul.f32 %v7677_v48, %v2831_v61  ;;  %2919 = vmatmul.mubr.f32.vlgmr.msra.gmra.mrb[22].mxu0 %v4629_v38 }
 0x713   : > { %2924 = vmatprep.mubr.f32.mxu0 %v4633_v52 }
 0x714   : > { %v4988_v31 = vpack.c.bf16 %v2836_v7, %v2834_v12  ;;  %v2823_v32 = vpop.permute.xlu1 %2822  ;;  %v2817_v49 = vpop.permute.xlu0 %2816  ;;  %v4986_v4 = vpack.c.bf16 %v2837_v29, %v2835_v10  ;;  %v5610_v12 = vmov 10  }
 0x715   : > { %v2828_v24 = vsel %vm1641_vm3, %v2815_v0, %v2823_v32  ;;  %v2832_v35 = vsel %vm1641_vm3, %v2823_v32, %v2815_v0  ;;  %5370 = vset.pattern.permute.xlu1 %v5610_v12  ;;  %5371 = vset.pattern.permute.xlu0 %v5610_v12 }
 0x716   : > { %2925 = vmatmul.mubr.f32.gmra.mrb[24].mxu0 %v4632_v36  ;;  %4987 = vmatprep.subr.bf16.mxu0 %v4986_v4  ;;  %v2838_v56 = vmul.f32 %v7674_v45, %v2828_v24  ;;  %v2839_v17 = vmul.f32 %v7677_v48, %v2832_v35 }
 0x717   : > { %4989 = vmatpush1.bf16.msra.mxu0 %v4988_v31  ;;  %2930 = vmatprep.mubr.f32.mxu0 %v4636_v16 }
 0x718   : > { %v2825_v58 = vpop.permute.xlu0 %2824 }
 0x719   : > { %v2829_v53 = vsel %vm1641_vm3, %v2817_v49, %v2825_v58  ;;  %v2833_v11 = vsel %vm1641_vm3, %v2825_v58, %v2817_v49 }
 0x71a   : > { %v2840_v23 = vmul.f32 %v7674_v45, %v2829_v53  ;;  %v2841_v62 = vmul.f32 %v7677_v48, %v2833_v11  ;;  %2931 = vmatmul.mubr.f32.gmra.mrb[26].mxu0 %v4635_v44 }
 0x71b   : > { %2936 = vmatprep.mubr.f32.mxu0 %v4639_v50 }
 0x71c   : > { %v4992_v40 = vpack.c.bf16 %v2840_v23, %v2838_v56  ;;  %v4990_v63 = vpack.c.bf16 %v2841_v62, %v2839_v17  ;;  %v4646_v56 = vld [vmem:[%s9097_s7 + $0x128] sm:$0xff] }
 0x71d   : > { %3425 = vmatprep.mubr.f32.mxu1 %v4646_v56  ;;  %v5611_v56 = vmov 11  }
 0x71e   : > { %2937 = vmatmul.mubr.f32.gmra.mrb[28].mxu0 %v4638_v21  ;;  %4991 = vmatprep.subr.bf16.mxu0 %v4990_v63  ;;  %v9189_v21 = vld [vmem:[#allocation17_spill] sm:$0xff] }
 0x71f   : > { %4993 = vmatpush1.bf16.msra.mxu0 %v4992_v40  ;;  %3007 = vmatprep.mubr.f32.mxu0 %v9182_v1  ;;  %v9190_v40 = vld [vmem:[#allocation18_spill] sm:$0xff] }
 0x720   : > { %v3598_v63 = vrot.slane %v9190_v40, %v9189_v21 }
 0x722   : > { %4641 = vmatmul.mubr.msk.f32.vlgmr.msra.gmra.mrb[22].mxu0 %vm1134_vm1, %v4631_v55 }
 0x723   : > { %3013 = vmatprep.mubr.f32.mxu0 %v9182_v1 }
 0x725   : > { %v3034_v54 = vpop.permute.xlu1 %3033 }
 0x726   : > { %4642 = vmatmul.mubr.msk.f32.gmra.mrb[24].mxu0 %vm1134_vm1, %v4634_v37 }
 0x727   : > { %3019 = vmatprep.mubr.f32.mxu0 %v9182_v1 }
 0x729   : > { %v3038_v33 = vpop.permute.xlu0 %3037 }
 0x72a   : > { %4643 = vmatmul.mubr.msk.f32.gmra.mrb[26].mxu0 %vm1134_vm1, %v4637_v19  ;;  %v9191_v19 = vld [vmem:[#allocation19_spill] sm:$0xff] }
 0x72b   : > { %3025 = vmatprep.mubr.f32.mxu0 %v9182_v1  ;;  %v3058_v47 = vpop.permute.xlu1 %3057 }
 0x72d   : > { %v3042_v31 = vpop.permute.xlu0 %3041 }
 0x72e   : > { %4644 = vmatmul.mubr.msk.f32.gmra.mrb[28].mxu0 %vm1134_vm1, %v4640_v6  ;;  %v3602_v6 = vrot.slane %v9191_v19, %v9189_v21  ;;  %v5435_v19 = vld [vmem:[%s5990_s11 + $0x20] sm:$0xff] }
 0x72f   : > { %v3062_v38 = vpop.permute.xlu1 %3061 }
 0x732   : > { %v3066_v4 = vpop.permute.xlu0 %3065 }
 0x734   : > { %v3046_v32 = vpop.permute.xlu1 %3045 }
 0x739   : > { %v3070_v35 = vpop.permute.xlu1 %3069 }
 0x7f5   : > { %v3009_v5 = vpop.f32.mrb[22].mxu0 }
 0x7f6   : > { %v3048_v8 = vmul.f32 %v3034_v54, %v3009_v5  ;;  %v3011_v2 = vpop.f32.mrb[23].mxu0  ;;  %v5431_v5 = vld [vmem:[%s5990_s11] sm:$0xff] }
 0x7f7   : > { %v3049_v10 = vmul.f32 %v3034_v54, %v3011_v2 }
 0x7f8   : > { %v7729_v9 = vadd.f32 %v3058_v47, %v3048_v8  ;;  %v7891_v8 = vmul.f32 %v5431_v5, %v3598_v63  ;;  %v7938_v5 = vmul.f32 %v5435_v19, %v3598_v63 }
 0x7f9   : > { %v3015_v14 = vpop.f32.mrb[24].mxu0  ;;  %v7753_v7 = vadd.f32 %v3058_v47, %v3049_v10 }
 0x7fa   : > { %v3050_v46 = vmul.f32 %v3038_v33, %v3015_v14  ;;  %3093 = vrot.lane.b32.xlu1 %v7729_v9, %s5594_s21  ;;  %v3017_v3 = vpop.f32.mrb[25].mxu0  ;;  %v5432_v14 = vld [vmem:[%s5990_s11 + $0x10] sm:$0xff] }
 0x7fb   : > { %v3051_v29 = vmul.f32 %v3038_v33, %v3017_v3  ;;  %v5433_v3 = vld [vmem:[%s5990_s11 + $0x8] sm:$0xff] }
 0x7fc   : > { %v7733_v0 = vadd.f32 %v3062_v38, %v3050_v46  ;;  %v7902_v46 = vmul.f32 %v5432_v14, %v3598_v63 }
 0x7fd   : > { %v3021_v51 = vpop.f32.mrb[26].mxu0  ;;  %v7759_v36 = vadd.f32 %v3062_v38, %v3051_v29  ;;  %v7905_v38 = vmul.f32 %v5433_v3, %v3602_v6 }
 0x7fe   : > { %3125 = vrot.lane.b32.xlu1 %v7729_v9, %s5595_s23  ;;  %3095 = vrot.lane.b32.xlu0 %v7733_v0, %s5594_s21  ;;  %v3023_v52 = vpop.f32.mrb[27].mxu0  ;;  %v3052_v49 = vmul.f32 %v3042_v31, %v3021_v51 }
 0x7ff   : > { %v3053_v58 = vmul.f32 %v3042_v31, %v3023_v52 }
 0x800   : > { %v7773_v16 = vadd.f32 %v3066_v4, %v3052_v49 }
 0x801   : > { %v3027_v25 = vpop.f32.mrb[28].mxu0  ;;  %v7793_v50 = vadd.f32 %v3066_v4, %v3053_v58 }
 0x802   : > { %3157 = vrot.lane.b32.xlu1 %v7729_v9, %s5596_s24  ;;  %3127 = vrot.lane.b32.xlu0 %v7733_v0, %s5595_s23  ;;  %v3029_v61 = vpop.f32.mrb[29].mxu0  ;;  %v3054_v24 = vmul.f32 %v3046_v32, %v3027_v25  ;;  %v5434_v25 = vld [vmem:[%s5990_s11 + $0x18] sm:$0xff] }
 0x803   : > { %v3055_v53 = vmul.f32 %v3046_v32, %v3029_v61  ;;  %v7914_v61 = vmul.f32 %v5434_v25, %v3602_v6  ;;  %v5437_v25 = vld [vmem:[%s5990_s11 + $0x30] sm:$0xff] }
 0x804   : > { %v7779_v44 = vadd.f32 %v3070_v35, %v3054_v24 }
 0x805   : > { %v7799_v11 = vadd.f32 %v3070_v35, %v3055_v53 }
 0x806   : > { %3189 = vrot.lane.b32.xlu1 %v7729_v9, %s5597_s25  ;;  %3159 = vrot.lane.b32.xlu0 %v7733_v0, %s5596_s24 }
 0x80a   : > { %3221 = vrot.lane.b32.xlu1 %v7729_v9, %s5598_s26  ;;  %3191 = vrot.lane.b32.xlu0 %v7733_v0, %s5597_s25 }
 0x80e   : > { %3101 = vrot.lane.b32.xlu1 %v7753_v7, %s5594_s21  ;;  %3223 = vrot.lane.b32.xlu0 %v7733_v0, %s5598_s26 }
 0x812   : > { %3133 = vrot.lane.b32.xlu1 %v7753_v7, %s5595_s23  ;;  %3103 = vrot.lane.b32.xlu0 %v7759_v36, %s5594_s21 }
 0x816   : > { %3165 = vrot.lane.b32.xlu1 %v7753_v7, %s5596_s24  ;;  %3135 = vrot.lane.b32.xlu0 %v7759_v36, %s5595_s23 }
 0x81a   : > { %3197 = vrot.lane.b32.xlu1 %v7753_v7, %s5597_s25  ;;  %3167 = vrot.lane.b32.xlu0 %v7759_v36, %s5596_s24 }
 0x81e   : > { %3199 = vrot.lane.b32.xlu0 %v7759_v36, %s5597_s25  ;;  %3097 = vrot.lane.b32.xlu1 %v7773_v16, %s5594_s21 }
 0x822   : > { %3129 = vrot.lane.b32.xlu1 %v7773_v16, %s5595_s23  ;;  %3099 = vrot.lane.b32.xlu0 %v7779_v44, %s5594_s21 }
 0x826   : > { %3161 = vrot.lane.b32.xlu1 %v7773_v16, %s5596_s24  ;;  %3131 = vrot.lane.b32.xlu0 %v7779_v44, %s5595_s23 }
 0x82a   : > { %3193 = vrot.lane.b32.xlu1 %v7773_v16, %s5597_s25  ;;  %3163 = vrot.lane.b32.xlu0 %v7779_v44, %s5596_s24 }
 0x82e   : > { %3105 = vrot.lane.b32.xlu1 %v7793_v50, %s5594_s21  ;;  %3195 = vrot.lane.b32.xlu0 %v7779_v44, %s5597_s25 }
 0x832   : > { %3229 = vrot.lane.b32.xlu1 %v7753_v7, %s5598_s26  ;;  %3107 = vrot.lane.b32.xlu0 %v7799_v11, %s5594_s21 }
 0x836   : > { %3137 = vrot.lane.b32.xlu1 %v7793_v50, %s5595_s23  ;;  %3231 = vrot.lane.b32.xlu0 %v7759_v36, %s5598_s26 }
 0x83a   : > { %3169 = vrot.lane.b32.xlu1 %v7793_v50, %s5596_s24  ;;  %3139 = vrot.lane.b32.xlu0 %v7799_v11, %s5595_s23 }
 0x83e   : > { %3201 = vrot.lane.b32.xlu1 %v7793_v50, %s5597_s25  ;;  %3227 = vrot.lane.b32.xlu0 %v7779_v44, %s5598_s26 }
 0x842   : > { %3225 = vrot.lane.b32.xlu1 %v7773_v16, %s5598_s26  ;;  %3171 = vrot.lane.b32.xlu0 %v7799_v11, %s5596_s24 }
 0x846   : > { %3233 = vrot.lane.b32.xlu1 %v7793_v50, %s5598_s26  ;;  %3255 = vrot.lane.b32.xlu0 %v7733_v0, %s5599_s27 }
 0x84a   : > { %3253 = vrot.lane.b32.xlu1 %v7729_v9, %s5599_s27  ;;  %3203 = vrot.lane.b32.xlu0 %v7799_v11, %s5597_s25 }
 0x84e   : > { %3261 = vrot.lane.b32.xlu1 %v7753_v7, %s5599_s27  ;;  %3263 = vrot.lane.b32.xlu0 %v7759_v36, %s5599_s27 }
 0x852   : > { %3257 = vrot.lane.b32.xlu1 %v7773_v16, %s5599_s27  ;;  %3259 = vrot.lane.b32.xlu0 %v7779_v44, %s5599_s27 }
 0x856   : > { %3265 = vrot.lane.b32.xlu1 %v7793_v50, %s5599_s27  ;;  %3287 = vrot.lane.b32.xlu0 %v7733_v0, %s5600_s29 }
 0x85a   : > { %3285 = vrot.lane.b32.xlu1 %v7729_v9, %s5600_s29  ;;  %3235 = vrot.lane.b32.xlu0 %v7799_v11, %s5598_s26 }
 0x85e   : > { %3293 = vrot.lane.b32.xlu1 %v7753_v7, %s5600_s29  ;;  %3295 = vrot.lane.b32.xlu0 %v7759_v36, %s5600_s29 }
 0x862   : > { %3289 = vrot.lane.b32.xlu1 %v7773_v16, %s5600_s29  ;;  %3267 = vrot.lane.b32.xlu0 %v7799_v11, %s5599_s27 }
 0x866   : > { %3297 = vrot.lane.b32.xlu1 %v7793_v50, %s5600_s29  ;;  %3291 = vrot.lane.b32.xlu0 %v7779_v44, %s5600_s29 }
 0x86a   : > { %3317 = vrot.lane.b32.xlu1 %v7729_v9, %s5601_s19  ;;  %3299 = vrot.lane.b32.xlu0 %v7799_v11, %s5600_s29 }
 0x86c   : > { %v3094_v17 = vpop.permute.xlu1 %3093 }
 0x86e   : > { %3325 = vrot.lane.b32.xlu1 %v7753_v7, %s5601_s19  ;;  %3319 = vrot.lane.b32.xlu0 %v7733_v0, %s5601_s19 }
 0x870   : > { %v7868_v23 = vpop.permute.xlu1 %3125  ;;  %v3096_v62 = vpop.permute.xlu0 %3095 }
 0x872   : > { %3321 = vrot.lane.b32.xlu1 %v7773_v16, %s5601_s19  ;;  %3327 = vrot.lane.b32.xlu0 %v7759_v36, %s5601_s19 }
 0x874   : > { %v7876_v55 = vpop.permute.xlu1 %3157  ;;  %v7878_v37 = vpop.permute.xlu0 %3127 }
 0x876   : > { %3329 = vrot.lane.b32.xlu1 %v7793_v50, %s5601_s19  ;;  %3323 = vrot.lane.b32.xlu0 %v7779_v44, %s5601_s19 }
 0x878   : > { %v7886_v54 = vpop.permute.xlu1 %3189  ;;  %v7888_v47 = vpop.permute.xlu0 %3159 }
 0x87a   : > { %3611 = vrot.lane.b32.xlu1 %v7891_v8, %s5594_s21  ;;  %3331 = vrot.lane.b32.xlu0 %v7799_v11, %s5601_s19 }
 0x87c   : > { %v7897_v2 = vpop.permute.xlu1 %3221  ;;  %v7899_v33 = vpop.permute.xlu0 %3191 }
 0x87e   : > { %3613 = vrot.lane.b32.xlu0 %v7902_v46, %s5594_s21  ;;  %3619 = vrot.lane.b32.xlu1 %v7905_v38, %s5594_s21 }
 0x880   : > { %v3102_v51 = vpop.permute.xlu1 %3101  ;;  %v7911_v52 = vpop.permute.xlu0 %3223 }
 0x881   : > { %v3109_v10 = vsel %vm1354_vm10, %v3094_v17, %v3102_v51  ;;  %v3113_v29 = vsel %vm1354_vm10, %v3102_v51, %v3094_v17 }
 0x882   : > { %3621 = vrot.lane.b32.xlu0 %v7914_v61, %s5594_s21  ;;  %3540 = vperm.xlu1 %5370, %v7434_v22   ;;  %v3117_v24 = vmul.f32 %v3113_v29, %v6316_v13  ;;  %v3118_v35 = vmul.f32 %v3109_v10, %v6320_v26  ;;  %v7951_v10 = vmul.f32 %v5437_v25, %v3598_v63 }
 0x884   : > { %v7923_v31 = vpop.permute.xlu1 %3133  ;;  %v3104_v32 = vpop.permute.xlu0 %3103 }
 0x885   : > { %v3110_v49 = vsel %vm1354_vm10, %v3096_v62, %v3104_v32  ;;  %v3114_v4 = vsel %vm1354_vm10, %v3104_v32, %v3096_v62  ;;  %v3141_v25 = vsel %vm1395_vm11, %v7868_v23, %v7923_v31 }
 0x886   : > { %v3119_v58 = vmul.f32 %v3114_v4, %v6316_v13  ;;  %v3120_v53 = vmul.f32 %v3110_v49, %v6320_v26  ;;  %3544 = vperm.xlu0 %5371, %v7442_v57   ;;  %5372 = vset.pattern.permute.xlu1 %v5611_v56  ;;  %v5439_v4 = vld [vmem:[%s9099_s9 + $0x10] sm:$0xff] }
 0x887   : > { %3564 = vperm.xlu1 %5372, %v7434_v22   ;;  %v5436_v22 = vld [vmem:[%s5990_s11 + $0x28] sm:$0xff] }
 0x888   : > { %v4996_v17 = vpack.c.bf16 %v3119_v58, %v3117_v24  ;;  %v7935_v21 = vpop.permute.xlu1 %3165  ;;  %v3136_v62 = vpop.permute.xlu0 %3135  ;;  %v4994_v40 = vpack.c.bf16 %v3120_v53, %v3118_v35  ;;  %v7948_v51 = vmul.f32 %v5436_v22, %v3602_v6  ;;  %v5440_v35 = vld [vmem:[%s9099_s9 + $0x18] sm:$0xff] }
 0x889   : > { %v3142_v19 = vsel %vm1395_vm11, %v7878_v37, %v3136_v62 }
 0x88a   : > { %4995 = vmatprep.subr.bf16.mxu1 %v4994_v40  ;;  %3615 = vrot.lane.b32.xlu0 %v7938_v5, %s5594_s21  ;;  %v3152_v1 = vmul.f32 %v3142_v19, %v6362_v34 }
 0x88b   : > { %4997 = vmatpush1.bf16.msra.mxu1 %v4996_v17  ;;  %3568 = vperm.xlu1 %5372, %v7442_v57   ;;  %v5438_v57 = vld [vmem:[%s5990_s11 + $0x38] sm:$0xff] }
 0x88c   : > { %v7943_v14 = vpop.permute.xlu1 %3197  ;;  %v7945_v3 = vpop.permute.xlu0 %3167  ;;  %v7961_v49 = vmul.f32 %v5438_v57, %v3602_v6 }
 0x88e   : > { %3623 = vrot.lane.b32.xlu0 %v7948_v51, %s5594_s21 }
 0x88f   : > { %3617 = vrot.lane.b32.xlu1 %v7951_v10, %s5594_s21 }
 0x890   : > { %v7957_v29 = vpop.permute.xlu0 %3199  ;;  %v3098_v32 = vpop.permute.xlu1 %3097  ;;  %5373 = vset.pattern.permute.xlu1 %v5610_v12 }
 0x892   : > { %3548 = vperm.xlu0 %5371, %v5439_v4  }
 0x893   : > { %3625 = vrot.lane.b32.xlu1 %v7961_v49, %s5594_s21 }
 0x894   : > { %v3130_v63 = vpop.permute.xlu1 %3129  ;;  %v3100_v24 = vpop.permute.xlu0 %3099 }
 0x896   : > { %5374 = vset.pattern.permute.xlu0 %v5611_v56 }
 0x897   : > { %3572 = vperm.xlu0 %5374, %v5439_v4   ;;  %3552 = vperm.xlu1 %5373, %v5440_v35  }
 0x898   : > { %v7971_v12 = vpop.permute.xlu1 %3161  ;;  %v3132_v6 = vpop.permute.xlu0 %3131 }
 0x89b   : > { %3645 = vrot.lane.b32.xlu0 %v7902_v46, %s5595_s23  ;;  %5375 = vset.pattern.permute.xlu1 %v5611_v56 }
 0x89c   : > { %v7975_v58 = vpop.permute.xlu1 %3193  ;;  %v7977_v53 = vpop.permute.xlu0 %3163  ;;  %3576 = vperm.xlu1 %5375, %v5440_v35   ;;  %v3146_v35 = vsel %vm1395_vm11, %v3136_v62, %v7878_v37  ;;  %v3145_v37 = vsel %vm1395_vm11, %v7923_v31, %v7868_v23  ;;  %v3150_v62 = vmul.f32 %v3141_v25, %v6362_v34  ;;  %v3174_v23 = vsel %vm1436_vm12, %v7888_v47, %v7945_v3 }
 0x89e   : > { %v5002_v31 = vpack.c.bf16 %v3152_v1, %v3150_v62  ;;  %v3178_v1 = vsel %vm1436_vm12, %v7945_v3, %v7888_v47  ;;  %v3177_v47 = vsel %vm1436_vm12, %v7935_v21, %v7876_v55 }
 0x89f   : > { %3653 = vrot.lane.b32.xlu0 %v7914_v61, %s5595_s23 }
 0x8a0   : > { %v3106_v17 = vpop.permute.xlu1 %3105  ;;  %v7981_v40 = vpop.permute.xlu0 %3195  ;;  %3643 = vrot.lane.b32.xlu1 %v7891_v8, %s5595_s23 }
 0x8a1   : > { %v3111_v56 = vsel %vm1354_vm10, %v3098_v32, %v3106_v17  ;;  %v3115_v22 = vsel %vm1354_vm10, %v3106_v17, %v3098_v32 }
 0x8a2   : > { %v3121_v48 = vmul.f32 %v3115_v22, %v6316_v13  ;;  %v3122_v45 = vmul.f32 %v3111_v56, %v6320_v26 }
 0x8a3   : > { %3649 = vrot.lane.b32.xlu0 %v7951_v10, %s5595_s23 }
 0x8a4   : > { %v7998_v57 = vpop.permute.xlu1 %3229  ;;  %v3108_v4 = vpop.permute.xlu0 %3107  ;;  %3651 = vrot.lane.b32.xlu1 %v7905_v38, %s5595_s23 }
 0x8a5   : > { %v3112_v32 = vsel %vm1354_vm10, %v3100_v24, %v3108_v4  ;;  %v3116_v17 = vsel %vm1354_vm10, %v3108_v4, %v3100_v24  ;;  %v3151_v24 = vmul.f32 %v3146_v35, %v6369_v27 }
 0x8a6   : > { %v3123_v30 = vmul.f32 %v3116_v17, %v6316_v13  ;;  %v3124_v59 = vmul.f32 %v3112_v32, %v6320_v26  ;;  %v3149_v32 = vmul.f32 %v3145_v37, %v6369_v27 }
 0x8a7   : > { %3657 = vrot.lane.b32.xlu0 %v7961_v49, %s5595_s23 }
 0x8a8   : > { %v5000_v19 = vpack.c.bf16 %v3123_v30, %v3121_v48  ;;  %v3138_v22 = vpop.permute.xlu1 %3137  ;;  %v8022_v4 = vpop.permute.xlu0 %3231  ;;  %v4998_v56 = vpack.c.bf16 %v3124_v59, %v3122_v45  ;;  %3647 = vrot.lane.b32.xlu1 %v7938_v5, %s5595_s23  ;;  %v3173_v59 = vsel %vm1436_vm12, %v7876_v55, %v7935_v21  ;;  %v5004_v45 = vpack.c.bf16 %v3151_v24, %v3149_v32 }
 0x8a9   : > { %v3143_v30 = vsel %vm1395_vm11, %v3130_v63, %v3138_v22  ;;  %v3147_v48 = vsel %vm1395_vm11, %v3138_v22, %v3130_v63  ;;  %v3184_v63 = vmul.f32 %v3174_v23, %v6402_v15  ;;  %v3182_v3 = vmul.f32 %v3173_v59, %v6402_v15 }
 0x8aa   : > { %4999 = vmatprep.subr.bf16.mxu1 %v4998_v56  ;;  %v3153_v62 = vmul.f32 %v3147_v48, %v6369_v27  ;;  %v3154_v24 = vmul.f32 %v3143_v30, %v6362_v34  ;;  %v3181_v30 = vmul.f32 %v3177_v47, %v6409_v42  ;;  %v3206_v55 = vsel %vm1477_vm13, %v7899_v33, %v7957_v29 }
 0x8ab   : > { %5001 = vmatpush1.bf16.msra.mxu1 %v5000_v19  ;;  %3677 = vrot.lane.b32.xlu0 %v7902_v46, %s5596_s24  ;;  %v5010_v21 = vpack.c.bf16 %v3184_v63, %v3182_v3 }
 0x8ac   : > { %v3170_v25 = vpop.permute.xlu1 %3169  ;;  %5003 = vmatprep.subr.bf16.mxu1 %v5002_v31  ;;  %v3140_v35 = vpop.permute.xlu0 %3139  ;;  %3655 = vrot.lane.b32.xlu1 %v7948_v51, %s5595_s23 }
 0x8ad   : > { %v3144_v17 = vsel %vm1395_vm11, %v3132_v6, %v3140_v35  ;;  %v3148_v37 = vsel %vm1395_vm11, %v3140_v35, %v3132_v6  ;;  %v3183_v6 = vmul.f32 %v3178_v1, %v6409_v42  ;;  %v3175_v48 = vsel %vm1436_vm12, %v7971_v12, %v3170_v25 }
 0x8ae   : > { %v3155_v19 = vmul.f32 %v3148_v37, %v6369_v27  ;;  %v3156_v22 = vmul.f32 %v3144_v17, %v6362_v34  ;;  %v3179_v59 = vsel %vm1436_vm12, %v3170_v25, %v7971_v12  ;;  %v3210_v17 = vsel %vm1477_vm13, %v7957_v29, %v7899_v33 }
 0x8af   : > { %5005 = vmatpush1.bf16.msra.mxu1 %v5004_v45  ;;  %3685 = vrot.lane.b32.xlu0 %v7914_v61, %s5596_s24  ;;  %v3205_v45 = vsel %vm1477_vm13, %v7886_v54, %v7943_v14  ;;  %v5012_v35 = vpack.c.bf16 %v3183_v6, %v3181_v30  ;;  %v3216_v12 = vmul.f32 %v3206_v55, %v6443_v43 }
 0x8b0   : > { %v5008_v56 = vpack.c.bf16 %v3155_v19, %v3153_v62  ;;  %v3202_v32 = vpop.permute.xlu1 %3201  ;;  %v8064_v23 = vpop.permute.xlu0 %3227  ;;  %v5006_v31 = vpack.c.bf16 %v3156_v22, %v3154_v24  ;;  %3675 = vrot.lane.b32.xlu1 %v7891_v8, %s5596_s24  ;;  %v3185_v62 = vmul.f32 %v3179_v59, %v6409_v42  ;;  %v3186_v24 = vmul.f32 %v3175_v48, %v6402_v15 }
 0x8b1   : > { %v3209_v29 = vsel %vm1477_vm13, %v7943_v14, %v7886_v54  ;;  %v3214_v22 = vmul.f32 %v3205_v45, %v6443_v43  ;;  %v3207_v54 = vsel %vm1477_vm13, %v7975_v58, %v3202_v32  ;;  %v3211_v14 = vsel %vm1477_vm13, %v3202_v32, %v7975_v58 }
 0x8b2   : > { %5007 = vmatprep.subr.bf16.mxu1 %v5006_v31  ;;  %v3213_v30 = vmul.f32 %v3209_v29, %v6473_v20  ;;  %v3217_v58 = vmul.f32 %v3211_v14, %v6473_v20  ;;  %v3218_v32 = vmul.f32 %v3207_v54, %v6443_v43 }
 0x8b3   : > { %5009 = vmatpush1.bf16.msra.mxu1 %v5008_v56  ;;  %3681 = vrot.lane.b32.xlu0 %v7951_v10, %s5596_s24  ;;  %v3215_v56 = vmul.f32 %v3210_v17, %v6473_v20  ;;  %v5018_v31 = vpack.c.bf16 %v3216_v12, %v3214_v22  ;;  %v5030_v22 = vpack.c.bf16 %v7799_v11, %v7793_v50 }
 0x8b4   : > { %v8085_v1 = vpop.permute.xlu1 %3225  ;;  %5011 = vmatprep.subr.bf16.mxu1 %v5010_v21  ;;  %v3172_v63 = vpop.permute.xlu0 %3171  ;;  %3683 = vrot.lane.b32.xlu1 %v7905_v38, %s5596_s24  ;;  %v5032_v11 = vpack.c.bf16 %v7779_v44, %v7773_v16 }
 0x8b5   : > { %v3176_v25 = vsel %vm1436_vm12, %v7977_v53, %v3172_v63  ;;  %v3180_v37 = vsel %vm1436_vm12, %v3172_v63, %v7977_v53  ;;  %v5020_v48 = vpack.c.bf16 %v3215_v56, %v3213_v30 }
 0x8b6   : > { %v3187_v19 = vmul.f32 %v3180_v37, %v6409_v42  ;;  %v3188_v33 = vmul.f32 %v3176_v25, %v6402_v15 }
 0x8b7   : > { %5013 = vmatpush1.bf16.msra.mxu1 %v5012_v35  ;;  %3689 = vrot.lane.b32.xlu0 %v7961_v49, %s5596_s24 }
 0x8b8   : > { %v5016_v53 = vpack.c.bf16 %v3187_v19, %v3185_v62  ;;  %v3234_v47 = vpop.permute.xlu1 %3233  ;;  %v8111_v3 = vpop.permute.xlu0 %3255  ;;  %v5014_v6 = vpack.c.bf16 %v3188_v33, %v3186_v24  ;;  %3679 = vrot.lane.b32.xlu1 %v7938_v5, %s5596_s24  ;;  %v3242_v62 = vsel %vm1518_vm14, %v8022_v4, %v7911_v52  ;;  %v3241_v33 = vsel %vm1518_vm14, %v7998_v57, %v7897_v2 }
 0x8b9   : > { %v3248_v29 = vmul.f32 %v3242_v62, %v6509_v41  ;;  %v3243_v50 = vsel %vm1518_vm14, %v3234_v47, %v8085_v1 }
 0x8ba   : > { %5015 = vmatprep.subr.bf16.mxu1 %v5014_v6  ;;  %v3246_v6 = vmul.f32 %v3241_v33, %v6509_v41 }
 0x8bb   : > { %5017 = vmatpush1.bf16.msra.mxu1 %v5016_v53  ;;  %3709 = vrot.lane.b32.xlu0 %v7902_v46, %s5597_s25  ;;  %v3237_v53 = vsel %vm1518_vm14, %v7897_v2, %v7998_v57 }
 0x8bc   : > { %v3254_v55 = vpop.permute.xlu1 %3253  ;;  %5019 = vmatprep.subr.bf16.mxu1 %v5018_v31  ;;  %v3204_v21 = vpop.permute.xlu0 %3203  ;;  %3687 = vrot.lane.b32.xlu1 %v7948_v51, %s5596_s24  ;;  %v3245_v2 = vmul.f32 %v3237_v53, %v6524_v60  ;;  %v5034_v57 = vpack.c.bf16 %v3248_v29, %v3246_v6 }
 0x8bd   : > { %v3208_v59 = vsel %vm1477_vm13, %v7981_v40, %v3204_v21  ;;  %v3212_v45 = vsel %vm1477_vm13, %v3204_v21, %v7981_v40  ;;  %v5026_v40 = vpack.c.bf16 %v7759_v36, %v7753_v7  ;;  %v3238_v7 = vsel %vm1518_vm14, %v7911_v52, %v8022_v4 }
 0x8be   : > { %v3219_v35 = vmul.f32 %v3212_v45, %v6473_v20  ;;  %v3220_v63 = vmul.f32 %v3208_v59, %v6443_v43  ;;  %v5028_v36 = vpack.c.bf16 %v7733_v0, %v7729_v9  ;;  %v3247_v52 = vmul.f32 %v3238_v7, %v6524_v60 }
 0x8bf   : > { %5021 = vmatpush1.bf16.msra.mxu1 %v5020_v48  ;;  %3717 = vrot.lane.b32.xlu0 %v7914_v61, %s5597_s25  ;;  %v3239_v0 = vsel %vm1518_vm14, %v8085_v1, %v3234_v47  ;;  %v3250_v47 = vmul.f32 %v3243_v50, %v6509_v41 }
 0x8c0   : > { %v5024_v17 = vpack.c.bf16 %v3219_v35, %v3217_v58  ;;  %v3262_v12 = vpop.permute.xlu1 %3261  ;;  %v3264_v25 = vpop.permute.xlu0 %3263  ;;  %v5022_v37 = vpack.c.bf16 %v3220_v63, %v3218_v32  ;;  %3707 = vrot.lane.b32.xlu1 %v7891_v8, %s5597_s25  ;;  %v5036_v30 = vpack.c.bf16 %v3247_v52, %v3245_v2  ;;  %v3249_v1 = vmul.f32 %v3239_v0, %v6524_v60 }
 0x8c1   : > { %v3273_v56 = vsel %vm1559_vm15, %v3262_v12, %v3254_v55  ;;  %v3274_v31 = vsel %vm1559_vm15, %v3264_v25, %v8111_v3  ;;  %v3269_v54 = vsel %vm1559_vm15, %v3254_v55, %v3262_v12  ;;  %v3270_v14 = vsel %vm1559_vm15, %v8111_v3, %v3264_v25 }
 0x8c2   : > { %5023 = vmatprep.subr.bf16.mxu1 %v5022_v37  ;;  %v3278_v59 = vmul.f32 %v3273_v56, %v9176_v18  ;;  %v3280_v45 = vmul.f32 %v3274_v31, %v9176_v18  ;;  %v3277_v3 = vmul.f32 %v3269_v54, %v9178_v28  ;;  %v3279_v32 = vmul.f32 %v3270_v14, %v9178_v28 }
 0x8c3   : > { %5025 = vmatpush1.bf16.msra.mxu1 %v5024_v17  ;;  %3713 = vrot.lane.b32.xlu0 %v7951_v10, %s5597_s25 }
 0x8c4   : > { %v3258_v24 = vpop.permute.xlu1 %3257  ;;  %5027 = vmatprep.subr.bf16.mxu1 %v5026_v40  ;;  %v8149_v19 = vpop.permute.xlu0 %3259  ;;  %3715 = vrot.lane.b32.xlu1 %v7905_v38, %s5597_s25  ;;  %v5042_v37 = vpack.c.bf16 %v3280_v45, %v3278_v59  ;;  %v5044_v33 = vpack.c.bf16 %v3279_v32, %v3277_v3 }
 0x8c7   : > { %5029 = vmatpush1.bf16.msra.mxu1 %v5028_v36  ;;  %3721 = vrot.lane.b32.xlu0 %v7961_v49, %s5597_s25 }
 0x8c8   : > { %v3266_v4 = vpop.permute.xlu1 %3265  ;;  %v3288_v9 = vpop.permute.xlu0 %3287  ;;  %5031 = vmatprep.subr.bf16.mxu1 %v5030_v22  ;;  %3711 = vrot.lane.b32.xlu1 %v7938_v5, %s5597_s25 }
 0x8c9   : > { %v3271_v12 = vsel %vm1559_vm15, %v3258_v24, %v3266_v4  ;;  %v3275_v25 = vsel %vm1559_vm15, %v3266_v4, %v3258_v24  ;;  %v9192_v4 = vld [vmem:[#allocation22_spill] sm:$0xff] }
 0x8ca   : > { %v3281_v7 = vmul.f32 %v3271_v12, %v9178_v28  ;;  %v3282_v36 = vmul.f32 %v3275_v25, %v9176_v18  ;;  %v4645_v25 = vld [vmem:[%s9097_s7 + $0x120] sm:$0xff] }
 0x8cb   : > { %5033 = vmatpush1.bf16.msra.mxu1 %v5032_v11  ;;  %3741 = vrot.lane.b32.xlu0 %v7902_v46, %s5598_s26 }
 0x8cc   : > { %v3286_v16 = vpop.permute.xlu1 %3285  ;;  %v3236_v44 = vpop.permute.xlu0 %3235  ;;  %5035 = vmatprep.subr.bf16.mxu1 %v5034_v57  ;;  %3719 = vrot.lane.b32.xlu1 %v7948_v51, %s5597_s25 }
 0x8cd   : > { %v3240_v21 = vsel %vm1518_vm14, %v8064_v23, %v3236_v44  ;;  %v3244_v48 = vsel %vm1518_vm14, %v3236_v44, %v8064_v23 }
 0x8ce   : > { %v3251_v55 = vmul.f32 %v3240_v21, %v6524_v60  ;;  %v3252_v58 = vmul.f32 %v3244_v48, %v6509_v41 }
 0x8cf   : > { %5037 = vmatpush1.bf16.msra.mxu1 %v5036_v30  ;;  %3749 = vrot.lane.b32.xlu0 %v7914_v61, %s5598_s26 }
 0x8d0   : > { %v5040_v35 = vpack.c.bf16 %v3251_v55, %v3249_v1  ;;  %v3294_v23 = vpop.permute.xlu1 %3293  ;;  %v3296_v63 = vpop.permute.xlu0 %3295  ;;  %v5038_v17 = vpack.c.bf16 %v3252_v58, %v3250_v47  ;;  %3739 = vrot.lane.b32.xlu1 %v7891_v8, %s5598_s26 }
 0x8d1   : > { %v3305_v40 = vsel %vm1600_vm2, %v3294_v23, %v3286_v16  ;;  %v3306_v62 = vsel %vm1600_vm2, %v3296_v63, %v3288_v9  ;;  %v3301_v22 = vsel %vm1600_vm2, %v3286_v16, %v3294_v23  ;;  %v3302_v53 = vsel %vm1600_vm2, %v3288_v9, %v3296_v63 }
 0x8d2   : > { %5039 = vmatprep.subr.bf16.mxu1 %v5038_v17  ;;  %v3310_v0 = vmul.f32 %v3305_v40, %v9192_v4  ;;  %v3312_v50 = vmul.f32 %v3306_v62, %v9192_v4  ;;  %v4649_v62 = vld [vmem:[%s9097_s7 + $0x140] sm:$0xff] }
 0x8d3   : > { %5041 = vmatpush1.bf16.msra.mxu1 %v5040_v35  ;;  %3745 = vrot.lane.b32.xlu0 %v7951_v10, %s5598_s26 }
 0x8d4   : > { %v3290_v24 = vpop.permute.xlu1 %3289  ;;  %v3268_v29 = vpop.permute.xlu0 %3267  ;;  %5043 = vmatprep.subr.bf16.mxu1 %v5042_v37  ;;  %3747 = vrot.lane.b32.xlu1 %v7905_v38, %s5598_s26  ;;  %v5050_v47 = vpack.c.bf16 %v3312_v50, %v3310_v0 }
 0x8d5   : > { %v3272_v6 = vsel %vm1559_vm15, %v8149_v19, %v3268_v29  ;;  %v3276_v52 = vsel %vm1559_vm15, %v3268_v29, %v8149_v19  ;;  %v9193_v19 = vld [vmem:[#allocation23_spill] sm:$0xff]  ;;  %v9195_v29 = vld [vmem:[#allocation20_spill] sm:$0xff] }
 0x8d6   : > { %v3283_v11 = vmul.f32 %v3272_v6, %v9178_v28  ;;  %v3284_v2 = vmul.f32 %v3276_v52, %v9176_v18  ;;  %v3309_v30 = vmul.f32 %v3301_v22, %v9193_v19  ;;  %v3311_v1 = vmul.f32 %v3302_v53, %v9193_v19  ;;  %v4648_v52 = vld [vmem:[%s9097_s7 + $0x138] sm:$0xff] }
 0x8d7   : > { %5045 = vmatpush1.bf16.msra.mxu1 %v5044_v33  ;;  %3753 = vrot.lane.b32.xlu0 %v7961_v49, %s5598_s26 }
 0x8d8   : > { %v5048_v9 = vpack.c.bf16 %v3283_v11, %v3281_v7  ;;  %v3298_v57 = vpop.permute.xlu1 %3297  ;;  %v3292_v56 = vpop.permute.xlu0 %3291  ;;  %v5046_v31 = vpack.c.bf16 %v3284_v2, %v3282_v36  ;;  %3743 = vrot.lane.b32.xlu1 %v7938_v5, %s5598_s26  ;;  %v5052_v21 = vpack.c.bf16 %v3311_v1, %v3309_v30  ;;  %v9194_v36 = vld [vmem:[#allocation28_spill] sm:$0xff] }
 0x8d9   : > { %v3303_v16 = vsel %vm1600_vm2, %v3290_v24, %v3298_v57  ;;  %v3307_v44 = vsel %vm1600_vm2, %v3298_v57, %v3290_v24 }
 0x8da   : > { %5047 = vmatprep.subr.bf16.mxu1 %v5046_v31  ;;  %v3313_v45 = vmul.f32 %v3303_v16, %v9193_v19  ;;  %v3314_v55 = vmul.f32 %v3307_v44, %v9192_v4  ;;  %v4651_v31 = vld [vmem:[%s9097_s7 + $0x150] sm:$0xff] }
 0x8db   : > { %5049 = vmatpush1.bf16.msra.mxu1 %v5048_v9  ;;  %3773 = vrot.lane.b32.xlu0 %v7902_v46, %s5599_s27  ;;  %v4652_v9 = vld [vmem:[%s9097_s7 + $0x158] sm:$0xff] }
 0x8dc   : > { %v3318_v54 = vpop.permute.xlu1 %3317  ;;  %v3300_v14 = vpop.permute.xlu0 %3299  ;;  %5051 = vmatprep.subr.bf16.mxu1 %v5050_v47  ;;  %3751 = vrot.lane.b32.xlu1 %v7948_v51, %s5598_s26  ;;  %v4655_v47 = vld [vmem:[%s9097_s7 + $0x170] sm:$0xff] }
 0x8dd   : > { %v3304_v48 = vsel %vm1600_vm2, %v3292_v56, %v3300_v14  ;;  %v3308_v59 = vsel %vm1600_vm2, %v3300_v14, %v3292_v56 }
 0x8de   : > { %v3315_v58 = vmul.f32 %v3304_v48, %v9193_v19  ;;  %v3316_v3 = vmul.f32 %v3308_v59, %v9192_v4  ;;  %v4654_v59 = vld [vmem:[%s9097_s7 + $0x168] sm:$0xff] }
 0x8df   : > { %5053 = vmatpush1.bf16.msra.mxu1 %v5052_v21  ;;  %3781 = vrot.lane.b32.xlu0 %v7914_v61, %s5599_s27 }
 0x8e0   : > { %v5056_v32 = vpack.c.bf16 %v3315_v58, %v3313_v45  ;;  %v3326_v35 = vpop.permute.xlu1 %3325  ;;  %v3320_v23 = vpop.permute.xlu0 %3319  ;;  %v5054_v63 = vpack.c.bf16 %v3316_v3, %v3314_v55  ;;  %3771 = vrot.lane.b32.xlu1 %v7891_v8, %s5599_s27 }
 0x8e1   : > { %v3333_v17 = vsel %vm1641_vm3, %v3318_v54, %v3326_v35  ;;  %v3337_v12 = vsel %vm1641_vm3, %v3326_v35, %v3318_v54 }
 0x8e2   : > { %5055 = vmatprep.subr.bf16.mxu1 %v5054_v63  ;;  %v3341_v24 = vmul.f32 %v9194_v36, %v3333_v17  ;;  %v3342_v22 = vmul.f32 %v9195_v29, %v3337_v12  ;;  %v4647_v63 = vld [vmem:[%s9097_s7 + $0x130] sm:$0xff] }
 0x8e3   : > { %5057 = vmatpush1.bf16.msra.mxu1 %v5056_v32  ;;  %3777 = vrot.lane.b32.xlu0 %v7951_v10, %s5599_s27 }
 0x8e4   : > { %v3322_v37 = vpop.permute.xlu1 %3321  ;;  %v3328_v40 = vpop.permute.xlu0 %3327  ;;  %3779 = vrot.lane.b32.xlu1 %v7905_v38, %s5599_s27 }
 0x8e5   : > { %v3334_v33 = vsel %vm1641_vm3, %v3320_v23, %v3328_v40  ;;  %v3338_v7 = vsel %vm1641_vm3, %v3328_v40, %v3320_v23  ;;  %v9196_v23 = vmov 0.0  }
 0x8e6   : > { %v3343_v53 = vmul.f32 %v9194_v36, %v3334_v33  ;;  %v3344_v6 = vmul.f32 %v9195_v29, %v3338_v7  ;;  %3426 = vmatmul.mubr.f32.vlgmr.msra.gmra.mrb[30].mxu1 %v4645_v25  ;;  %v4650_v7 = vld [vmem:[%s9097_s7 + $0x148] sm:$0xff] }
 0x8e7   : > { %3431 = vmatprep.mubr.f32.mxu1 %v4649_v62  ;;  %3785 = vrot.lane.b32.xlu0 %v7961_v49, %s5599_s27 }
 0x8e8   : > { %v5060_v0 = vpack.c.bf16 %v3343_v53, %v3341_v24  ;;  %v3330_v50 = vpop.permute.xlu1 %3329  ;;  %v3324_v11 = vpop.permute.xlu0 %3323  ;;  %v5058_v2 = vpack.c.bf16 %v3344_v6, %v3342_v22  ;;  %3775 = vrot.lane.b32.xlu1 %v7938_v5, %s5599_s27  ;;  %v4656_v22 = vld [vmem:[%s9097_s7 + $0x178] sm:$0xff] }
 0x8e9   : > { %v3335_v57 = vsel %vm1641_vm3, %v3322_v37, %v3330_v50  ;;  %v3339_v56 = vsel %vm1641_vm3, %v3330_v50, %v3322_v37  ;;  %v4124_v50 = vld [vmem:[#allocation7 + $0x8] sm:$0xff] }
 0x8ea   : > { %3432 = vmatmul.mubr.f32.gmra.mrb[32].mxu1 %v4648_v52  ;;  %5059 = vmatprep.subr.bf16.mxu1 %v5058_v2  ;;  %v3345_v54 = vmul.f32 %v9194_v36, %v3335_v57  ;;  %v3346_v14 = vmul.f32 %v9195_v29, %v3339_v56 }
 0x8eb   : > { %5061 = vmatpush1.bf16.msra.mxu1 %v5060_v0  ;;  %3437 = vmatprep.mubr.f32.mxu1 %v4652_v9 }
 0x8ec   : > { %3805 = vrot.lane.b32.xlu0 %v7902_v46, %s5600_s29  ;;  %v3612_v30 = vpop.permute.xlu1 %3611  ;;  %v3332_v1 = vpop.permute.xlu0 %3331  ;;  %3783 = vrot.lane.b32.xlu1 %v7948_v51, %s5599_s27 }
 0x8ed   : > { %v3336_v16 = vsel %vm1641_vm3, %v3324_v11, %v3332_v1  ;;  %v3340_v44 = vsel %vm1641_vm3, %v3332_v1, %v3324_v11  ;;  %4203 = vmatprep.mubr.f32.mxu0 %v4124_v50 }
 0x8ee   : > { %v3347_v21 = vmul.f32 %v9194_v36, %v3336_v16  ;;  %v3348_v48 = vmul.f32 %v9195_v29, %v3340_v44  ;;  %3438 = vmatmul.mubr.f32.gmra.mrb[34].mxu1 %v4651_v31  ;;  %v4653_v29 = vld [vmem:[%s9097_s7 + $0x160] sm:$0xff] }
 0x8ef   : > { %3443 = vmatprep.mubr.f32.mxu1 %v4655_v47 }
 0x8f0   : > { %v5064_v45 = vpack.c.bf16 %v3347_v21, %v3345_v54  ;;  %3813 = vrot.lane.b32.xlu0 %v7914_v61, %s5600_s29  ;;  %v3614_v55 = vpop.permute.xlu0 %3613  ;;  %v3620_v58 = vpop.permute.xlu1 %3619  ;;  %v5062_v3 = vpack.c.bf16 %v3348_v48, %v3346_v14  ;;  %3803 = vrot.lane.b32.xlu1 %v7891_v8, %s5600_s29 }
 0x8f1   : > { %v3627_v32 = vsel %vm1354_vm10, %v3612_v30, %v3620_v58  ;;  %v3631_v35 = vsel %vm1354_vm10, %v3620_v58, %v3612_v30 }
 0x8f2   : > { %3444 = vmatmul.mubr.f32.gmra.mrb[36].mxu1 %v4654_v59  ;;  %5063 = vmatprep.subr.bf16.mxu1 %v5062_v3  ;;  %v3635_v37 = vmul.f32 %v3631_v35, %v6316_v13  ;;  %v3636_v40 = vmul.f32 %v3627_v32, %v6320_v26 }
 0x8f3   : > { %5065 = vmatpush1.bf16.msra.mxu1 %v5064_v45  ;;  %3514 = vmatprep.mubr.f32.mxu1 %v9196_v23 }
 0x8f4   : > { %3809 = vrot.lane.b32.xlu0 %v7951_v10, %s5600_s29  ;;  %v3622_v17 = vpop.permute.xlu0 %3621  ;;  %3811 = vrot.lane.b32.xlu1 %v7905_v38, %s5600_s29 }
 0x8f5   : > { %v3628_v12 = vsel %vm1354_vm10, %v3614_v55, %v3622_v17  ;;  %v3632_v25 = vsel %vm1354_vm10, %v3622_v17, %v3614_v55 }
 0x8f6   : > { %v3637_v62 = vmul.f32 %v3632_v25, %v6316_v13  ;;  %v3638_v33 = vmul.f32 %v3628_v12, %v6320_v26  ;;  %4657 = vmatmul.mubr.msk.f32.vlgmr.msra.gmra.mrb[30].mxu1 %vm1134_vm1, %v4647_v63 }
 0x8f7   : > { %3520 = vmatprep.mubr.f32.mxu1 %v9196_v23 }
 0x8f8   : > { %v5068_v36 = vpack.c.bf16 %v3637_v62, %v3635_v37  ;;  %3817 = vrot.lane.b32.xlu0 %v7961_v49, %s5600_s29  ;;  %v5066_v24 = vpack.c.bf16 %v3638_v33, %v3636_v40  ;;  %3807 = vrot.lane.b32.xlu1 %v7938_v5, %s5600_s29 }
 0x8fa   : > { %4658 = vmatmul.mubr.msk.f32.gmra.mrb[32].mxu1 %vm1134_vm1, %v4650_v7  ;;  %5067 = vmatprep.subr.bf16.mxu0 %v5066_v24 }
 0x8fb   : > { %5069 = vmatpush1.bf16.msra.mxu0 %v5068_v36  ;;  %3526 = vmatprep.mubr.f32.mxu1 %v9196_v23 }
 0x8fc   : > { %3837 = vrot.lane.b32.xlu0 %v7902_v46, %s5601_s19  ;;  %3815 = vrot.lane.b32.xlu1 %v7948_v51, %s5600_s29 }
 0x8fe   : > { %4659 = vmatmul.mubr.msk.f32.gmra.mrb[34].mxu1 %vm1134_vm1, %v4653_v29 }
 0x8ff   : > { %3532 = vmatprep.mubr.f32.mxu1 %v9196_v23 }
 0x900   : > { %3845 = vrot.lane.b32.xlu0 %v7914_v61, %s5601_s19  ;;  %3835 = vrot.lane.b32.xlu1 %v7891_v8, %s5601_s19 }
 0x901   : > { %v8379_v53 = vpop.permute.xlu1 %3540 }
 0x902   : > { %4660 = vmatmul.mubr.msk.f32.gmra.mrb[36].mxu1 %vm1134_vm1, %v4656_v22 }
 0x904   : > { %3841 = vrot.lane.b32.xlu0 %v7951_v10, %s5601_s19  ;;  %3843 = vrot.lane.b32.xlu1 %v7905_v38, %s5601_s19 }
 0x905   : > { %v8386_v6 = vpop.permute.xlu0 %3544 }
 0x906   : > { %v8388_v52 = vpop.permute.xlu1 %3564 }
 0x908   : > { %3849 = vrot.lane.b32.xlu0 %v7961_v49, %s5601_s19  ;;  %3839 = vrot.lane.b32.xlu1 %v7938_v5, %s5601_s19 }
 0x909   : > { %v3616_v0 = vpop.permute.xlu0 %3615 }
 0x90a   : > { %v8394_v11 = vpop.permute.xlu1 %3568 }
 0x90c   : > { %3847 = vrot.lane.b32.xlu1 %v7948_v51, %s5601_s19 }
 0x90d   : > { %v3624_v2 = vpop.permute.xlu0 %3623 }
 0x90e   : > { %v3618_v9 = vpop.permute.xlu1 %3617  ;;  %v3629_v57 = vsel %vm1354_vm10, %v3616_v0, %v3624_v2  ;;  %v3633_v56 = vsel %vm1354_vm10, %v3624_v2, %v3616_v0 }
 0x90f   : > { %v3639_v16 = vmul.f32 %v3633_v56, %v6316_v13  ;;  %v3640_v44 = vmul.f32 %v3629_v57, %v6320_v26 }
 0x911   : > { %v8402_v31 = vpop.permute.xlu0 %3548 }
 0x912   : > { %v3626_v30 = vpop.permute.xlu1 %3625 }
 0x913   : > { %v3630_v1 = vsel %vm1354_vm10, %v3618_v9, %v3626_v30  ;;  %v3634_v47 = vsel %vm1354_vm10, %v3626_v30, %v3618_v9 }
 0x914   : > { %v3641_v54 = vmul.f32 %v3634_v47, %v6316_v13  ;;  %v3642_v14 = vmul.f32 %v3630_v1, %v6320_v26 }
 0x916   : > { %v5072_v21 = vpack.c.bf16 %v3641_v54, %v3639_v16  ;;  %v8412_v48 = vpop.permute.xlu0 %3572  ;;  %v8414_v59 = vpop.permute.xlu1 %3552  ;;  %v5070_v45 = vpack.c.bf16 %v3642_v14, %v3640_v44 }
 0x918   : > { %5071 = vmatprep.subr.bf16.mxu0 %v5070_v45 }
 0x919   : > { %5073 = vmatpush1.bf16.msra.mxu0 %v5072_v21 }
 0x91a   : > { %v3646_v55 = vpop.permute.xlu0 %3645 }
 0x91b   : > { %v8416_v58 = vpop.permute.xlu1 %3576 }
 0x91e   : > { %v3654_v3 = vpop.permute.xlu0 %3653 }
 0x91f   : > { %v3644_v32 = vpop.permute.xlu1 %3643  ;;  %v3660_v35 = vsel %vm1395_vm11, %v3646_v55, %v3654_v3  ;;  %v3664_v63 = vsel %vm1395_vm11, %v3654_v3, %v3646_v55 }
 0x920   : > { %v3669_v40 = vmul.f32 %v3664_v63, %v6369_v27  ;;  %v3670_v62 = vmul.f32 %v3660_v35, %v6362_v34 }
 0x922   : > { %v3650_v17 = vpop.permute.xlu0 %3649 }
 0x923   : > { %v3652_v12 = vpop.permute.xlu1 %3651 }
 0x924   : > { %v3659_v25 = vsel %vm1395_vm11, %v3644_v32, %v3652_v12  ;;  %v3663_v37 = vsel %vm1395_vm11, %v3652_v12, %v3644_v32 }
 0x925   : > { %v3667_v33 = vmul.f32 %v3663_v37, %v6369_v27  ;;  %v3668_v7 = vmul.f32 %v3659_v25, %v6362_v34 }
 0x926   : > { %v3658_v36 = vpop.permute.xlu0 %3657 }
 0x927   : > { %v5076_v24 = vpack.c.bf16 %v3669_v40, %v3667_v33  ;;  %v3648_v29 = vpop.permute.xlu1 %3647  ;;  %v5074_v22 = vpack.c.bf16 %v3670_v62, %v3668_v7  ;;  %v3662_v0 = vsel %vm1395_vm11, %v3650_v17, %v3658_v36  ;;  %v3666_v50 = vsel %vm1395_vm11, %v3658_v36, %v3650_v17 }
 0x928   : > { %v3673_v30 = vmul.f32 %v3666_v50, %v6369_v27  ;;  %v3674_v1 = vmul.f32 %v3662_v0, %v6362_v34 }
 0x929   : > { %5075 = vmatprep.subr.bf16.mxu0 %v5074_v22 }
 0x92a   : > { %v3678_v2 = vpop.permute.xlu0 %3677  ;;  %5077 = vmatpush1.bf16.msra.mxu0 %v5076_v24 }
 0x92b   : > { %v3656_v9 = vpop.permute.xlu1 %3655 }
 0x92c   : > { %v3661_v57 = vsel %vm1395_vm11, %v3648_v29, %v3656_v9  ;;  %v3665_v56 = vsel %vm1395_vm11, %v3656_v9, %v3648_v29 }
 0x92d   : > { %v3671_v47 = vmul.f32 %v3665_v56, %v6369_v27  ;;  %v3672_v16 = vmul.f32 %v3661_v57, %v6362_v34 }
 0x92e   : > { %v3686_v44 = vpop.permute.xlu0 %3685 }
 0x92f   : > { %v5080_v54 = vpack.c.bf16 %v3673_v30, %v3671_v47  ;;  %v3676_v14 = vpop.permute.xlu1 %3675  ;;  %v5078_v21 = vpack.c.bf16 %v3674_v1, %v3672_v16  ;;  %v3692_v45 = vsel %vm1436_vm12, %v3678_v2, %v3686_v44  ;;  %v3696_v55 = vsel %vm1436_vm12, %v3686_v44, %v3678_v2 }
 0x930   : > { %v3701_v17 = vmul.f32 %v3696_v55, %v6409_v42  ;;  %v3702_v12 = vmul.f32 %v3692_v45, %v6402_v15 }
 0x931   : > { %5079 = vmatprep.subr.bf16.mxu0 %v5078_v21 }
 0x932   : > { %v3682_v3 = vpop.permute.xlu0 %3681  ;;  %5081 = vmatpush1.bf16.msra.mxu0 %v5080_v54 }
 0x933   : > { %v3684_v32 = vpop.permute.xlu1 %3683 }
 0x934   : > { %v3691_v35 = vsel %vm1436_vm12, %v3676_v14, %v3684_v32  ;;  %v3695_v63 = vsel %vm1436_vm12, %v3684_v32, %v3676_v14 }
 0x935   : > { %v3699_v25 = vmul.f32 %v3695_v63, %v6409_v42  ;;  %v3700_v37 = vmul.f32 %v3691_v35, %v6402_v15 }
 0x936   : > { %v3690_v40 = vpop.permute.xlu0 %3689 }
 0x937   : > { %v5084_v62 = vpack.c.bf16 %v3701_v17, %v3699_v25  ;;  %v3680_v33 = vpop.permute.xlu1 %3679  ;;  %v5082_v7 = vpack.c.bf16 %v3702_v12, %v3700_v37  ;;  %v3694_v36 = vsel %vm1436_vm12, %v3682_v3, %v3690_v40  ;;  %v3698_v24 = vsel %vm1436_vm12, %v3690_v40, %v3682_v3 }
 0x938   : > { %v3705_v2 = vmul.f32 %v3698_v24, %v6409_v42  ;;  %v3706_v9 = vmul.f32 %v3694_v36, %v6402_v15 }
 0x939   : > { %5083 = vmatprep.subr.bf16.mxu0 %v5082_v7 }
 0x93a   : > { %v3710_v29 = vpop.permute.xlu0 %3709  ;;  %5085 = vmatpush1.bf16.msra.mxu0 %v5084_v62 }
 0x93b   : > { %v3688_v22 = vpop.permute.xlu1 %3687 }
 0x93c   : > { %v3693_v0 = vsel %vm1436_vm12, %v3680_v33, %v3688_v22  ;;  %v3697_v50 = vsel %vm1436_vm12, %v3688_v22, %v3680_v33 }
 0x93d   : > { %v3703_v57 = vmul.f32 %v3697_v50, %v6409_v42  ;;  %v3704_v56 = vmul.f32 %v3693_v0, %v6402_v15 }
 0x93e   : > { %v3718_v30 = vpop.permute.xlu0 %3717 }
 0x93f   : > { %v5088_v1 = vpack.c.bf16 %v3705_v2, %v3703_v57  ;;  %v3708_v47 = vpop.permute.xlu1 %3707  ;;  %v5086_v16 = vpack.c.bf16 %v3706_v9, %v3704_v56  ;;  %v3724_v44 = vsel %vm1477_vm13, %v3710_v29, %v3718_v30  ;;  %v3728_v54 = vsel %vm1477_vm13, %v3718_v30, %v3710_v29 }
 0x940   : > { %v3733_v3 = vmul.f32 %v3728_v54, %v6473_v20  ;;  %v3734_v32 = vmul.f32 %v3724_v44, %v6443_v43  ;;  %v5098_v30 = vpack.c.bf16 %v7914_v61, %v7905_v38  ;;  %v5100_v54 = vpack.c.bf16 %v7902_v46, %v7891_v8 }
 0x941   : > { %5087 = vmatprep.subr.bf16.mxu0 %v5086_v16  ;;  %v5102_v38 = vpack.c.bf16 %v7961_v49, %v7948_v51  ;;  %v5104_v8 = vpack.c.bf16 %v7951_v10, %v7938_v5 }
 0x942   : > { %v3714_v14 = vpop.permute.xlu0 %3713  ;;  %5089 = vmatpush1.bf16.msra.mxu0 %v5088_v1 }
 0x943   : > { %v3716_v21 = vpop.permute.xlu1 %3715 }
 0x944   : > { %v3723_v45 = vsel %vm1477_vm13, %v3708_v47, %v3716_v21  ;;  %v3727_v55 = vsel %vm1477_vm13, %v3716_v21, %v3708_v47 }
 0x945   : > { %v3731_v35 = vmul.f32 %v3727_v55, %v6473_v20  ;;  %v3732_v63 = vmul.f32 %v3723_v45, %v6443_v43 }
 0x946   : > { %v3722_v17 = vpop.permute.xlu0 %3721 }
 0x947   : > { %v5092_v12 = vpack.c.bf16 %v3733_v3, %v3731_v35  ;;  %v3712_v25 = vpop.permute.xlu1 %3711  ;;  %v5090_v37 = vpack.c.bf16 %v3734_v32, %v3732_v63  ;;  %v3726_v40 = vsel %vm1477_vm13, %v3714_v14, %v3722_v17  ;;  %v3730_v62 = vsel %vm1477_vm13, %v3722_v17, %v3714_v14 }
 0x948   : > { %v3737_v29 = vmul.f32 %v3730_v62, %v6473_v20  ;;  %v3738_v22 = vmul.f32 %v3726_v40, %v6443_v43 }
 0x949   : > { %5091 = vmatprep.subr.bf16.mxu0 %v5090_v37 }
 0x94a   : > { %v3742_v33 = vpop.permute.xlu0 %3741  ;;  %5093 = vmatpush1.bf16.msra.mxu0 %v5092_v12 }
 0x94b   : > { %v3720_v7 = vpop.permute.xlu1 %3719 }
 0x94c   : > { %v3725_v36 = vsel %vm1477_vm13, %v3712_v25, %v3720_v7  ;;  %v3729_v24 = vsel %vm1477_vm13, %v3720_v7, %v3712_v25 }
 0x94d   : > { %v3735_v0 = vmul.f32 %v3729_v24, %v6473_v20  ;;  %v3736_v50 = vmul.f32 %v3725_v36, %v6443_v43 }
 0x94e   : > { %v3750_v2 = vpop.permute.xlu0 %3749 }
 0x94f   : > { %v5096_v9 = vpack.c.bf16 %v3737_v29, %v3735_v0  ;;  %v3740_v57 = vpop.permute.xlu1 %3739  ;;  %v5094_v56 = vpack.c.bf16 %v3738_v22, %v3736_v50  ;;  %v3760_v16 = vsel %vm1518_vm14, %v3750_v2, %v3742_v33  ;;  %v3756_v45 = vsel %vm1518_vm14, %v3742_v33, %v3750_v2 }
 0x950   : > { %v3766_v55 = vmul.f32 %v3760_v16, %v6509_v41  ;;  %v3765_v35 = vmul.f32 %v3756_v45, %v6524_v60 }
 0x951   : > { %5095 = vmatprep.subr.bf16.mxu0 %v5094_v56 }
 0x952   : > { %v3746_v1 = vpop.permute.xlu0 %3745  ;;  %5097 = vmatpush1.bf16.msra.mxu0 %v5096_v9 }
 0x953   : > { %v3748_v47 = vpop.permute.xlu1 %3747  ;;  %5099 = vmatprep.subr.bf16.mxu0 %v5098_v30 }
 0x954   : > { %v3759_v44 = vsel %vm1518_vm14, %v3748_v47, %v3740_v57  ;;  %v3755_v14 = vsel %vm1518_vm14, %v3740_v57, %v3748_v47 }
 0x955   : > { %v3764_v21 = vmul.f32 %v3759_v44, %v6509_v41  ;;  %v3763_v32 = vmul.f32 %v3755_v14, %v6524_v60 }
 0x956   : > { %v3754_v61 = vpop.permute.xlu0 %3753  ;;  %5101 = vmatpush1.bf16.msra.mxu0 %v5100_v54 }
 0x957   : > { %v3744_v3 = vpop.permute.xlu1 %3743  ;;  %5103 = vmatprep.subr.bf16.mxu0 %v5102_v38  ;;  %v5106_v46 = vpack.c.bf16 %v3766_v55, %v3764_v21  ;;  %v3758_v51 = vsel %vm1518_vm14, %v3746_v1, %v3754_v61  ;;  %v3762_v49 = vsel %vm1518_vm14, %v3754_v61, %v3746_v1  ;;  %v5108_v12 = vpack.c.bf16 %v3765_v35, %v3763_v32 }
 0x958   : > { %v3769_v10 = vmul.f32 %v3758_v51, %v6524_v60  ;;  %v3770_v37 = vmul.f32 %v3762_v49, %v6509_v41 }
 0x95a   : > { %v3774_v63 = vpop.permute.xlu0 %3773  ;;  %5105 = vmatpush1.bf16.msra.mxu0 %v5104_v8 }
 0x95b   : > { %v3752_v17 = vpop.permute.xlu1 %3751  ;;  %5107 = vmatprep.subr.bf16.mxu0 %v5106_v46 }
 0x95c   : > { %v3757_v25 = vsel %vm1518_vm14, %v3744_v3, %v3752_v17  ;;  %v3761_v5 = vsel %vm1518_vm14, %v3752_v17, %v3744_v3 }
 0x95d   : > { %v3767_v40 = vmul.f32 %v3757_v25, %v6524_v60  ;;  %v3768_v62 = vmul.f32 %v3761_v5, %v6509_v41 }
 0x95e   : > { %v3782_v33 = vpop.permute.xlu0 %3781  ;;  %5109 = vmatpush1.bf16.msra.mxu0 %v5108_v12 }
 0x95f   : > { %v5112_v7 = vpack.c.bf16 %v3769_v10, %v3767_v40  ;;  %v3772_v36 = vpop.permute.xlu1 %3771  ;;  %v5110_v24 = vpack.c.bf16 %v3770_v37, %v3768_v62  ;;  %v3788_v29 = vsel %vm1559_vm15, %v3774_v63, %v3782_v33  ;;  %v3792_v22 = vsel %vm1559_vm15, %v3782_v33, %v3774_v63 }
 0x960   : > { %v3797_v57 = vmul.f32 %v3788_v29, %v9178_v28  ;;  %v3798_v56 = vmul.f32 %v3792_v22, %v9176_v18 }
 0x961   : > { %5111 = vmatprep.subr.bf16.mxu0 %v5110_v24 }
 0x962   : > { %v3778_v0 = vpop.permute.xlu0 %3777  ;;  %5113 = vmatpush1.bf16.msra.mxu0 %v5112_v7 }
 0x963   : > { %v3780_v50 = vpop.permute.xlu1 %3779 }
 0x964   : > { %v3787_v2 = vsel %vm1559_vm15, %v3772_v36, %v3780_v50  ;;  %v3791_v9 = vsel %vm1559_vm15, %v3780_v50, %v3772_v36 }
 0x965   : > { %v3795_v30 = vmul.f32 %v3787_v2, %v9178_v28  ;;  %v3796_v1 = vmul.f32 %v3791_v9, %v9176_v18 }
 0x966   : > { %v3786_v47 = vpop.permute.xlu0 %3785 }
 0x967   : > { %v5116_v16 = vpack.c.bf16 %v3797_v57, %v3795_v30  ;;  %v3776_v44 = vpop.permute.xlu1 %3775  ;;  %v5114_v54 = vpack.c.bf16 %v3798_v56, %v3796_v1  ;;  %v3790_v14 = vsel %vm1559_vm15, %v3778_v0, %v3786_v47  ;;  %v3794_v21 = vsel %vm1559_vm15, %v3786_v47, %v3778_v0 }
 0x968   : > { %v3801_v3 = vmul.f32 %v3790_v14, %v9178_v28  ;;  %v3802_v32 = vmul.f32 %v3794_v21, %v9176_v18 }
 0x969   : > { %5115 = vmatprep.subr.bf16.mxu0 %v5114_v54 }
 0x96a   : > { %v3806_v38 = vpop.permute.xlu0 %3805  ;;  %5117 = vmatpush1.bf16.msra.mxu0 %v5116_v16 }
 0x96b   : > { %v3784_v61 = vpop.permute.xlu1 %3783 }
 0x96c   : > { %v3789_v45 = vsel %vm1559_vm15, %v3776_v44, %v3784_v61  ;;  %v3793_v55 = vsel %vm1559_vm15, %v3784_v61, %v3776_v44 }
 0x96d   : > { %v3799_v8 = vmul.f32 %v3789_v45, %v9178_v28  ;;  %v3800_v46 = vmul.f32 %v3793_v55, %v9176_v18  ;;  %v4123_v55 = vld [vmem:[#allocation7] sm:$0xff] }
 0x96e   : > { %v3814_v35 = vpop.permute.xlu0 %3813 }
 0x96f   : > { %v5120_v51 = vpack.c.bf16 %v3801_v3, %v3799_v8  ;;  %v3804_v49 = vpop.permute.xlu1 %3803  ;;  %v5118_v63 = vpack.c.bf16 %v3802_v32, %v3800_v46  ;;  %v3820_v17 = vsel %vm1600_vm2, %v3806_v38, %v3814_v35  ;;  %v3824_v12 = vsel %vm1600_vm2, %v3814_v35, %v3806_v38  ;;  %v8578_v46 = vld [vmem:[#allocation4 + $0x10] ss:$0 sm:$0xff] }
 0x970   : > { %v3829_v40 = vmul.f32 %v3820_v17, %v9193_v19  ;;  %v3830_v62 = vmul.f32 %v3824_v12, %v9192_v4  ;;  %9197 = vst [vmem:[#allocation29_spill] sm:$0xff] %v8578_v46 }
 0x971   : > { %5119 = vmatprep.subr.bf16.mxu0 %v5118_v63 }
 0x972   : > { %v3810_v25 = vpop.permute.xlu0 %3809  ;;  %5121 = vmatpush1.bf16.msra.mxu0 %v5120_v51  ;;  %v8581_v51 = vld [vmem:[#allocation4 + $0x18] ss:$0 sm:$0xff] }
 0x973   : > { %v3812_v5 = vpop.permute.xlu1 %3811  ;;  %9198 = vst [vmem:[#allocation21_spill] sm:$0xff] %v8581_v51 }
 0x974   : > { %v3819_v10 = vsel %vm1600_vm2, %v3804_v49, %v3812_v5  ;;  %v3823_v37 = vsel %vm1600_vm2, %v3812_v5, %v3804_v49 }
 0x975   : > { %v3827_v33 = vmul.f32 %v3819_v10, %v9193_v19  ;;  %v3828_v7 = vmul.f32 %v3823_v37, %v9192_v4 }
 0x976   : > { %v3818_v36 = vpop.permute.xlu0 %3817 }
 0x977   : > { %v5124_v24 = vpack.c.bf16 %v3829_v40, %v3827_v33  ;;  %v3808_v29 = vpop.permute.xlu1 %3807  ;;  %v5122_v22 = vpack.c.bf16 %v3830_v62, %v3828_v7  ;;  %v3822_v0 = vsel %vm1600_vm2, %v3810_v25, %v3818_v36  ;;  %v3826_v50 = vsel %vm1600_vm2, %v3818_v36, %v3810_v25 }
 0x978   : > { %v3833_v30 = vmul.f32 %v3822_v0, %v9193_v19  ;;  %v3834_v1 = vmul.f32 %v3826_v50, %v9192_v4 }
 0x979   : > { %5123 = vmatprep.subr.bf16.mxu0 %v5122_v22 }
 0x97a   : > { %v3838_v2 = vpop.permute.xlu0 %3837  ;;  %5125 = vmatpush1.bf16.msra.mxu0 %v5124_v24 }
 0x97b   : > { %v3816_v9 = vpop.permute.xlu1 %3815 }
 0x97c   : > { %v3821_v57 = vsel %vm1600_vm2, %v3808_v29, %v3816_v9  ;;  %v3825_v56 = vsel %vm1600_vm2, %v3816_v9, %v3808_v29 }
 0x97d   : > { %v3831_v47 = vmul.f32 %v3821_v57, %v9193_v19  ;;  %v3832_v16 = vmul.f32 %v3825_v56, %v9192_v4 }
 0x97e   : > { %v3846_v44 = vpop.permute.xlu0 %3845 }
 0x97f   : > { %v5128_v54 = vpack.c.bf16 %v3833_v30, %v3831_v47  ;;  %v3836_v14 = vpop.permute.xlu1 %3835  ;;  %v5126_v21 = vpack.c.bf16 %v3834_v1, %v3832_v16  ;;  %v3852_v38 = vsel %vm1641_vm3, %v3838_v2, %v3846_v44  ;;  %v3856_v61 = vsel %vm1641_vm3, %v3846_v44, %v3838_v2 }
 0x980   : > { %v3861_v35 = vmul.f32 %v8578_v46, %v3852_v38  ;;  %v3862_v49 = vmul.f32 %v8581_v51, %v3856_v61 }
 0x981   : > { %5127 = vmatprep.subr.bf16.mxu0 %v5126_v21 }
 0x982   : > { %v3842_v45 = vpop.permute.xlu0 %3841  ;;  %5129 = vmatpush1.bf16.msra.mxu0 %v5128_v54 }
 0x983   : > { %v3844_v3 = vpop.permute.xlu1 %3843 }
 0x984   : > { %v3851_v32 = vsel %vm1641_vm3, %v3836_v14, %v3844_v3  ;;  %v3855_v8 = vsel %vm1641_vm3, %v3844_v3, %v3836_v14 }
 0x985   : > { %v3859_v63 = vmul.f32 %v8578_v46, %v3851_v32  ;;  %v3860_v17 = vmul.f32 %v8581_v51, %v3855_v8  ;;  %4204 = vmatmul.mubr.f32.vlgmr.msra.gmra.mrb[30].mxu0 %v4123_v55 }
 0x986   : > { %v3850_v25 = vpop.permute.xlu0 %3849 }
 0x987   : > { %v5132_v12 = vpack.c.bf16 %v3861_v35, %v3859_v63  ;;  %v3840_v5 = vpop.permute.xlu1 %3839  ;;  %v5130_v10 = vpack.c.bf16 %v3862_v49, %v3860_v17  ;;  %v3854_v37 = vsel %vm1641_vm3, %v3842_v45, %v3850_v25  ;;  %v3858_v40 = vsel %vm1641_vm3, %v3850_v25, %v3842_v45 }
 0x988   : > { %v3865_v36 = vmul.f32 %v8578_v46, %v3854_v37  ;;  %v3866_v24 = vmul.f32 %v8581_v51, %v3858_v40 }
 0x989   : > { %5131 = vmatprep.subr.bf16.mxu0 %v5130_v10 }
 0x98a   : > { %5133 = vmatpush1.bf16.msra.mxu0 %v5132_v12 }
 0x98b   : > { %v3848_v62 = vpop.permute.xlu1 %3847 }
 0x98c   : > { %v3853_v33 = vsel %vm1641_vm3, %v3840_v5, %v3848_v62  ;;  %v3857_v7 = vsel %vm1641_vm3, %v3848_v62, %v3840_v5 }
 0x98d   : > { %v3863_v29 = vmul.f32 %v8578_v46, %v3853_v33  ;;  %v3864_v22 = vmul.f32 %v8581_v51, %v3857_v7 }
 0x98f   : > { %v5136_v0 = vpack.c.bf16 %v3865_v36, %v3863_v29  ;;  %v5134_v50 = vpack.c.bf16 %v3866_v24, %v3864_v22  ;;  %v5612_v29 = vmov 14  }
 0x990   : > { %5376 = vset.pattern.permute.xlu1 %v5612_v29  ;;  %5377 = vset.pattern.permute.xlu0 %v5612_v29 }
 0x991   : > { %5135 = vmatprep.subr.bf16.mxu0 %v5134_v50  ;;  %v5443_v50 = vld [vmem:[%s9099_s9] sm:$0xff] }
 0x992   : > { %5137 = vmatpush1.bf16.msra.mxu0 %v5136_v0 }
 0x9c9   : > { %v3516_v2 = vpop.f32.mrb[30].mxu1 }
 0x9ca   : > { %v3555_v9 = vmul.f32 %v8379_v53, %v3516_v2  ;;  %v3518_v57 = vpop.f32.mrb[31].mxu1  ;;  %v5444_v2 = vld [vmem:[%s9099_s9 + $0x8] sm:$0xff] }
 0x9cb   : > { %v3556_v45 = vmul.f32 %v8379_v53, %v3518_v57 }
 0x9cc   : > { %v3579_v56 = vadd.f32 %v8388_v52, %v3555_v9 }
 0x9cd   : > { %v3522_v30 = vpop.f32.mrb[32].mxu1  ;;  %v3580_v55 = vadd.f32 %v8388_v52, %v3556_v45 }
 0x9ce   : > { %v8600_v1 = vmax.f32 %v3579_v56, 0.0  ;;  %v3557_v47 = vmul.f32 %v8386_v6, %v3522_v30  ;;  %v3524_v16 = vpop.f32.mrb[33].mxu1  ;;  %v5613_v56 = vmov 15   ;;  %v5614_v30 = vmov 16  }
 0x9cf   : > { %v3558_v3 = vmul.f32 %v8386_v6, %v3524_v16  ;;  %v8627_v32 = vmax.f32 %v3580_v55, 0.0 }
 0x9d0   : > { %v3581_v44 = vadd.f32 %v8394_v11, %v3557_v47  ;;  %3867 = vrot.lane.b32.xlu1 %v8600_v1, %s5594_s21 }
 0x9d1   : > { %v3528_v54 = vpop.f32.mrb[34].mxu1  ;;  %v3582_v53 = vadd.f32 %v8394_v11, %v3558_v3 }
 0x9d2   : > { %v8606_v14 = vmax.f32 %v3581_v44, 0.0  ;;  %v3530_v21 = vpop.f32.mrb[35].mxu1  ;;  %v3559_v6 = vmul.f32 %v8402_v31, %v3528_v54 }
 0x9d3   : > { %v8634_v8 = vmax.f32 %v3582_v53, 0.0  ;;  %v3560_v17 = vmul.f32 %v8402_v31, %v3530_v21  ;;  %v5615_v53 = vmov 17  }
 0x9d4   : > { %3899 = vrot.lane.b32.xlu1 %v8600_v1, %s5595_s23  ;;  %3869 = vrot.lane.b32.xlu0 %v8606_v14, %s5594_s21  ;;  %v3583_v52 = vadd.f32 %v8412_v48, %v3559_v6 }
 0x9d5   : > { %v3534_v38 = vpop.f32.mrb[36].mxu1  ;;  %v3584_v12 = vadd.f32 %v8412_v48, %v3560_v17  ;;  %v4129_v48 = vld [vmem:[#allocation7 + $0x30] sm:$0xff] }
 0x9d6   : > { %v3536_v61 = vpop.f32.mrb[37].mxu1  ;;  %v3561_v11 = vmul.f32 %v8414_v59, %v3534_v38  ;;  %v8655_v35 = vmax.f32 %v3583_v52, 0.0  ;;  %4209 = vmatprep.mubr.f32.mxu0 %v4129_v48 }
 0x9d7   : > { %v3562_v25 = vmul.f32 %v8414_v59, %v3536_v61  ;;  %v8683_v5 = vmax.f32 %v3584_v12, 0.0  ;;  %v4128_v59 = vld [vmem:[#allocation7 + $0x28] sm:$0xff] }
 0x9d8   : > { %3931 = vrot.lane.b32.xlu1 %v8600_v1, %s5596_s24  ;;  %3901 = vrot.lane.b32.xlu0 %v8606_v14, %s5595_s23  ;;  %v3585_v49 = vadd.f32 %v8416_v58, %v3561_v11 }
 0x9d9   : > { %v3586_v31 = vadd.f32 %v8416_v58, %v3562_v25  ;;  %4210 = vmatmul.mubr.f32.gmra.mrb[32].mxu0 %v4128_v59  ;;  %v4126_v58 = vld [vmem:[#allocation7 + $0x18] sm:$0xff] }
 0x9da   : > { %v8662_v63 = vmax.f32 %v3585_v49, 0.0  ;;  %4280 = vmatprep.mubr.f32.mxu0 %v4126_v58 }
 0x9db   : > { %v8690_v10 = vmax.f32 %v3586_v31, 0.0 }
 0x9dc   : > { %3963 = vrot.lane.b32.xlu1 %v8600_v1, %s5597_s25  ;;  %3933 = vrot.lane.b32.xlu0 %v8606_v14, %s5596_s24 }
 0x9e0   : > { %3995 = vrot.lane.b32.xlu1 %v8600_v1, %s5598_s26  ;;  %3965 = vrot.lane.b32.xlu0 %v8606_v14, %s5597_s25 }
 0x9e4   : > { %3875 = vrot.lane.b32.xlu1 %v8627_v32, %s5594_s21  ;;  %3997 = vrot.lane.b32.xlu0 %v8606_v14, %s5598_s26 }
 0x9e8   : > { %3907 = vrot.lane.b32.xlu1 %v8627_v32, %s5595_s23  ;;  %3877 = vrot.lane.b32.xlu0 %v8634_v8, %s5594_s21 }
 0x9ec   : > { %3939 = vrot.lane.b32.xlu1 %v8627_v32, %s5596_s24  ;;  %3909 = vrot.lane.b32.xlu0 %v8634_v8, %s5595_s23 }
 0x9f0   : > { %3971 = vrot.lane.b32.xlu1 %v8627_v32, %s5597_s25  ;;  %3941 = vrot.lane.b32.xlu0 %v8634_v8, %s5596_s24 }
 0x9f4   : > { %4003 = vrot.lane.b32.xlu1 %v8627_v32, %s5598_s26  ;;  %3973 = vrot.lane.b32.xlu0 %v8634_v8, %s5597_s25 }
 0x9f8   : > { %3871 = vrot.lane.b32.xlu1 %v8655_v35, %s5594_s21  ;;  %4005 = vrot.lane.b32.xlu0 %v8634_v8, %s5598_s26 }
 0x9fc   : > { %3903 = vrot.lane.b32.xlu1 %v8655_v35, %s5595_s23  ;;  %3873 = vrot.lane.b32.xlu0 %v8662_v63, %s5594_s21 }
 0xa00   : > { %3935 = vrot.lane.b32.xlu1 %v8655_v35, %s5596_s24  ;;  %3905 = vrot.lane.b32.xlu0 %v8662_v63, %s5595_s23 }
 0xa04   : > { %3967 = vrot.lane.b32.xlu1 %v8655_v35, %s5597_s25  ;;  %3937 = vrot.lane.b32.xlu0 %v8662_v63, %s5596_s24 }
 0xa08   : > { %3999 = vrot.lane.b32.xlu1 %v8655_v35, %s5598_s26  ;;  %3969 = vrot.lane.b32.xlu0 %v8662_v63, %s5597_s25 }
 0xa0c   : > { %3879 = vrot.lane.b32.xlu1 %v8683_v5, %s5594_s21  ;;  %4001 = vrot.lane.b32.xlu0 %v8662_v63, %s5598_s26 }
 0xa10   : > { %4027 = vrot.lane.b32.xlu1 %v8600_v1, %s5599_s27  ;;  %3881 = vrot.lane.b32.xlu0 %v8690_v10, %s5594_s21 }
 0xa14   : > { %3911 = vrot.lane.b32.xlu1 %v8683_v5, %s5595_s23  ;;  %4029 = vrot.lane.b32.xlu0 %v8606_v14, %s5599_s27 }
 0xa18   : > { %3943 = vrot.lane.b32.xlu1 %v8683_v5, %s5596_s24  ;;  %3913 = vrot.lane.b32.xlu0 %v8690_v10, %s5595_s23 }
 0xa1c   : > { %3975 = vrot.lane.b32.xlu1 %v8683_v5, %s5597_s25  ;;  %4037 = vrot.lane.b32.xlu0 %v8634_v8, %s5599_s27 }
 0xa20   : > { %3945 = vrot.lane.b32.xlu0 %v8690_v10, %s5596_s24  ;;  %4007 = vrot.lane.b32.xlu1 %v8683_v5, %s5598_s26 }
 0xa24   : > { %4033 = vrot.lane.b32.xlu0 %v8662_v63, %s5599_s27  ;;  %4035 = vrot.lane.b32.xlu1 %v8627_v32, %s5599_s27 }
 0xa28   : > { %3977 = vrot.lane.b32.xlu0 %v8690_v10, %s5597_s25  ;;  %4031 = vrot.lane.b32.xlu1 %v8655_v35, %s5599_s27 }
 0xa2c   : > { %4061 = vrot.lane.b32.xlu0 %v8606_v14, %s5600_s29  ;;  %4039 = vrot.lane.b32.xlu1 %v8683_v5, %s5599_s27 }
 0xa30   : > { %4069 = vrot.lane.b32.xlu0 %v8634_v8, %s5600_s29  ;;  %4059 = vrot.lane.b32.xlu1 %v8600_v1, %s5600_s29 }
 0xa34   : > { %4065 = vrot.lane.b32.xlu0 %v8662_v63, %s5600_s29  ;;  %4067 = vrot.lane.b32.xlu1 %v8627_v32, %s5600_s29 }
 0xa38   : > { %4009 = vrot.lane.b32.xlu0 %v8690_v10, %s5598_s26  ;;  %4063 = vrot.lane.b32.xlu1 %v8655_v35, %s5600_s29  ;;  %s4584_s26 = sshll.u32 %s9216_s16, 1 }
 0xa3c   : > { %4093 = vrot.lane.b32.xlu0 %v8606_v14, %s5601_s19  ;;  %4071 = vrot.lane.b32.xlu1 %v8683_v5, %s5600_s29 }
 0xa40   : > { %4041 = vrot.lane.b32.xlu0 %v8690_v10, %s5599_s27  ;;  %4091 = vrot.lane.b32.xlu1 %v8600_v1, %s5601_s19 }
 0xa42   : > { %v3868_v37 = vpop.permute.xlu1 %3867 }
 0xa44   : > { %4101 = vrot.lane.b32.xlu0 %v8634_v8, %s5601_s19  ;;  %4099 = vrot.lane.b32.xlu1 %v8627_v32, %s5601_s19 }
 0xa46   : > { %v3870_v40 = vpop.permute.xlu0 %3869  ;;  %v8748_v62 = vpop.permute.xlu1 %3899 }
 0xa48   : > { %4073 = vrot.lane.b32.xlu0 %v8690_v10, %s5600_s29  ;;  %4095 = vrot.lane.b32.xlu1 %v8655_v35, %s5601_s19 }
 0xa4a   : > { %v8754_v33 = vpop.permute.xlu0 %3901  ;;  %v8756_v7 = vpop.permute.xlu1 %3931 }
 0xa4c   : > { %4097 = vrot.lane.b32.xlu0 %v8662_v63, %s5601_s19  ;;  %4103 = vrot.lane.b32.xlu1 %v8683_v5, %s5601_s19 }
 0xa4e   : > { %v8762_v36 = vpop.permute.xlu0 %3933  ;;  %v3964_v24 = vpop.permute.xlu1 %3963 }
 0xa50   : > { %4105 = vrot.lane.b32.xlu0 %v8690_v10, %s5601_s19  ;;  %4371 = vperm.xlu1 %5376, %v5443_v50   ;;  %s444_s19 = scalar_lea.vmem %s9100_s10, %s4584_s26 }
 0xa52   : > { %v3966_v22 = vpop.permute.xlu0 %3965  ;;  %v3996_v0 = vpop.permute.xlu1 %3995 }
 0xa54   : > { %4375 = vperm.xlu0 %5377, %v5444_v2   ;;  %5378 = vset.pattern.permute.xlu1 %v5613_v56 }
 0xa55   : > { %4383 = vperm.xlu1 %5378, %v5443_v50  }
 0xa56   : > { %v3998_v9 = vpop.permute.xlu0 %3997  ;;  %v3876_v57 = vpop.permute.xlu1 %3875 }
 0xa57   : > { %v3883_v47 = vsel %vm1354_vm10, %v3868_v37, %v3876_v57  ;;  %v3887_v16 = vsel %vm1354_vm10, %v3876_v57, %v3868_v37 }
 0xa58   : > { %5379 = vset.pattern.permute.xlu0 %v5614_v30  ;;  %v3891_v61 = vmul.f32 %v3887_v16, %v6316_v13  ;;  %v3892_v45 = vmul.f32 %v3883_v47, %v6320_v26 }
 0xa59   : > { %4399 = vperm.xlu0 %5379, %v5443_v50   ;;  %4387 = vperm.xlu1 %5378, %v5444_v2  }
 0xa5a   : > { %v3878_v44 = vpop.permute.xlu0 %3877  ;;  %v8776_v54 = vpop.permute.xlu1 %3907 }
 0xa5b   : > { %v3884_v21 = vsel %vm1354_vm10, %v3870_v40, %v3878_v44  ;;  %v3888_v38 = vsel %vm1354_vm10, %v3878_v44, %v3870_v40 }
 0xa5c   : > { %v3893_v55 = vmul.f32 %v3888_v38, %v6316_v13  ;;  %v3894_v3 = vmul.f32 %v3884_v21, %v6320_v26 }
 0xa5d   : > { %5382 = vset.pattern.permute.xlu0 %v5615_v53  ;;  %5380 = vset.pattern.permute.xlu1 %v5614_v30 }
 0xa5e   : > { %v5140_v6 = vpack.c.bf16 %v3893_v55, %v3891_v61  ;;  %v3910_v52 = vpop.permute.xlu0 %3909  ;;  %v8786_v11 = vpop.permute.xlu1 %3939  ;;  %v5138_v49 = vpack.c.bf16 %v3894_v3, %v3892_v45  ;;  %4403 = vperm.xlu1 %5380, %v5444_v2  }
 0xa5f   : > { %v3951_v17 = vsel %vm1436_vm12, %v8786_v11, %v8756_v7 }
 0xa60   : > { %5139 = vmatprep.subr.bf16.mxu0 %v5138_v49  ;;  %v8799_v48 = vmul.f32 %v3951_v17, %v6409_v42 }
 0xa61   : > { %5141 = vmatpush1.bf16.msra.mxu0 %v5140_v6 }
 0xa62   : > { %v8792_v12 = vpop.permute.xlu0 %3941  ;;  %v3972_v25 = vpop.permute.xlu1 %3971  ;;  %5381 = vset.pattern.permute.xlu1 %v5615_v53 }
 0xa63   : > { %v3952_v31 = vsel %vm1436_vm12, %v8792_v12, %v8762_v36  ;;  %v3979_v58 = vsel %vm1477_vm13, %v3964_v24, %v3972_v25  ;;  %v3983_v37 = vsel %vm1477_vm13, %v3972_v25, %v3964_v24  ;;  %4425 = vperm.xlu1 %5381, %v5443_v50  }
 0xa64   : > { %v8802_v59 = vmul.f32 %v3952_v31, %v6409_v42  ;;  %v8815_v30 = vmul.f32 %v3983_v37, %v6473_v20  ;;  %v8818_v47 = vmul.f32 %v3979_v58, %v6443_v43 }
 0xa66   : > { %v3974_v29 = vpop.permute.xlu0 %3973  ;;  %v4004_v2 = vpop.permute.xlu1 %4003 }
 0xa67   : > { %v3980_v57 = vsel %vm1477_vm13, %v3966_v22, %v3974_v29  ;;  %v3984_v56 = vsel %vm1477_vm13, %v3974_v29, %v3966_v22  ;;  %v4011_v50 = vsel %vm1518_vm14, %v3996_v0, %v4004_v2  ;;  %v4015_v44 = vsel %vm1518_vm14, %v4004_v2, %v3996_v0 }
 0xa68   : > { %v8821_v24 = vmul.f32 %v3984_v56, %v6473_v20  ;;  %v8824_v16 = vmul.f32 %v3980_v57, %v6443_v43  ;;  %v8839_v3 = vmul.f32 %v4011_v50, %v6524_v60  ;;  %v8842_v53 = vmul.f32 %v4015_v44, %v6509_v41 }
 0xa69   : > { %v3916_v44 = vsel %vm1395_vm11, %v8754_v33, %v3910_v52  ;;  %v3920_v22 = vsel %vm1395_vm11, %v3910_v52, %v8754_v33  ;;  %v3919_v33 = vsel %vm1395_vm11, %v8776_v54, %v8748_v62 }
 0xa6a   : > { %v4006_v21 = vpop.permute.xlu0 %4005  ;;  %v3872_v38 = vpop.permute.xlu1 %3871  ;;  %v3926_v61 = vmul.f32 %v3916_v44, %v6362_v34 }
 0xa6b   : > { %v4012_v45 = vsel %vm1518_vm14, %v3998_v9, %v4006_v21  ;;  %v4016_v55 = vsel %vm1518_vm14, %v4006_v21, %v3998_v9 }
 0xa6c   : > { %v8845_v0 = vmul.f32 %v4012_v45, %v6524_v60  ;;  %v8848_v6 = vmul.f32 %v4016_v55, %v6509_v41  ;;  %v3915_v55 = vsel %vm1395_vm11, %v8748_v62, %v8776_v54 }
 0xa6d   : > { %v3924_v52 = vmul.f32 %v3915_v55, %v6362_v34 }
 0xa6e   : > { %v3874_v17 = vpop.permute.xlu0 %3873  ;;  %v3904_v25 = vpop.permute.xlu1 %3903 }
 0xa72   : > { %v3906_v31 = vpop.permute.xlu0 %3905  ;;  %v3936_v58 = vpop.permute.xlu1 %3935 }
 0xa76   : > { %v3938_v37 = vpop.permute.xlu0 %3937  ;;  %v8854_v29 = vpop.permute.xlu1 %3967 }
 0xa7a   : > { %v8856_v2 = vpop.permute.xlu0 %3969  ;;  %v8858_v57 = vpop.permute.xlu1 %3999 }
 0xa7e   : > { %v8860_v56 = vpop.permute.xlu0 %4001  ;;  %v3880_v50 = vpop.permute.xlu1 %3879 }
 0xa7f   : > { %v3885_v21 = vsel %vm1354_vm10, %v3872_v38, %v3880_v50  ;;  %v3889_v45 = vsel %vm1354_vm10, %v3880_v50, %v3872_v38 }
 0xa80   : > { %v3895_v50 = vmul.f32 %v3889_v45, %v6316_v13  ;;  %v3896_v23 = vmul.f32 %v3885_v21, %v6320_v26 }
 0xa82   : > { %v3882_v49 = vpop.permute.xlu0 %3881  ;;  %v8873_v9 = vpop.permute.xlu1 %4027 }
 0xa83   : > { %v3886_v40 = vsel %vm1354_vm10, %v3874_v17, %v3882_v49  ;;  %v3890_v38 = vsel %vm1354_vm10, %v3882_v49, %v3874_v17  ;;  %v3925_v17 = vmul.f32 %v3920_v22, %v6369_v27 }
 0xa84   : > { %v3897_v46 = vmul.f32 %v3890_v38, %v6316_v13  ;;  %v3898_v51 = vmul.f32 %v3886_v40, %v6320_v26  ;;  %v3948_v13 = vsel %vm1436_vm12, %v8762_v36, %v8792_v12  ;;  %v5146_v26 = vpack.c.bf16 %v3926_v61, %v3924_v52 }
 0xa85   : > { %v3923_v40 = vmul.f32 %v3919_v33, %v6369_v27  ;;  %v3958_v12 = vmul.f32 %v3948_v13, %v6402_v15 }
 0xa86   : > { %v5144_v44 = vpack.c.bf16 %v3897_v46, %v3895_v50  ;;  %v8892_v19 = vpop.permute.xlu0 %4029  ;;  %v3912_v4 = vpop.permute.xlu1 %3911  ;;  %v5142_v49 = vpack.c.bf16 %v3898_v51, %v3896_v23  ;;  %v3947_v23 = vsel %vm1436_vm12, %v8756_v7, %v8786_v11 }
 0xa87   : > { %v3917_v62 = vsel %vm1395_vm11, %v3904_v25, %v3912_v4  ;;  %v3921_v46 = vsel %vm1395_vm11, %v3912_v4, %v3904_v25  ;;  %v5148_v36 = vpack.c.bf16 %v3925_v17, %v3923_v40  ;;  %v3956_v11 = vmul.f32 %v3947_v23, %v6402_v15 }
 0xa88   : > { %5143 = vmatprep.subr.bf16.mxu0 %v5142_v49  ;;  %v3927_v4 = vmul.f32 %v3921_v46, %v6369_v27  ;;  %v3928_v25 = vmul.f32 %v3917_v62, %v6362_v34 }
 0xa89   : > { %5145 = vmatpush1.bf16.msra.mxu0 %v5144_v44  ;;  %v5154_v33 = vpack.c.bf16 %v3958_v12, %v3956_v11 }
 0xa8a   : > { %v3914_v51 = vpop.permute.xlu0 %3913  ;;  %v3944_v54 = vpop.permute.xlu1 %3943  ;;  %5147 = vmatprep.subr.bf16.mxu0 %v5146_v26 }
 0xa8b   : > { %v3918_v22 = vsel %vm1395_vm11, %v3906_v31, %v3914_v51  ;;  %v3922_v61 = vsel %vm1395_vm11, %v3914_v51, %v3906_v31  ;;  %v3949_v31 = vsel %vm1436_vm12, %v3936_v58, %v3944_v54  ;;  %v3953_v52 = vsel %vm1436_vm12, %v3944_v54, %v3936_v58 }
 0xa8c   : > { %v3929_v21 = vmul.f32 %v3922_v61, %v6369_v27  ;;  %v3930_v7 = vmul.f32 %v3918_v22, %v6362_v34  ;;  %v3959_v17 = vmul.f32 %v3953_v52, %v6409_v42  ;;  %v3960_v13 = vmul.f32 %v3949_v31, %v6402_v15 }
 0xa8d   : > { %5149 = vmatpush1.bf16.msra.mxu0 %v5148_v36  ;;  %v9199_v58 = vpack.c.bf16 %v8802_v59, %v8799_v48  ;;  %v9200_v48 = vpack.c.bf16 %v8824_v16, %v8818_v47  ;;  %v9201_v47 = vpack.c.bf16 %v8821_v24, %v8815_v30  ;;  %v9203_v52 = vpack.c.bf16 %v8845_v0, %v8839_v3 }
 0xa8e   : > { %v5152_v45 = vpack.c.bf16 %v3929_v21, %v3927_v4  ;;  %v8918_v55 = vpop.permute.xlu0 %4037  ;;  %v3976_v38 = vpop.permute.xlu1 %3975  ;;  %v5150_v50 = vpack.c.bf16 %v3930_v7, %v3928_v25 }
 0xa90   : > { %5151 = vmatprep.subr.bf16.mxu0 %v5150_v50 }
 0xa91   : > { %5153 = vmatpush1.bf16.msra.mxu0 %v5152_v45  ;;  %v5176_v45 = vpack.c.bf16 %v8662_v63, %v8655_v35  ;;  %v9202_v63 = vpack.c.bf16 %v8848_v6, %v8842_v53 }
 0xa92   : > { %v3946_v27 = vpop.permute.xlu0 %3945  ;;  %v4008_v44 = vpop.permute.xlu1 %4007  ;;  %5155 = vmatprep.subr.bf16.mxu0 %v5154_v33 }
 0xa93   : > { %v3950_v34 = vsel %vm1436_vm12, %v3938_v37, %v3946_v27  ;;  %v3954_v49 = vsel %vm1436_vm12, %v3946_v27, %v3938_v37  ;;  %v3981_v37 = vsel %vm1477_vm13, %v8854_v29, %v3976_v38 }
 0xa94   : > { %v3961_v26 = vmul.f32 %v3954_v49, %v6409_v42  ;;  %v3962_v40 = vmul.f32 %v3950_v34, %v6402_v15  ;;  %v3985_v42 = vsel %vm1477_vm13, %v3976_v38, %v8854_v29  ;;  %v3992_v22 = vmul.f32 %v3981_v37, %v6443_v43 }
 0xa95   : > { %5157 = vmatpush1.bf16.msra.mxu0 %v9199_v58  ;;  %v3991_v12 = vmul.f32 %v3985_v42, %v6473_v20  ;;  %v9204_v42 = vld [vmem:[#allocation22_spill] sm:$0xff] }
 0xa96   : > { %v5160_v62 = vpack.c.bf16 %v3961_v26, %v3959_v17  ;;  %v8935_v46 = vpop.permute.xlu0 %4033  ;;  %v4036_v23 = vpop.permute.xlu1 %4035  ;;  %v5158_v51 = vpack.c.bf16 %v3962_v40, %v3960_v13 }
 0xa98   : > { %5159 = vmatprep.subr.bf16.mxu0 %v5158_v51 }
 0xa99   : > { %5161 = vmatpush1.bf16.msra.mxu0 %v5160_v62 }
 0xa9a   : > { %v3978_v15 = vpop.permute.xlu0 %3977  ;;  %v4032_v54 = vpop.permute.xlu1 %4031  ;;  %5163 = vmatprep.subr.bf16.mxu0 %v9200_v48 }
 0xa9b   : > { %v3982_v59 = vsel %vm1477_vm13, %v8856_v2, %v3978_v15  ;;  %v3986_v36 = vsel %vm1477_vm13, %v3978_v15, %v8856_v2  ;;  %v5170_v2 = vpack.c.bf16 %v8634_v8, %v8627_v32  ;;  %v4013_v32 = vsel %vm1518_vm14, %v8858_v57, %v4008_v44 }
 0xa9c   : > { %v3993_v29 = vmul.f32 %v3986_v36, %v6473_v20  ;;  %v3994_v61 = vmul.f32 %v3982_v59, %v6443_v43  ;;  %v5172_v20 = vpack.c.bf16 %v8606_v14, %v8600_v1  ;;  %v5174_v43 = vpack.c.bf16 %v8690_v10, %v8683_v5 }
 0xa9d   : > { %5165 = vmatpush1.bf16.msra.mxu0 %v9201_v47  ;;  %v4017_v8 = vsel %vm1518_vm14, %v4008_v44, %v8858_v57  ;;  %v4047_v1 = vsel %vm1559_vm15, %v4036_v23, %v8873_v9  ;;  %v4048_v14 = vsel %vm1559_vm15, %v8918_v55, %v8892_v19  ;;  %v4023_v10 = vmul.f32 %v4013_v32, %v6524_v60 }
 0xa9e   : > { %v5168_v16 = vpack.c.bf16 %v3993_v29, %v3991_v12  ;;  %v4062_v4 = vpop.permute.xlu0 %4061  ;;  %v4040_v25 = vpop.permute.xlu1 %4039  ;;  %v5166_v21 = vpack.c.bf16 %v3994_v61, %v3992_v22  ;;  %v4043_v57 = vsel %vm1559_vm15, %v8873_v9, %v4036_v23  ;;  %v4024_v33 = vmul.f32 %v4017_v8, %v6509_v41  ;;  %v9205_v12 = vld [vmem:[#allocation23_spill] sm:$0xff] }
 0xa9f   : > { %v4052_v31 = vmul.f32 %v4047_v1, %v9176_v18  ;;  %v4044_v9 = vsel %vm1559_vm15, %v8892_v19, %v8918_v55  ;;  %v4054_v27 = vmul.f32 %v4048_v14, %v9176_v18  ;;  %v4049_v19 = vsel %vm1559_vm15, %v4040_v25, %v4032_v54 }
 0xaa0   : > { %5167 = vmatprep.subr.bf16.mxu0 %v5166_v21  ;;  %v4056_v37 = vmul.f32 %v4049_v19, %v9176_v18 }
 0xaa1   : > { %5169 = vmatpush1.bf16.msra.mxu0 %v5168_v16  ;;  %v5186_v13 = vpack.c.bf16 %v4054_v27, %v4052_v31 }
 0xaa2   : > { %v4070_v7 = vpop.permute.xlu0 %4069  ;;  %v4060_v11 = vpop.permute.xlu1 %4059  ;;  %5171 = vmatprep.subr.bf16.mxu0 %v5170_v2  ;;  %v4125_v2 = vld [vmem:[#allocation7 + $0x10] sm:$0xff] }
 0xaa3   : > { %v4080_v58 = vsel %vm1600_vm2, %v4070_v7, %v4062_v4  ;;  %v4076_v59 = vsel %vm1600_vm2, %v4062_v4, %v4070_v7 }
 0xaa4   : > { %v4086_v36 = vmul.f32 %v4080_v58, %v9204_v42 }
 0xaa5   : > { %5173 = vmatpush1.bf16.msra.mxu0 %v5172_v20 }
 0xaa6   : > { %v8965_v30 = vpop.permute.xlu0 %4065  ;;  %v4068_v24 = vpop.permute.xlu1 %4067  ;;  %5175 = vmatprep.subr.bf16.mxu0 %v5174_v43 }
 0xaa7   : > { %v4079_v3 = vsel %vm1600_vm2, %v4068_v24, %v4060_v11  ;;  %v4075_v62 = vsel %vm1600_vm2, %v4060_v11, %v4068_v24 }
 0xaa8   : > { %v4084_v15 = vmul.f32 %v4079_v3, %v9204_v42  ;;  %v4083_v22 = vmul.f32 %v4075_v62, %v9205_v12 }
 0xaa9   : > { %5177 = vmatpush1.bf16.msra.mxu0 %v5176_v45  ;;  %v4131_v45 = vld [vmem:[#allocation7 + $0x40] sm:$0xff] }
 0xaaa   : > { %v4010_v5 = vpop.permute.xlu0 %4009  ;;  %v4064_v35 = vpop.permute.xlu1 %4063  ;;  %5179 = vmatprep.subr.bf16.mxu0 %v9202_v63 }
 0xaab   : > { %v4014_v38 = vsel %vm1518_vm14, %v8860_v56, %v4010_v5  ;;  %v4018_v50 = vsel %vm1518_vm14, %v4010_v5, %v8860_v56  ;;  %v4051_v56 = vmul.f32 %v4043_v57, %v9178_v28  ;;  %v9206_v5 = vld [vmem:[#allocation21_spill] sm:$0xff] }
 0xaac   : > { %v4025_v53 = vmul.f32 %v4014_v38, %v6524_v60  ;;  %v4026_v6 = vmul.f32 %v4018_v50, %v6509_v41  ;;  %v4045_v41 = vsel %vm1559_vm15, %v4032_v54, %v4040_v25  ;;  %v4053_v60 = vmul.f32 %v4044_v9, %v9178_v28  ;;  %v4130_v38 = vld [vmem:[#allocation7 + $0x38] sm:$0xff] }
 0xaad   : > { %5181 = vmatpush1.bf16.msra.mxu0 %v9203_v52  ;;  %v4055_v55 = vmul.f32 %v4045_v41, %v9178_v28  ;;  %v5194_v25 = vpack.c.bf16 %v4086_v36, %v4084_v15 }
 0xaae   : > { %v5184_v44 = vpack.c.bf16 %v4025_v53, %v4023_v10  ;;  %v4094_v34 = vpop.permute.xlu0 %4093  ;;  %v4072_v49 = vpop.permute.xlu1 %4071  ;;  %v5182_v17 = vpack.c.bf16 %v4026_v6, %v4024_v33  ;;  %v5188_v0 = vpack.c.bf16 %v4053_v60, %v4051_v56  ;;  %v9207_v6 = vld [vmem:[#allocation29_spill] sm:$0xff] }
 0xaaf   : > { %v4077_v16 = vsel %vm1600_vm2, %v4064_v35, %v4072_v49 }
 0xab0   : > { %5183 = vmatprep.subr.bf16.mxu0 %v5182_v17  ;;  %v4087_v11 = vmul.f32 %v4077_v16, %v9205_v12 }
 0xab1   : > { %5185 = vmatpush1.bf16.msra.mxu0 %v5184_v44  ;;  %v9208_v44 = vmov 0.0  }
 0xab2   : > { %v4042_v26 = vpop.permute.xlu0 %4041  ;;  %v4092_v40 = vpop.permute.xlu1 %4091  ;;  %5187 = vmatprep.subr.bf16.mxu0 %v5186_v13 }
 0xab3   : > { %v4046_v23 = vsel %vm1559_vm15, %v8935_v46, %v4042_v26  ;;  %v4050_v51 = vsel %vm1559_vm15, %v4042_v26, %v8935_v46  ;;  %v4127_v26 = vld [vmem:[#allocation7 + $0x20] sm:$0xff] }
 0xab4   : > { %v4057_v54 = vmul.f32 %v4046_v23, %v9178_v28  ;;  %v4058_v48 = vmul.f32 %v4050_v51, %v9176_v18  ;;  %v4081_v28 = vsel %vm1600_vm2, %v4072_v49, %v4064_v35  ;;  %v4085_v18 = vmul.f32 %v4076_v59, %v9205_v12 }
 0xab5   : > { %5189 = vmatpush1.bf16.msra.mxu0 %v5188_v0  ;;  %v4088_v20 = vmul.f32 %v4081_v28, %v9204_v42 }
 0xab6   : > { %v5192_v29 = vpack.c.bf16 %v4057_v54, %v4055_v55  ;;  %v4102_v61 = vpop.permute.xlu0 %4101  ;;  %v4100_v47 = vpop.permute.xlu1 %4099  ;;  %v5190_v46 = vpack.c.bf16 %v4058_v48, %v4056_v37  ;;  %v5196_v7 = vpack.c.bf16 %v4085_v18, %v4083_v22 }
 0xab7   : > { %v4112_v4 = vsel %vm1641_vm3, %v4102_v61, %v4094_v34  ;;  %v4111_v21 = vsel %vm1641_vm3, %v4100_v47, %v4092_v40  ;;  %v4108_v32 = vsel %vm1641_vm3, %v4094_v34, %v4102_v61  ;;  %v4107_v8 = vsel %vm1641_vm3, %v4092_v40, %v4100_v47 }
 0xab8   : > { %5191 = vmatprep.subr.bf16.mxu0 %v5190_v46  ;;  %v4118_v35 = vmul.f32 %v9206_v5, %v4112_v4  ;;  %v4116_v63 = vmul.f32 %v9206_v5, %v4111_v21  ;;  %v4117_v9 = vmul.f32 %v9207_v6, %v4108_v32 }
 0xab9   : > { %5193 = vmatpush1.bf16.msra.mxu0 %v5192_v29 }
 0xaba   : > { %v4074_v43 = vpop.permute.xlu0 %4073  ;;  %v4096_v24 = vpop.permute.xlu1 %4095  ;;  %5195 = vmatprep.subr.bf16.mxu0 %v5194_v25  ;;  %v5202_v52 = vpack.c.bf16 %v4118_v35, %v4116_v63  ;;  %v5616_v63 = vmov 1966171168  }
 0xabb   : > { %v4078_v1 = vsel %vm1600_vm2, %v8965_v30, %v4074_v43  ;;  %v4082_v14 = vsel %vm1600_vm2, %v4074_v43, %v8965_v30  ;;  %v4115_v30 = vmul.f32 %v9207_v6, %v4107_v8 }
 0xabc   : > { %v4089_v10 = vmul.f32 %v4078_v1, %v9205_v12  ;;  %v4090_v57 = vmul.f32 %v4082_v14, %v9204_v42  ;;  %4281 = vmatmul.mubr.f32.vlgmr.msra.gmra.mrb[30].mxu0 %v4125_v2 }
 0xabd   : > { %5197 = vmatpush1.bf16.msra.mxu0 %v5196_v7  ;;  %4286 = vmatprep.mubr.f32.mxu0 %v4131_v45  ;;  %v5204_v49 = vpack.c.bf16 %v4117_v9, %v4115_v30  ;;  %v9209_v9 = vld [vmem:[#allocation12_spill] sm:$0xff] }
 0xabe   : > { %v5200_v50 = vpack.c.bf16 %v4089_v10, %v4087_v11  ;;  %v4098_v33 = vpop.permute.xlu0 %4097  ;;  %v4104_v31 = vpop.permute.xlu1 %4103  ;;  %v5198_v53 = vpack.c.bf16 %v4090_v57, %v4088_v20  ;;  %v4438_v10 = vunpack.c.l.s4 %v5616_v63 }
 0xabf   : > { %v4109_v27 = vsel %vm1641_vm3, %v4096_v24, %v4104_v31  ;;  %v4113_v56 = vsel %vm1641_vm3, %v4104_v31, %v4096_v24 }
 0xac0   : > { %5199 = vmatprep.subr.bf16.mxu0 %v5198_v53  ;;  %4287 = vmatmul.mubr.f32.gmra.mrb[32].mxu0 %v4130_v38  ;;  %v4119_v60 = vmul.f32 %v9207_v6, %v4109_v27  ;;  %v4120_v13 = vmul.f32 %v9206_v5, %v4113_v56  ;;  %v4439_v53 = vunpack.c.0.s8 %v4438_v10  ;;  %v9211_v56 = vld [vmem:[#allocation14_spill] sm:$0xff] }
 0xac1   : > { %5201 = vmatpush1.bf16.msra.mxu0 %v5200_v50  ;;  %4357 = vmatprep.mubr.f32.mxu0 %v9208_v44 }
 0xac2   : > { %v4106_v34 = vpop.permute.xlu0 %4105  ;;  %5203 = vmatprep.subr.bf16.mxu0 %v5202_v52  ;;  %v9210_v52 = vld [vmem:[#allocation13_spill] sm:$0xff] }
 0xac3   : > { %v4110_v17 = vsel %vm1641_vm3, %v4098_v33, %v4106_v34  ;;  %v4114_v41 = vsel %vm1641_vm3, %v4106_v34, %v4098_v33  ;;  %v9212_v34 = vld [vmem:[#allocation16_spill] sm:$0xff] }
 0xac4   : > { %v4121_v19 = vmul.f32 %v9207_v6, %v4110_v17  ;;  %v4122_v3 = vmul.f32 %v9206_v5, %v4114_v41  ;;  %v9213_v17 = vld [vmem:[#allocation15_spill] sm:$0xff] }
 0xac5   : > { %5205 = vmatpush1.bf16.msra.mxu0 %v5204_v49  ;;  %v4442_v49 = vsub.s32 %v4439_v53, %v9212_v34 }
 0xac6   : > { %v5208_v0 = vpack.c.bf16 %v4121_v19, %v4119_v60  ;;  %v5206_v55 = vpack.c.bf16 %v4122_v3, %v4120_v13  ;;  %v9214_v19 = vlaneseq }
 0xac8   : > { %5207 = vmatprep.subr.bf16.mxu0 %v5206_v55 }
 0xac9   : > { %5209 = vmatpush1.bf16.msra.mxu0 %v5208_v0 }
 0xacc   : > { %4661 = vmatmul.mubr.msk.f32.vlgmr.msra.gmra.mrb[30].mxu0 %vm494_vm0, %v4127_v26 }
 0xacd   : > { %4363 = vmatprep.mubr.f32.mxu0 %v9208_v44 }
 0xacf   : > { %v4372_v40 = vpop.permute.xlu1 %4371 }
 0xad0   : > { %4662 = vmatmul.mubr.msk.f32.gmra.mrb[32].mxu0 %vm494_vm0, %v4132_v39  ;;  %vm4454_vm0 = vcmp.lt.s32.totalorder %v9214_v19, 256 }
 0xad3   : > { %v4376_v42 = vpop.permute.xlu0 %4375 }
 0xad4   : > { %v4384_v58 = vpop.permute.xlu1 %4383 }
 0xad8   : > { %v4388_v59 = vpop.permute.xlu1 %4387  ;;  %v4400_v46 = vpop.permute.xlu0 %4399 }
 0xadd   : > { %v4404_v28 = vpop.permute.xlu1 %4403 }
 0xae2   : > { %v4426_v57 = vpop.permute.xlu1 %4425 }
 0xb9f   : > { %v4359_v62 = vpop.f32.mrb[30].mxu0 }
 0xba0   : > { %v4378_v23 = vmul.f32 %v4372_v40, %v4359_v62  ;;  %v4361_v51 = vpop.f32.mrb[31].mxu0 }
 0xba1   : > { %v4379_v37 = vmul.f32 %v4372_v40, %v4361_v51 }
 0xba2   : > { %v4390_v15 = vadd.f32 %v4384_v58, %v4378_v23 }
 0xba3   : > { %v4391_v54 = vadd.f32 %v4384_v58, %v4379_v37  ;;  %v4365_v48 = vpop.f32.mrb[32].mxu0 }
 0xba4   : > { %v4380_v36 = vmul.f32 %v4376_v42, %v4365_v48  ;;  %v4367_v12 = vpop.f32.mrb[33].mxu0  ;;  %v4394_v29 = vmax.f32 %v4390_v15, 0.0 }
 0xba5   : > { %v4381_v22 = vmul.f32 %v4376_v42, %v4367_v12  ;;  %v4395_v47 = vmax.f32 %v4391_v54, 0.0 }
 0xba6   : > { %v4392_v61 = vadd.f32 %v4388_v59, %v4380_v36  ;;  %v4406_v4 = vmul.f32 %v4400_v46, %v4394_v29 }
 0xba7   : > { %v4393_v16 = vadd.f32 %v4388_v59, %v4381_v22  ;;  %v4407_v2 = vmul.f32 %v4400_v46, %v4395_v47 }
 0xba8   : > { %v4396_v18 = vmax.f32 %v4392_v61, 0.0 }
 0xba9   : > { %v4397_v25 = vmax.f32 %v4393_v16, 0.0 }
 0xbaa   : > { %v4408_v21 = vmul.f32 %v4404_v28, %v4396_v18 }
 0xbab   : > { %v4409_v7 = vmul.f32 %v4404_v28, %v4397_v25 }
 0xbac   : > { %v4410_v11 = vadd.f32 %v4408_v21, %v4406_v4 }
 0xbad   : > { %v4417_v20 = vadd.f32 %v4409_v7, %v4407_v2 }
 0xbae   : > { %v4411_v43 = vrot.slane %v4410_v11, 4 }
 0xbaf   : > { %v4418_v24 = vrot.slane %v4417_v20, 4 }
 0xbb0   : > { %v4412_v45 = vadd.f32 %v4411_v43, %v4410_v11 }
 0xbb1   : > { %v4419_v32 = vadd.f32 %v4418_v24, %v4417_v20 }
 0xbb2   : > { %v4413_v8 = vrot.slane %v4412_v45, 2 }
 0xbb3   : > { %v4420_v1 = vrot.slane %v4419_v32, 2 }
 0xbb4   : > { %v4414_v14 = vadd.f32 %v4413_v8, %v4412_v45 }
 0xbb5   : > { %v4421_v5 = vadd.f32 %v4420_v1, %v4419_v32 }
 0xbb6   : > { %v4415_v35 = vrot.slane %v4414_v14, 1 }
 0xbb7   : > { %v4422_v38 = vrot.slane %v4421_v5, 1 }
 0xbb8   : > { %v4416_v50 = vadd.f32 %v4415_v35, %v4414_v14 }
 0xbb9   : > { %v4423_v33 = vadd.f32 %v4422_v38, %v4421_v5 }
 0xbba   : > { %v4428_v31 = vadd.f32 %v4426_v57, %v4416_v50 }
 0xbbb   : > { %v4429_v6 = vadd.f32 %v4426_v57, %v4423_v33 }
 0xbbc   : > { %v4430_v30 = vadd.f32 %v4428_v31, %v9209_v9 }
 0xbbd   : > { %v4431_v27 = vadd.f32 %v4429_v6, %v9210_v52 }
 0xbbe   : > { %v4432_v44 = vadd.f32 %v4430_v30, %v9211_v56 }
 0xbbf   : > { %v4433_v41 = vadd.f32 %v4431_v27, %v9213_v17 }
 0xbc1   : > { %v4436_v60 = vcombine.low %v4432_v44, %v4433_v41 }
 0xbc3   : > { %v4443_v13 = vrot.slane %v4436_v60, %v4442_v49 }
 0xbc5   : > { %v4450_v3 = vrot.slane %v4443_v13, %v4442_v49 }
 0xbc7   : > { %4456 = vst.msk [vmem:[%s444_s19] sm:$0x3] %vm4454_vm0, %v4450_v3 }
 0xbc8 PF: > { %s23_s13 = sadd.s32 1, %s5575_s13  }
 0xbc9   : > { %p20_p1 = scmp.ge.s32.totalorder %s23_s13, 4  }
 0xbcb   :  { %22 = sbr.rel (!%p20_p1) target bundleno = 3 (0x3), region = 117 }
 0xbd2   :  { %4476 = vsyncpa [#allocation3], 1 }
 0xbd3   :  { %4478 = vsyncpa [#allocation3 + $0x1], 1 }
 0xbd4   :  { %4479 = vsyncpa [#allocation5], 1 }
 0xbd5   :  { %4480 = vsyncpa [#allocation8], 1 }

</bundles_post_ra>
